<compile_context>
chip_gen: v5e
topology: v5e:2x2
jax: 0.10.0
libtpu: 0.0.40
codegen_flags: <defaults>
</compile_context>

<pallas_src>
import functools

import jax
import jax.numpy as jnp
from jax.experimental import pallas as pl
from jax.experimental.pallas import tpu as pltpu


_BIG = 1e30  # added to ||e||^2 of padded codebook rows so they never win the argmin


def _round_up(x, m):
    return (x + m - 1) // m * m


def _cdiv(a, b):
    return -(-a // b)


def _vq_kernel(x_ref, x2_ref, em2_ref, e2_ref,
               q_ref, idx_ref, mind_ref, loss_ref,
               run_min, run_arg, q_acc, *,
               n_rows, tn, tk, d_real):
    """Grid = (row tiles, codebook blocks).  Running min/argmin/gathered-row
    accumulators live in VMEM scratch; outputs are written on the last block."""
    i = pl.program_id(0)
    k = pl.program_id(1)
    nk = pl.num_programs(1)

    @pl.when(k == 0)
    def _():
        run_min[...] = jnp.full_like(run_min, jnp.inf)
        run_arg[...] = jnp.zeros_like(run_arg)
        q_acc[...] = jnp.zeros_like(q_acc)

    x = x_ref[...]                       # (tn, Dp)
    em2 = em2_ref[...]                   # (tk, Dp) == -2 * codebook block
    e2 = e2_ref[...]                     # (1, tk), padded entries = +_BIG

    # Reduced distance ||e||^2 - 2 x.e (per-row ||x||^2 dropped: argmin-invariant).
    # The -2 scale is pre-folded into em2, so this is a single MXU matmul
    # (codebook fed untransposed: contract dim 1 with dim 1) plus one add.
    xe = jax.lax.dot_general(x, em2, (((1,), (1,)), ((), ())),
                             preferred_element_type=jnp.float32)     # (tn, tk)
    red = xe + e2

    blk_min = jnp.min(red, axis=1, keepdims=True)                    # (tn, 1)
    iota = jax.lax.broadcasted_iota(jnp.int32, red.shape, 1)          # (tn, tk)
    local = jnp.min(jnp.where(red <= blk_min, iota, tk), axis=1,
                    keepdims=True)                                    # first-index argmin
    onehot = (iota == local).astype(jnp.float32)                      # (tn, tk)
    qm2 = jnp.dot(onehot, em2, preferred_element_type=jnp.float32)    # (tn, Dp) = -2*e[arg]

    better = blk_min < run_min[...]       # strict <: earlier block wins ties
    run_min[...] = jnp.where(better, blk_min, run_min[...])
    run_arg[...] = jnp.where(better, local + k * tk, run_arg[...])
    q_acc[...] = jnp.where(better, qm2, q_acc[...])

    @pl.when(k == nk - 1)
    def _():
        q = q_acc[...] * (-0.5)                      # exact e[argmin] (power-of-2 scale)
        q_ref[...] = q[:, :d_real]                   # lane-masked store if D % 128 != 0
        idx_ref[...] = run_arg[...].reshape(1, 1, tn)
        mind_ref[...] = run_min[...].reshape(1, 1, tn) + x2_ref[...]
        # Partial of sum((quantized - x)^2); row mask applied after the axis-1 reduce.
        diff = q - x
        per_row = jnp.sum(diff * diff, axis=1, keepdims=True)        # (tn, 1)
        row = jax.lax.broadcasted_iota(jnp.int32, (tn, 1), 0) + i * tn
        loss_ref[...] = jnp.sum(jnp.where(row < n_rows, per_row, 0.0)).reshape(1, 1, 1)


def vector_quantizer_forward(inputs, embedding_weight, *, commitment_cost=0.25,
                             use_ema=False, tn=256, max_tk=None):
    """Forward pass of VectorQuantizer (non-packed, eval mode).

    inputs:           (B, T, D) float32
    embedding_weight: (K, D)    float32
    tn:     row-tile size (sweep 512-1024 on v5e/v6e for large N; default 256).
    max_tk: optional cap on the codebook block size (else derived from the VMEM budget).
    """
    B, T, D = inputs.shape
    K, De = embedding_weight.shape
    assert De == D
    N = B * T
    f32 = jnp.float32

    Dp = _round_up(D, 128)

    # ---- row tiling: clamp for tiny inputs; keep G >= 2 when possible so the
    # "parallel" row axis can shard across both v7x TensorCores.
    tn = max(128, min(_round_up(tn, 128), _round_up(N, 128)))
    if N > 128 and _round_up(N, tn) // tn < 2:
        tn = max(128, _round_up(_cdiv(N, 2), 128))
    Np = _round_up(N, tn)
    G = Np // tn

    # ---- per-generation VMEM budget -> codebook block size tk and scoped limit.
    try:
        vmem_cap = pltpu.get_tpu_info().vmem_capacity_bytes
    except Exception:
        vmem_cap = 64 * 1024 * 1024           # conservative fallback (v7x-sized)
    budget = vmem_cap * 3 // 4                # headroom for compiler scratch / spill

    def _vmem_bytes(tk_):
        kb = _cdiv(K, tk_)
        cb_bufs = 1 if kb == 1 else 2         # grid-invariant codebook -> single buffer
        b = 2 * tn * Dp * 4                   # x row tile (double-buffered)
        b += 2 * tn * 4                       # ||x||^2 row tile
        b += cb_bufs * tk_ * Dp * 4           # -2*codebook block
        b += cb_bufs * tk_ * 4                # ||e||^2 block
        b += 2 * tn * max(D, 128) * 4         # quantized output block
        b += 2 * (2 * tn + 128) * 4           # idx / min_dist / loss output blocks
        b += (2 * 128 + Dp) * tn * 4          # scratch: run_min, run_arg, q_acc
        b += 4 * tn * tk_ * 4                 # (tn, tk) distance-plane temporaries
        return b

    tk = _round_up(K, 128)
    if max_tk is not None:
        tk = min(tk, max(128, _round_up(max_tk, 128)))
    while tk > 128 and _vmem_bytes(tk) > budget:
        tk = max(128, _round_up(tk // 2, 128))
    Kp = _round_up(K, tk)
    KB = Kp // tk
    vmem_limit = int(min(budget, max(32 * 1024 * 1024, 2 * _vmem_bytes(tk))))

    # ---- operand prep (padding + hoisted reductions / scaling done once in XLA).
    flat = inputs.reshape(N, D).astype(f32)
    x_pad = jnp.pad(flat, ((0, Np - N), (0, Dp - D)))
    x2_pad = jnp.pad(jnp.sum(flat * flat, axis=1), (0, Np - N)).reshape(G, 1, tn)
    e = embedding_weight.astype(f32)
    em2_pad = jnp.pad(e * (-2.0), ((0, Kp - K), (0, Dp - D)))        # -2*e, padded rows 0
    e2_pad = jnp.pad(jnp.sum(e * e, axis=1), (0, Kp - K),
                     constant_values=_BIG).reshape(1, Kp)

    kernel = functools.partial(_vq_kernel, n_rows=N, tn=tn, tk=tk, d_real=D)

    def _make_call(single_buffer_codebook):
        cb_kwargs = ({"pipeline_mode": pl.Buffered(1)}
                     if (single_buffer_codebook and KB == 1) else {})
        return pl.pallas_call(
            kernel,
            out_shape=(
                jax.ShapeDtypeStruct((Np, D), f32),            # quantized (flat)
                jax.ShapeDtypeStruct((G, 1, tn), jnp.int32),   # encoding indices
                jax.ShapeDtypeStruct((G, 1, tn), f32),         # min distances
                jax.ShapeDtypeStruct((G, 1, 1), f32),          # per-tile loss partials
            ),
            grid_spec=pltpu.PrefetchScalarGridSpec(
                num_scalar_prefetch=0,
                grid=(G, KB),
                in_specs=[
                    pl.BlockSpec((tn, Dp), lambda i, k: (i, 0)),              # input rows
                    pl.BlockSpec((1, 1, tn), lambda i, k: (i, 0, 0)),         # ||x||^2
                    pl.BlockSpec((tk, Dp), lambda i, k: (k, 0), **cb_kwargs),  # -2*codebook
                    pl.BlockSpec((1, tk), lambda i, k: (0, k), **cb_kwargs),   # ||e||^2
                ],
                out_specs=(
                    pl.BlockSpec((tn, D), lambda i, k: (i, 0)),
                    pl.BlockSpec((1, 1, tn), lambda i, k: (i, 0, 0)),
                    pl.BlockSpec((1, 1, tn), lambda i, k: (i, 0, 0)),
                    pl.BlockSpec((1, 1, 1), lambda i, k: (i, 0, 0)),
                ),
                scratch_shapes=[
                    pltpu.VMEM((tn, 1), f32),        # running min of reduced distance
                    pltpu.VMEM((tn, 1), jnp.int32),  # running argmin
                    pltpu.VMEM((tn, Dp), f32),       # running -2*e[argmin]
                ],
            ),
            compiler_params=pltpu.CompilerParams(
                dimension_semantics=("parallel", "arbitrary"),
                vmem_limit_bytes=vmem_limit,
            ),
        )

    try:
        q, idx, mind, loss_part = _make_call(True)(x_pad, x2_pad, em2_pad, e2_pad)
        jax.block_until_ready((q, idx, mind, loss_part))
    except Exception:
        # pl.Buffered(1) not accepted on this JAX version: retry with default buffering.
        q, idx, mind, loss_part = _make_call(False)(x_pad, x2_pad, em2_pad, e2_pad)

    loss_sq = jnp.sum(loss_part)
    loss_vq = loss_sq        # forward value of MSE(quantized, x.detach(), 'sum')
    loss_commit = loss_sq    # forward value of MSE(x, quantized.detach(), 'sum')
    loss = loss_commit * commitment_cost + (0.0 if use_ema else loss_vq)

    quantized = q[:N].reshape(B, T, D)       # row-slice only; D is already exact
    quantized_st = quantized                 # straight-through: forward value == quantized
    encoding_indices = idx.reshape(-1)[:N].reshape(B, T)
    min_distances = mind.reshape(-1)[:N].reshape(B, T)

    return {
        'quantized': quantized_st,
        'loss': loss,
        'encoding_indices': encoding_indices,
        'min_distances': min_distances,
        'loss_commit': loss_commit,
        'loss_theta': 0,
    }


def _check_against_reference(out, inputs, embedding_weight,
                             commitment_cost=0.25, use_ema=False):
    """Tie-tolerant comparison against a pure-JAX reference of the torch forward."""
    B, T, D = inputs.shape
    flat = inputs.reshape(-1, D).astype(jnp.float32)
    e = embedding_weight.astype(jnp.float32)
    dist = (jnp.sum(flat ** 2, axis=1, keepdims=True) + jnp.sum(e ** 2, axis=1)
            - 2.0 * jnp.dot(flat, e.T, precision=jax.lax.Precision.HIGHEST))
    ref_min = jnp.min(dist, axis=1)
    ref_idx = jnp.argmin(dist, axis=1)

    got_idx = out['encoding_indices'].reshape(-1)
    got_min = out['min_distances'].reshape(-1)
    got_q = out['quantized'].reshape(-1, D)

    # 1. the chosen entry is (numerically) optimal; exact index match when unambiguous.
    sel = jnp.take_along_axis(dist, got_idx[:, None], axis=1)[:, 0]
    assert bool(jnp.all(sel <= ref_min + 1e-2))
    top2 = jnp.sort(dist, axis=1)[:, :2]
    unambiguous = (top2[:, 1] - top2[:, 0]) > 1e-2
    assert bool(jnp.all(jnp.where(unambiguous, got_idx == ref_idx, True)))
    # 2. quantized rows are exactly the chosen codebook rows; min distances match.
    assert bool(jnp.allclose(got_q, e[got_idx], atol=1e-4))
    assert bool(jnp.allclose(got_min, ref_min, atol=2e-3, rtol=2e-3))
    # 3. loss.
    loss_sq = jnp.sum((e[ref_idx] - flat) ** 2)
    ref_loss = loss_sq * commitment_cost + (0.0 if use_ema else loss_sq)
    assert bool(jnp.allclose(out['loss'], ref_loss, rtol=1e-3, atol=1e-2))


if __name__ == "__main__":
    key = jax.random.PRNGKey(0)
    k1, k2, k3, k4 = jax.random.split(key, 4)

    # Test 1: module-consistent tiny shapes (batch=2, seq=8, hidden=32, K=16);
    # single codebook block (KB == 1) -> single-buffered codebook path.
    B, T, D, K = 2, 8, 32, 16
    inputs = jax.random.normal(k1, (B, T, D), dtype=jnp.float32)
    emb = jax.random.normal(k2, (K, D), dtype=jnp.float32)   # nn.Embedding init ~ N(0,1)
    out = vector_quantizer_forward(inputs, emb, commitment_cost=0.25, use_ema=False)
    jax.block_until_ready(out)
    _check_against_reference(out, inputs, emb)

    # Test 2: exercises the K-blocked accumulator path (KB > 1), multiple row
    # tiles (G >= 2), padded rows and a non-128-multiple D.
    B2, T2, D2, K2 = 4, 96, 32, 256
    inputs2 = jax.random.normal(k3, (B2, T2, D2), dtype=jnp.float32)
    emb2 = jax.random.normal(k4, (K2, D2), dtype=jnp.float32)
    out2 = vector_quantizer_forward(inputs2, emb2, commitment_cost=0.25,
                                    use_ema=False, tn=256, max_tk=128)
    jax.block_until_ready(out2)
    _check_against_reference(out2, inputs2, emb2)

    print("KERNEL_OK")
</pallas_src>

<mosaic_0001>
module attributes {stable_mosaic.version = 11 : i64} {
  func.func @_vq_kernel(%arg0: i32, %arg1: i32, %arg2: memref<128x128xf32, #tpu.memory_space<vmem>>, %arg3: memref<1x1x128xf32, #tpu.memory_space<vmem>>, %arg4: memref<128x128xf32, #tpu.memory_space<vmem>>, %arg5: memref<1x128xf32, #tpu.memory_space<vmem>>, %arg6: memref<128x32xf32, #tpu.memory_space<vmem>>, %arg7: memref<1x1x128xi32, #tpu.memory_space<vmem>>, %arg8: memref<1x1x128xf32, #tpu.memory_space<vmem>>, %arg9: memref<1x1x1xf32, #tpu.memory_space<vmem>>, %arg10: memref<128x1xf32, #tpu.memory_space<vmem>>, %arg11: memref<128x1xi32, #tpu.memory_space<vmem>>, %arg12: memref<128x128xf32, #tpu.memory_space<vmem>>) attributes {dimension_semantics = [#tpu.dimension_semantics<parallel>, #tpu.dimension_semantics<arbitrary>], iteration_bounds = array<i64: 1, 1>, scalar_prefetch = 0 : i64, scratch_operands = 3 : i64, tpu.core_type = #tpu.core_type<tc>, window_params = [{transform_indices = @transform_0, window_bounds = array<i64: 128, 128>}, {transform_indices = @transform_1, window_bounds = array<i64: 1, 1, 128>}, {pipeline_mode = #tpu.pipeline_mode<synchronous>, transform_indices = @transform_2, window_bounds = array<i64: 128, 128>}, {pipeline_mode = #tpu.pipeline_mode<synchronous>, transform_indices = @transform_3, window_bounds = array<i64: 1, 128>}, {transform_indices = @transform_4, window_bounds = array<i64: 128, 32>}, {transform_indices = @transform_5, window_bounds = array<i64: 1, 1, 128>}, {transform_indices = @transform_6, window_bounds = array<i64: 1, 1, 128>}, {transform_indices = @transform_7, window_bounds = array<i64: 1, 1, 1>}]} {
    %c0_i32 = arith.constant 0 : i32
    %0 = arith.cmpi eq, %arg1, %c0_i32 : i32
    %1 = arith.extui %0 : i1 to i32
    %c0_i32_0 = arith.constant 0 : i32
    %2 = arith.cmpi ne, %1, %c0_i32_0 : i32
    scf.if %2 {
      %cst_26 = arith.constant 0x7F800000 : f32
      %42 = vector.broadcast %cst_26 : f32 to vector<128x1xf32>
      %c0_27 = arith.constant 0 : index
      %c0_28 = arith.constant 0 : index
      %43 = vector.load %arg10[%c0_27, %c0_28] : memref<128x1xf32, #tpu.memory_space<vmem>>, vector<128x1xf32>
      tpu.vector_store %arg10[%c0_27, %c0_28], %42 {strides = array<i32>} : memref<128x1xf32, #tpu.memory_space<vmem>>, vector<128x1xf32>,
      %c0_i32_29 = arith.constant 0 : i32
      %44 = vector.broadcast %c0_i32_29 : i32 to vector<128x1xi32>
      %c0_30 = arith.constant 0 : index
      %c0_31 = arith.constant 0 : index
      %45 = vector.load %arg11[%c0_30, %c0_31] : memref<128x1xi32, #tpu.memory_space<vmem>>, vector<128x1xi32>
      tpu.vector_store %arg11[%c0_30, %c0_31], %44 {strides = array<i32>} : memref<128x1xi32, #tpu.memory_space<vmem>>, vector<128x1xi32>,
      %cst_32 = arith.constant 0.000000e+00 : f32
      %46 = vector.broadcast %cst_32 : f32 to vector<128x128xf32>
      %c0_33 = arith.constant 0 : index
      %c0_34 = arith.constant 0 : index
      %47 = vector.load %arg12[%c0_33, %c0_34] : memref<128x128xf32, #tpu.memory_space<vmem>>, vector<128x128xf32>
      tpu.vector_store %arg12[%c0_33, %c0_34], %46 {strides = array<i32>} : memref<128x128xf32, #tpu.memory_space<vmem>>, vector<128x128xf32>,
    } else {
    }
    %c0 = arith.constant 0 : index
    %c0_1 = arith.constant 0 : index
    %3 = vector.load %arg2[%c0, %c0_1] : memref<128x128xf32, #tpu.memory_space<vmem>>, vector<128x128xf32>
    %c0_2 = arith.constant 0 : index
    %c0_3 = arith.constant 0 : index
    %4 = vector.load %arg4[%c0_2, %c0_3] : memref<128x128xf32, #tpu.memory_space<vmem>>, vector<128x128xf32>
    %c0_4 = arith.constant 0 : index
    %c0_5 = arith.constant 0 : index
    %5 = vector.load %arg5[%c0_4, %c0_5] : memref<1x128xf32, #tpu.memory_space<vmem>>, vector<1x128xf32>
    %cst = arith.constant dense<0.000000e+00> : vector<128x128xf32>
    %6 = tpu.matmul %3, %4, %cst {dimension_numbers = #tpu.dot_dimension_numbers<[1], [1], [0], [0], [0, 0, 1, 0], [], []>} : vector<128x128xf32>, vector<128x128xf32>, vector<128x128xf32> -> vector<128x128xf32>
    %7 = vector.broadcast %5 : vector<1x128xf32> to vector<128x128xf32>
    %8 = arith.addf %6, %7 : vector<128x128xf32>
    %cst_6 = arith.constant dense<0x7F800000> : vector<128xf32>
    %9 = vector.multi_reduction <minimumf>, %8, %cst_6 [1] : vector<128x128xf32> to vector<128xf32>
    %10 = vector.shape_cast %9 : vector<128xf32> to vector<128x1xf32>
    %11 = tpu.iota {dimensions = array<i32: 1>} : vector<128x128xi32>
    %12 = vector.broadcast %10 : vector<128x1xf32> to vector<128x128xf32>
    %13 = arith.cmpf ole, %8, %12 : vector<128x128xf32>
    %c128_i32 = arith.constant 128 : i32
    %14 = vector.broadcast %c128_i32 : i32 to vector<128x128xi32>
    %15 = arith.select %13, %11, %14 : vector<128x128xi1>, vector<128x128xi32>
    %cst_7 = arith.constant dense<2147483647> : vector<128xi32>
    %16 = vector.multi_reduction <minsi>, %15, %cst_7 [1] : vector<128x128xi32> to vector<128xi32>
    %17 = vector.shape_cast %16 : vector<128xi32> to vector<128x1xi32>
    %18 = vector.broadcast %17 : vector<128x1xi32> to vector<128x128xi32>
    %19 = arith.cmpi eq, %11, %18 : vector<128x128xi32>
    %20 = arith.extui %19 : vector<128x128xi1> to vector<128x128xi32>
    %21 = arith.sitofp %20 : vector<128x128xi32> to vector<128x128xf32>
    %cst_8 = arith.constant dense<0.000000e+00> : vector<128x128xf32>
    %22 = tpu.matmul %21, %4, %cst_8 {dimension_numbers = #tpu.dot_dimension_numbers<[1], [0], [0], [1], [0, 0, 1, 1], [], []>} : vector<128x128xf32>, vector<128x128xf32>, vector<128x128xf32> -> vector<128x128xf32>
    %c0_9 = arith.constant 0 : index
    %c0_10 = arith.constant 0 : index
    %23 = vector.load %arg10[%c0_9, %c0_10] : memref<128x1xf32, #tpu.memory_space<vmem>>, vector<128x1xf32>
    %24 = arith.cmpf olt, %10, %23 : vector<128x1xf32>
    %c0_11 = arith.constant 0 : index
    %c0_12 = arith.constant 0 : index
    %25 = vector.load %arg10[%c0_11, %c0_12] : memref<128x1xf32, #tpu.memory_space<vmem>>, vector<128x1xf32>
    %26 = arith.select %24, %10, %25 : vector<128x1xi1>, vector<128x1xf32>
    %c0_13 = arith.constant 0 : index
    %c0_14 = arith.constant 0 : index
    %27 = vector.load %arg10[%c0_13, %c0_14] : memref<128x1xf32, #tpu.memory_space<vmem>>, vector<128x1xf32>
    tpu.vector_store %arg10[%c0_13, %c0_14], %26 {strides = array<i32>} : memref<128x1xf32, #tpu.memory_space<vmem>>, vector<128x1xf32>,
    %c128_i32_15 = arith.constant 128 : i32
    %28 = arith.muli %arg1, %c128_i32_15 : i32
    %29 = vector.broadcast %28 : i32 to vector<128x1xi32>
    %30 = arith.addi %17, %29 : vector<128x1xi32>
    %c0_16 = arith.constant 0 : index
    %c0_17 = arith.constant 0 : index
    %31 = vector.load %arg11[%c0_16, %c0_17] : memref<128x1xi32, #tpu.memory_space<vmem>>, vector<128x1xi32>
    %32 = arith.select %24, %30, %31 : vector<128x1xi1>, vector<128x1xi32>
    %c0_18 = arith.constant 0 : index
    %c0_19 = arith.constant 0 : index
    %33 = vector.load %arg11[%c0_18, %c0_19] : memref<128x1xi32, #tpu.memory_space<vmem>>, vector<128x1xi32>
    tpu.vector_store %arg11[%c0_18, %c0_19], %32 {strides = array<i32>} : memref<128x1xi32, #tpu.memory_space<vmem>>, vector<128x1xi32>,
    %c0_20 = arith.constant 0 : index
    %c0_21 = arith.constant 0 : index
    %34 = vector.load %arg12[%c0_20, %c0_21] : memref<128x128xf32, #tpu.memory_space<vmem>>, vector<128x128xf32>
    %35 = vector.shape_cast %24 : vector<128x1xi1> to vector<128x1xi1>
    %36 = vector.broadcast %35 : vector<128x1xi1> to vector<128x128xi1>
    %37 = arith.select %36, %22, %34 : vector<128x128xi1>, vector<128x128xf32>
    %c0_22 = arith.constant 0 : index
    %c0_23 = arith.constant 0 : index
    %38 = vector.load %arg12[%c0_22, %c0_23] : memref<128x128xf32, #tpu.memory_space<vmem>>, vector<128x128xf32>
    tpu.vector_store %arg12[%c0_22, %c0_23], %37 {strides = array<i32>} : memref<128x128xf32, #tpu.memory_space<vmem>>, vector<128x128xf32>,
    %c0_i32_24 = arith.constant 0 : i32
    %39 = arith.cmpi eq, %arg1, %c0_i32_24 : i32
    %40 = arith.extui %39 : i1 to i32
    %c0_i32_25 = arith.constant 0 : i32
    %41 = arith.cmpi ne, %40, %c0_i32_25 : i32
    scf.if %41 {
      %c0_26 = arith.constant 0 : index
      %c0_27 = arith.constant 0 : index
      %42 = vector.load %arg12[%c0_26, %c0_27] : memref<128x128xf32, #tpu.memory_space<vmem>>, vector<128x128xf32>
      %cst_28 = arith.constant -5.000000e-01 : f32
      %43 = vector.broadcast %cst_28 : f32 to vector<128x128xf32>
      %44 = arith.mulf %42, %43 : vector<128x128xf32>
      %45 = vector.extract_strided_slice %44 {offsets = [0, 0], sizes = [128, 32], strides = [1, 1]} : vector<128x128xf32> to vector<128x32xf32>
      %c0_29 = arith.constant 0 : index
      %c0_30 = arith.constant 0 : index
      %46 = vector.load %arg6[%c0_29, %c0_30] : memref<128x32xf32, #tpu.memory_space<vmem>>, vector<128x32xf32>
      tpu.vector_store %arg6[%c0_29, %c0_30], %45 {strides = array<i32>} : memref<128x32xf32, #tpu.memory_space<vmem>>, vector<128x32xf32>,
      %c0_31 = arith.constant 0 : index
      %c0_32 = arith.constant 0 : index
      %47 = vector.load %arg11[%c0_31, %c0_32] : memref<128x1xi32, #tpu.memory_space<vmem>>, vector<128x1xi32>
      %48 = vector.shape_cast %47 : vector<128x1xi32> to vector<1x1x128xi32>
      %c0_33 = arith.constant 0 : index
      %c0_34 = arith.constant 0 : index
      %c0_35 = arith.constant 0 : index
      %49 = vector.load %arg7[%c0_33, %c0_34, %c0_35] : memref<1x1x128xi32, #tpu.memory_space<vmem>>, vector<1x1x128xi32>
      tpu.vector_store %arg7[%c0_33, %c0_34, %c0_35], %48 {strides = array<i32>} : memref<1x1x128xi32, #tpu.memory_space<vmem>>, vector<1x1x128xi32>,
      %c0_36 = arith.constant 0 : index
      %c0_37 = arith.constant 0 : index
      %50 = vector.load %arg10[%c0_36, %c0_37] : memref<128x1xf32, #tpu.memory_space<vmem>>, vector<128x1xf32>
      %51 = vector.shape_cast %50 : vector<128x1xf32> to vector<1x1x128xf32>
      %c0_38 = arith.constant 0 : index
      %c0_39 = arith.constant 0 : index
      %c0_40 = arith.constant 0 : index
      %52 = vector.load %arg3[%c0_38, %c0_39, %c0_40] : memref<1x1x128xf32, #tpu.memory_space<vmem>>, vector<1x1x128xf32>
      %53 = arith.addf %51, %52 : vector<1x1x128xf32>
      %c0_41 = arith.constant 0 : index
      %c0_42 = arith.constant 0 : index
      %c0_43 = arith.constant 0 : index
      %54 = vector.load %arg8[%c0_41, %c0_42, %c0_43] : memref<1x1x128xf32, #tpu.memory_space<vmem>>, vector<1x1x128xf32>
      tpu.vector_store %arg8[%c0_41, %c0_42, %c0_43], %53 {strides = array<i32>} : memref<1x1x128xf32, #tpu.memory_space<vmem>>, vector<1x1x128xf32>,
      %55 = arith.subf %44, %3 : vector<128x128xf32>
      %56 = arith.mulf %55, %55 : vector<128x128xf32>
      %cst_44 = arith.constant dense<0.000000e+00> : vector<128xf32>
      %57 = vector.multi_reduction <add>, %56, %cst_44 [1] : vector<128x128xf32> to vector<128xf32>
      %58 = vector.shape_cast %57 : vector<128xf32> to vector<128x1xf32>
      %59 = tpu.iota {dimensions = array<i32: 0>} : vector<128x1xi32>
      %c128_i32_45 = arith.constant 128 : i32
      %60 = arith.muli %arg0, %c128_i32_45 : i32
      %61 = vector.broadcast %60 : i32 to vector<128x1xi32>
      %62 = arith.addi %59, %61 : vector<128x1xi32>
      %c16_i32 = arith.constant 16 : i32
      %63 = vector.broadcast %c16_i32 : i32 to vector<128x1xi32>
      %64 = arith.cmpi slt, %62, %63 : vector<128x1xi32>
      %cst_46 = arith.constant 0.000000e+00 : f32
      %65 = vector.broadcast %cst_46 : f32 to vector<128x1xf32>
      %66 = arith.select %64, %58, %65 : vector<128x1xi1>, vector<128x1xf32>
      %67 = vector.shape_cast %66 : vector<128x1xf32> to vector<1x128x1xf32>
      %cst_47 = arith.constant dense<0.000000e+00> : vector<1xf32>
      %68 = vector.multi_reduction <add>, %67, %cst_47 [1, 2] : vector<1x128x1xf32> to vector<1xf32>
      %69 = vector.shape_cast %68 : vector<1xf32> to vector<1x1x1xf32>
      %70 = vector.extract %69[0, 0, 0] : f32 from vector<1x1x1xf32>
      %71 = vector.broadcast %70 : f32 to vector<1x1x1xf32>
      %c0_48 = arith.constant 0 : index
      %c0_49 = arith.constant 0 : index
      %c0_50 = arith.constant 0 : index
      %72 = vector.load %arg9[%c0_48, %c0_49, %c0_50] : memref<1x1x1xf32, #tpu.memory_space<vmem>>, vector<1x1x1xf32>
      tpu.vector_store %arg9[%c0_48, %c0_49, %c0_50], %71 {strides = array<i32>} : memref<1x1x1xf32, #tpu.memory_space<vmem>>, vector<1x1x1xf32>,
    } else {
    }
    return
  }
  func.func @transform_0(%arg0: i32, %arg1: i32) -> (i32, i32) {
    %c0_i32 = arith.constant 0 : i32
    %c0_i32_0 = arith.constant 0 : i32
    return %arg0, %c0_i32 : i32, i32
  }
  func.func @transform_1(%arg0: i32, %arg1: i32) -> (i32, i32, i32) {
    %c0_i32 = arith.constant 0 : i32
    %c0_i32_0 = arith.constant 0 : i32
    %c0_i32_1 = arith.constant 0 : i32
    return %arg0, %c0_i32, %c0_i32_0 : i32, i32, i32
  }
  func.func @transform_2(%arg0: i32, %arg1: i32) -> (i32, i32) {
    %c0_i32 = arith.constant 0 : i32
    %c0_i32_0 = arith.constant 0 : i32
    return %arg1, %c0_i32 : i32, i32
  }
  func.func @transform_3(%arg0: i32, %arg1: i32) -> (i32, i32) {
    %c0_i32 = arith.constant 0 : i32
    %c0_i32_0 = arith.constant 0 : i32
    return %c0_i32, %arg1 : i32, i32
  }
  func.func @transform_4(%arg0: i32, %arg1: i32) -> (i32, i32) {
    %c0_i32 = arith.constant 0 : i32
    %c0_i32_0 = arith.constant 0 : i32
    return %arg0, %c0_i32 : i32, i32
  }
  func.func @transform_5(%arg0: i32, %arg1: i32) -> (i32, i32, i32) {
    %c0_i32 = arith.constant 0 : i32
    %c0_i32_0 = arith.constant 0 : i32
    %c0_i32_1 = arith.constant 0 : i32
    return %arg0, %c0_i32, %c0_i32_0 : i32, i32, i32
  }
  func.func @transform_6(%arg0: i32, %arg1: i32) -> (i32, i32, i32) {
    %c0_i32 = arith.constant 0 : i32
    %c0_i32_0 = arith.constant 0 : i32
    %c0_i32_1 = arith.constant 0 : i32
    return %arg0, %c0_i32, %c0_i32_0 : i32, i32, i32
  }
  func.func @transform_7(%arg0: i32, %arg1: i32) -> (i32, i32, i32) {
    %c0_i32 = arith.constant 0 : i32
    %c0_i32_0 = arith.constant 0 : i32
    %c0_i32_1 = arith.constant 0 : i32
    return %arg0, %c0_i32, %c0_i32_0 : i32, i32, i32
  }
}

module attributes {stable_mosaic.version = 11 : i64} {
  func.func @_vq_kernel(%arg0: i32, %arg1: i32, %arg2: memref<128x128xf32, #tpu.memory_space<vmem>>, %arg3: memref<1x1x128xf32, #tpu.memory_space<vmem>>, %arg4: memref<128x128xf32, #tpu.memory_space<vmem>>, %arg5: memref<1x128xf32, #tpu.memory_space<vmem>>, %arg6: memref<128x32xf32, #tpu.memory_space<vmem>>, %arg7: memref<1x1x128xi32, #tpu.memory_space<vmem>>, %arg8: memref<1x1x128xf32, #tpu.memory_space<vmem>>, %arg9: memref<1x1x1xf32, #tpu.memory_space<vmem>>, %arg10: memref<128x1xf32, #tpu.memory_space<vmem>>, %arg11: memref<128x1xi32, #tpu.memory_space<vmem>>, %arg12: memref<128x128xf32, #tpu.memory_space<vmem>>) attributes {dimension_semantics = [#tpu.dimension_semantics<parallel>, #tpu.dimension_semantics<arbitrary>], iteration_bounds = array<i64: 1, 1>, scalar_prefetch = 0 : i64, scratch_operands = 3 : i64, tpu.core_type = #tpu.core_type<tc>, window_params = [{transform_indices = @transform_0, window_bounds = array<i64: 128, 128>}, {transform_indices = @transform_1, window_bounds = array<i64: 1, 1, 128>}, {transform_indices = @transform_2, window_bounds = array<i64: 128, 128>}, {transform_indices = @transform_3, window_bounds = array<i64: 1, 128>}, {transform_indices = @transform_4, window_bounds = array<i64: 128, 32>}, {transform_indices = @transform_5, window_bounds = array<i64: 1, 1, 128>}, {transform_indices = @transform_6, window_bounds = array<i64: 1, 1, 128>}, {transform_indices = @transform_7, window_bounds = array<i64: 1, 1, 1>}]} {
    %c0_i32 = arith.constant 0 : i32
    %0 = arith.cmpi eq, %arg1, %c0_i32 : i32
    %1 = arith.extui %0 : i1 to i32
    %c0_i32_0 = arith.constant 0 : i32
    %2 = arith.cmpi ne, %1, %c0_i32_0 : i32
    scf.if %2 {
      %cst_26 = arith.constant 0x7F800000 : f32
      %42 = vector.broadcast %cst_26 : f32 to vector<128x1xf32>
      %c0_27 = arith.constant 0 : index
      %c0_28 = arith.constant 0 : index
      %43 = vector.load %arg10[%c0_27, %c0_28] : memref<128x1xf32, #tpu.memory_space<vmem>>, vector<128x1xf32>
      tpu.vector_store %arg10[%c0_27, %c0_28], %42 {strides = array<i32>} : memref<128x1xf32, #tpu.memory_space<vmem>>, vector<128x1xf32>,
      %c0_i32_29 = arith.constant 0 : i32
      %44 = vector.broadcast %c0_i32_29 : i32 to vector<128x1xi32>
      %c0_30 = arith.constant 0 : index
      %c0_31 = arith.constant 0 : index
      %45 = vector.load %arg11[%c0_30, %c0_31] : memref<128x1xi32, #tpu.memory_space<vmem>>, vector<128x1xi32>
      tpu.vector_store %arg11[%c0_30, %c0_31], %44 {strides = array<i32>} : memref<128x1xi32, #tpu.memory_space<vmem>>, vector<128x1xi32>,
      %cst_32 = arith.constant 0.000000e+00 : f32
      %46 = vector.broadcast %cst_32 : f32 to vector<128x128xf32>
      %c0_33 = arith.constant 0 : index
      %c0_34 = arith.constant 0 : index
      %47 = vector.load %arg12[%c0_33, %c0_34] : memref<128x128xf32, #tpu.memory_space<vmem>>, vector<128x128xf32>
      tpu.vector_store %arg12[%c0_33, %c0_34], %46 {strides = array<i32>} : memref<128x128xf32, #tpu.memory_space<vmem>>, vector<128x128xf32>,
    } else {
    }
    %c0 = arith.constant 0 : index
    %c0_1 = arith.constant 0 : index
    %3 = vector.load %arg2[%c0, %c0_1] : memref<128x128xf32, #tpu.memory_space<vmem>>, vector<128x128xf32>
    %c0_2 = arith.constant 0 : index
    %c0_3 = arith.constant 0 : index
    %4 = vector.load %arg4[%c0_2, %c0_3] : memref<128x128xf32, #tpu.memory_space<vmem>>, vector<128x128xf32>
    %c0_4 = arith.constant 0 : index
    %c0_5 = arith.constant 0 : index
    %5 = vector.load %arg5[%c0_4, %c0_5] : memref<1x128xf32, #tpu.memory_space<vmem>>, vector<1x128xf32>
    %cst = arith.constant dense<0.000000e+00> : vector<128x128xf32>
    %6 = tpu.matmul %3, %4, %cst {dimension_numbers = #tpu.dot_dimension_numbers<[1], [1], [0], [0], [0, 0, 1, 0], [], []>} : vector<128x128xf32>, vector<128x128xf32>, vector<128x128xf32> -> vector<128x128xf32>
    %7 = vector.broadcast %5 : vector<1x128xf32> to vector<128x128xf32>
    %8 = arith.addf %6, %7 : vector<128x128xf32>
    %cst_6 = arith.constant dense<0x7F800000> : vector<128xf32>
    %9 = vector.multi_reduction <minimumf>, %8, %cst_6 [1] : vector<128x128xf32> to vector<128xf32>
    %10 = vector.shape_cast %9 : vector<128xf32> to vector<128x1xf32>
    %11 = tpu.iota {dimensions = array<i32: 1>} : vector<128x128xi32>
    %12 = vector.broadcast %10 : vector<128x1xf32> to vector<128x128xf32>
    %13 = arith.cmpf ole, %8, %12 : vector<128x128xf32>
    %c128_i32 = arith.constant 128 : i32
    %14 = vector.broadcast %c128_i32 : i32 to vector<128x128xi32>
    %15 = arith.select %13, %11, %14 : vector<128x128xi1>, vector<128x128xi32>
    %cst_7 = arith.constant dense<2147483647> : vector<128xi32>
    %16 = vector.multi_reduction <minsi>, %15, %cst_7 [1] : vector<128x128xi32> to vector<128xi32>
    %17 = vector.shape_cast %16 : vector<128xi32> to vector<128x1xi32>
    %18 = vector.broadcast %17 : vector<128x1xi32> to vector<128x128xi32>
    %19 = arith.cmpi eq, %11, %18 : vector<128x128xi32>
    %20 = arith.extui %19 : vector<128x128xi1> to vector<128x128xi32>
    %21 = arith.sitofp %20 : vector<128x128xi32> to vector<128x128xf32>
    %cst_8 = arith.constant dense<0.000000e+00> : vector<128x128xf32>
    %22 = tpu.matmul %21, %4, %cst_8 {dimension_numbers = #tpu.dot_dimension_numbers<[1], [0], [0], [1], [0, 0, 1, 1], [], []>} : vector<128x128xf32>, vector<128x128xf32>, vector<128x128xf32> -> vector<128x128xf32>
    %c0_9 = arith.constant 0 : index
    %c0_10 = arith.constant 0 : index
    %23 = vector.load %arg10[%c0_9, %c0_10] : memref<128x1xf32, #tpu.memory_space<vmem>>, vector<128x1xf32>
    %24 = arith.cmpf olt, %10, %23 : vector<128x1xf32>
    %c0_11 = arith.constant 0 : index
    %c0_12 = arith.constant 0 : index
    %25 = vector.load %arg10[%c0_11, %c0_12] : memref<128x1xf32, #tpu.memory_space<vmem>>, vector<128x1xf32>
    %26 = arith.select %24, %10, %25 : vector<128x1xi1>, vector<128x1xf32>
    %c0_13 = arith.constant 0 : index
    %c0_14 = arith.constant 0 : index
    %27 = vector.load %arg10[%c0_13, %c0_14] : memref<128x1xf32, #tpu.memory_space<vmem>>, vector<128x1xf32>
    tpu.vector_store %arg10[%c0_13, %c0_14], %26 {strides = array<i32>} : memref<128x1xf32, #tpu.memory_space<vmem>>, vector<128x1xf32>,
    %c128_i32_15 = arith.constant 128 : i32
    %28 = arith.muli %arg1, %c128_i32_15 : i32
    %29 = vector.broadcast %28 : i32 to vector<128x1xi32>
    %30 = arith.addi %17, %29 : vector<128x1xi32>
    %c0_16 = arith.constant 0 : index
    %c0_17 = arith.constant 0 : index
    %31 = vector.load %arg11[%c0_16, %c0_17] : memref<128x1xi32, #tpu.memory_space<vmem>>, vector<128x1xi32>
    %32 = arith.select %24, %30, %31 : vector<128x1xi1>, vector<128x1xi32>
    %c0_18 = arith.constant 0 : index
    %c0_19 = arith.constant 0 : index
    %33 = vector.load %arg11[%c0_18, %c0_19] : memref<128x1xi32, #tpu.memory_space<vmem>>, vector<128x1xi32>
    tpu.vector_store %arg11[%c0_18, %c0_19], %32 {strides = array<i32>} : memref<128x1xi32, #tpu.memory_space<vmem>>, vector<128x1xi32>,
    %c0_20 = arith.constant 0 : index
    %c0_21 = arith.constant 0 : index
    %34 = vector.load %arg12[%c0_20, %c0_21] : memref<128x128xf32, #tpu.memory_space<vmem>>, vector<128x128xf32>
    %35 = vector.shape_cast %24 : vector<128x1xi1> to vector<128x1xi1>
    %36 = vector.broadcast %35 : vector<128x1xi1> to vector<128x128xi1>
    %37 = arith.select %36, %22, %34 : vector<128x128xi1>, vector<128x128xf32>
    %c0_22 = arith.constant 0 : index
    %c0_23 = arith.constant 0 : index
    %38 = vector.load %arg12[%c0_22, %c0_23] : memref<128x128xf32, #tpu.memory_space<vmem>>, vector<128x128xf32>
    tpu.vector_store %arg12[%c0_22, %c0_23], %37 {strides = array<i32>} : memref<128x128xf32, #tpu.memory_space<vmem>>, vector<128x128xf32>,
    %c0_i32_24 = arith.constant 0 : i32
    %39 = arith.cmpi eq, %arg1, %c0_i32_24 : i32
    %40 = arith.extui %39 : i1 to i32
    %c0_i32_25 = arith.constant 0 : i32
    %41 = arith.cmpi ne, %40, %c0_i32_25 : i32
    scf.if %41 {
      %c0_26 = arith.constant 0 : index
      %c0_27 = arith.constant 0 : index
      %42 = vector.load %arg12[%c0_26, %c0_27] : memref<128x128xf32, #tpu.memory_space<vmem>>, vector<128x128xf32>
      %cst_28 = arith.constant -5.000000e-01 : f32
      %43 = vector.broadcast %cst_28 : f32 to vector<128x128xf32>
      %44 = arith.mulf %42, %43 : vector<128x128xf32>
      %45 = vector.extract_strided_slice %44 {offsets = [0, 0], sizes = [128, 32], strides = [1, 1]} : vector<128x128xf32> to vector<128x32xf32>
      %c0_29 = arith.constant 0 : index
      %c0_30 = arith.constant 0 : index
      %46 = vector.load %arg6[%c0_29, %c0_30] : memref<128x32xf32, #tpu.memory_space<vmem>>, vector<128x32xf32>
      tpu.vector_store %arg6[%c0_29, %c0_30], %45 {strides = array<i32>} : memref<128x32xf32, #tpu.memory_space<vmem>>, vector<128x32xf32>,
      %c0_31 = arith.constant 0 : index
      %c0_32 = arith.constant 0 : index
      %47 = vector.load %arg11[%c0_31, %c0_32] : memref<128x1xi32, #tpu.memory_space<vmem>>, vector<128x1xi32>
      %48 = vector.shape_cast %47 : vector<128x1xi32> to vector<1x1x128xi32>
      %c0_33 = arith.constant 0 : index
      %c0_34 = arith.constant 0 : index
      %c0_35 = arith.constant 0 : index
      %49 = vector.load %arg7[%c0_33, %c0_34, %c0_35] : memref<1x1x128xi32, #tpu.memory_space<vmem>>, vector<1x1x128xi32>
      tpu.vector_store %arg7[%c0_33, %c0_34, %c0_35], %48 {strides = array<i32>} : memref<1x1x128xi32, #tpu.memory_space<vmem>>, vector<1x1x128xi32>,
      %c0_36 = arith.constant 0 : index
      %c0_37 = arith.constant 0 : index
      %50 = vector.load %arg10[%c0_36, %c0_37] : memref<128x1xf32, #tpu.memory_space<vmem>>, vector<128x1xf32>
      %51 = vector.shape_cast %50 : vector<128x1xf32> to vector<1x1x128xf32>
      %c0_38 = arith.constant 0 : index
      %c0_39 = arith.constant 0 : index
      %c0_40 = arith.constant 0 : index
      %52 = vector.load %arg3[%c0_38, %c0_39, %c0_40] : memref<1x1x128xf32, #tpu.memory_space<vmem>>, vector<1x1x128xf32>
      %53 = arith.addf %51, %52 : vector<1x1x128xf32>
      %c0_41 = arith.constant 0 : index
      %c0_42 = arith.constant 0 : index
      %c0_43 = arith.constant 0 : index
      %54 = vector.load %arg8[%c0_41, %c0_42, %c0_43] : memref<1x1x128xf32, #tpu.memory_space<vmem>>, vector<1x1x128xf32>
      tpu.vector_store %arg8[%c0_41, %c0_42, %c0_43], %53 {strides = array<i32>} : memref<1x1x128xf32, #tpu.memory_space<vmem>>, vector<1x1x128xf32>,
      %55 = arith.subf %44, %3 : vector<128x128xf32>
      %56 = arith.mulf %55, %55 : vector<128x128xf32>
      %cst_44 = arith.constant dense<0.000000e+00> : vector<128xf32>
      %57 = vector.multi_reduction <add>, %56, %cst_44 [1] : vector<128x128xf32> to vector<128xf32>
      %58 = vector.shape_cast %57 : vector<128xf32> to vector<128x1xf32>
      %59 = tpu.iota {dimensions = array<i32: 0>} : vector<128x1xi32>
      %c128_i32_45 = arith.constant 128 : i32
      %60 = arith.muli %arg0, %c128_i32_45 : i32
      %61 = vector.broadcast %60 : i32 to vector<128x1xi32>
      %62 = arith.addi %59, %61 : vector<128x1xi32>
      %c16_i32 = arith.constant 16 : i32
      %63 = vector.broadcast %c16_i32 : i32 to vector<128x1xi32>
      %64 = arith.cmpi slt, %62, %63 : vector<128x1xi32>
      %cst_46 = arith.constant 0.000000e+00 : f32
      %65 = vector.broadcast %cst_46 : f32 to vector<128x1xf32>
      %66 = arith.select %64, %58, %65 : vector<128x1xi1>, vector<128x1xf32>
      %67 = vector.shape_cast %66 : vector<128x1xf32> to vector<1x128x1xf32>
      %cst_47 = arith.constant dense<0.000000e+00> : vector<1xf32>
      %68 = vector.multi_reduction <add>, %67, %cst_47 [1, 2] : vector<1x128x1xf32> to vector<1xf32>
      %69 = vector.shape_cast %68 : vector<1xf32> to vector<1x1x1xf32>
      %70 = vector.extract %69[0, 0, 0] : f32 from vector<1x1x1xf32>
      %71 = vector.broadcast %70 : f32 to vector<1x1x1xf32>
      %c0_48 = arith.constant 0 : index
      %c0_49 = arith.constant 0 : index
      %c0_50 = arith.constant 0 : index
      %72 = vector.load %arg9[%c0_48, %c0_49, %c0_50] : memref<1x1x1xf32, #tpu.memory_space<vmem>>, vector<1x1x1xf32>
      tpu.vector_store %arg9[%c0_48, %c0_49, %c0_50], %71 {strides = array<i32>} : memref<1x1x1xf32, #tpu.memory_space<vmem>>, vector<1x1x1xf32>,
    } else {
    }
    return
  }
  func.func @transform_0(%arg0: i32, %arg1: i32) -> (i32, i32) {
    %c0_i32 = arith.constant 0 : i32
    %c0_i32_0 = arith.constant 0 : i32
    return %arg0, %c0_i32 : i32, i32
  }
  func.func @transform_1(%arg0: i32, %arg1: i32) -> (i32, i32, i32) {
    %c0_i32 = arith.constant 0 : i32
    %c0_i32_0 = arith.constant 0 : i32
    %c0_i32_1 = arith.constant 0 : i32
    return %arg0, %c0_i32, %c0_i32_0 : i32, i32, i32
  }
  func.func @transform_2(%arg0: i32, %arg1: i32) -> (i32, i32) {
    %c0_i32 = arith.constant 0 : i32
    %c0_i32_0 = arith.constant 0 : i32
    return %arg1, %c0_i32 : i32, i32
  }
  func.func @transform_3(%arg0: i32, %arg1: i32) -> (i32, i32) {
    %c0_i32 = arith.constant 0 : i32
    %c0_i32_0 = arith.constant 0 : i32
    return %c0_i32, %arg1 : i32, i32
  }
  func.func @transform_4(%arg0: i32, %arg1: i32) -> (i32, i32) {
    %c0_i32 = arith.constant 0 : i32
    %c0_i32_0 = arith.constant 0 : i32
    return %arg0, %c0_i32 : i32, i32
  }
  func.func @transform_5(%arg0: i32, %arg1: i32) -> (i32, i32, i32) {
    %c0_i32 = arith.constant 0 : i32
    %c0_i32_0 = arith.constant 0 : i32
    %c0_i32_1 = arith.constant 0 : i32
    return %arg0, %c0_i32, %c0_i32_0 : i32, i32, i32
  }
  func.func @transform_6(%arg0: i32, %arg1: i32) -> (i32, i32, i32) {
    %c0_i32 = arith.constant 0 : i32
    %c0_i32_0 = arith.constant 0 : i32
    %c0_i32_1 = arith.constant 0 : i32
    return %arg0, %c0_i32, %c0_i32_0 : i32, i32, i32
  }
  func.func @transform_7(%arg0: i32, %arg1: i32) -> (i32, i32, i32) {
    %c0_i32 = arith.constant 0 : i32
    %c0_i32_0 = arith.constant 0 : i32
    %c0_i32_1 = arith.constant 0 : i32
    return %arg0, %c0_i32, %c0_i32_0 : i32, i32, i32
  }
}

</mosaic_0001>

<bundles_post_ra>
// kernel: tpu_custom_call.1
= control target key start
LH: loop header
LB: loop body
LE: loop exit
PB: predicated region body
PF: predicated region fallthrough
CT: control target
= control target key end

     0   :  { %13 = vsyncpa [#allocation6], 0  ;;  %s3100_s0 = inlined_call_operand.hbm [shape: f32[128,128], index: 0, kind: input, shape index: {}]   ;;  %s3101_s1 = inlined_call_operand.hbm [shape: f32[1,1,128], index: 1, kind: input, shape index: {}]   ;;  %s3102_s2 = inlined_call_operand.hbm [shape: f32[128,128], index: 2, kind: input, shape index: {}]   ;;  %s3103_s3 = inlined_call_operand.vmem [shape: f32[1,128], index: 3, kind: input, shape index: {}]   ;;  %s3104_s4 = inlined_call_operand.vmem [shape: f32[128,32], index: 4, kind: output, shape index: {0}]   ;;  %s3105_s5 = inlined_call_operand.hbm [shape: s32[1,1,128], index: 5, kind: output, shape index: {1}]   ;;  %s3106_s6 = inlined_call_operand.hbm [shape: f32[1,1,128], index: 6, kind: output, shape index: {2}]   ;;  %s3107_s7 = inlined_call_operand.hbm [shape: f32[1,1,1], index: 7, kind: output, shape index: {3}]  }
   0x1   :  { %14 = vsyncpa [#allocation9], 0 }
   0x2   :  { %15 = vsyncpa [#allocation7], 0  ;;  %s35_s26 = sshll.u32 %s3101_s1, 4  ;;  %s36_s26 = int_to_ptr.hbm [resolvable:$true] %s35_s26 }
   0x3   :  { %16 = vsyncpa [#allocation13], 0  ;;  %s1824_s27 = smov [#allocation8]   ;;  %s21_s8 = sshll.u32 %s3100_s0, 4  ;;  %s22_s8 = int_to_ptr.hbm [resolvable:$true] %s21_s8 }
   0x4   :  { %s37_s28 = sshll.u32 %s1824_s27, 4  ;;  %s1825_s9 = smov [#allocation5]   ;;  %s38_s28 = int_to_ptr.vmem [resolvable:$true] %s37_s28 }
   0x5   :  { %40 = dma.hbm_to_vmem [thread:$0]  %s36_s26, 16, %s38_s28, [#allocation9]  }
   0x6   :  { %s23_s10 = sshll.u32 %s1825_s9, 4  ;;  %s1826_s11 = smov 128   ;;  %s24_s10 = int_to_ptr.vmem [resolvable:$true] %s23_s10 }
   0x7   :  { %s1827_s12 = smov 8   ;;  %s45_s1 = sshll.u32 %s3102_s2, 4  ;;  %s46_s1 = int_to_ptr.hbm [resolvable:$true] %s45_s1 }
   0x8   :  { %29 = dma.hbm_to_vmem [thread:$0]  %s22_s8, 2048, %s24_s10, [#allocation6], %s1826_s11, %s1826_s11, %s1827_s12  }
   0x9   :  { %s1828_s15 = smov [#allocation10]  }
   0xa   :  { %s47_s16 = sshll.u32 %s1828_s15, 4  ;;  %s48_s16 = int_to_ptr.vmem [resolvable:$true] %s47_s16 }
   0xb   :  { %53 = dma.hbm_to_vmem [thread:$0]  %s46_s1, 2048, %s48_s16, [#allocation9], %s1826_s11, %s1826_s11, %s1827_s12  }
   0xc   :  { %1816 = dma.done.wait [#allocation6], 2048  }
   0xd   :  { %1817 = vsyncadd [#allocation6], 4294965248 }
   0xe   :  { %1818 = dma.done.wait [#allocation9], 2064  }
   0xf   :  { %1819 = vsyncadd [#allocation9], 4294965232  ;;  %v1884_v0 = vld [vmem:[#allocation10 + $0x78] sm:$0xff]  ;;  %v1889_v1 = vld [vmem:[#allocation10 + $0x70] sm:$0xff]  ;;  %v254_v25 = vlaneseq  ;;  %vm72_vm0 = vcmask 7168   ;;  %v1829_v60 = vmov inf  }
  0x10   :  { %157 = vmatpush.xpose.msra.mxu0 %v1884_v0  ;;  %1565 = vmatpush.xpose.msra.mxu2 %v1884_v0  ;;  %v1895_v2 = vld [vmem:[#allocation10 + $0x68] sm:$0xff]  ;;  %v1899_v3 = vld [vmem:[#allocation10 + $0x60] sm:$0xff]  ;;  %v1904_v4 = vld [vmem:[#allocation10 + $0x58] sm:$0xff]  ;;  %73 = vst.msk [vmem:[#allocation2] sm:$0xff] %vm72_vm0, %v1829_v60  ;;  %s1489_s24 = sshll.u32 %s3105_s5, 4  ;;  %s1833_s5 = smov [#allocation12]   ;;  %s1490_s24 = int_to_ptr.hbm [resolvable:$true] %s1489_s24 }
  0x11   :  { %1566 = vmatpush.xpose.msra.mxu3 %v1884_v0  ;;  %1597 = vmatpush.msra.mxu1 %v1884_v0  ;;  %v1908_v5 = vld [vmem:[#allocation10 + $0x50] sm:$0xff]  ;;  %v1913_v6 = vld [vmem:[#allocation10 + $0x48] sm:$0xff]  ;;  %v1917_v7 = vld [vmem:[#allocation10 + $0x40] sm:$0xff]  ;;  %v1998_v26 = vshrl.u32 %v254_v25, 7  ;;  %74 = vst.msk [vmem:[#allocation2 + $0x8] sm:$0xff] %vm72_vm0, %v1829_v60  ;;  %s1498_s25 = sshll.u32 %s1833_s5, 4  ;;  %s1499_s25 = int_to_ptr.vmem [resolvable:$true] %s1498_s25 }
  0x12   :  { %v1922_v8 = vld [vmem:[#allocation10 + $0x38] sm:$0xff]  ;;  %v1926_v9 = vld [vmem:[#allocation10 + $0x30] sm:$0xff]  ;;  %v1931_v10 = vld [vmem:[#allocation10 + $0x28] sm:$0xff]  ;;  %75 = vst.msk [vmem:[#allocation2 + $0x10] sm:$0xff] %vm72_vm0, %v1829_v60  ;;  %s1500_s28 = sshll.u32 %s3106_s6, 4  ;;  %s1511_s8 = sshll.u32 %s3107_s7, 4  ;;  %s1501_s28 = int_to_ptr.hbm [resolvable:$true] %s1500_s28  ;;  %s1512_s8 = int_to_ptr.hbm [resolvable:$true] %s1511_s8 }
  0x13   :  { %1599 = vmatpush.msra.mxu1 %v1889_v1  ;;  %v1935_v11 = vld [vmem:[#allocation10 + $0x20] sm:$0xff]  ;;  %v1940_v12 = vld [vmem:[#allocation10 + $0x18] sm:$0xff]  ;;  %v1944_v13 = vld [vmem:[#allocation10 + $0x10] sm:$0xff]  ;;  %1642 = vset.pattern.permute.xlu2 %v1998_v26  ;;  %v1089_v27 = vadd.s32 8, %v1998_v26  ;;  %v1095_v28 = vadd.s32 16, %v1998_v26  ;;  %v1101_v35 = vadd.s32 24, %v1998_v26 }
  0x14   :  { %158 = vmatpush.xpose.msra.mxu0 %v1889_v1  ;;  %1567 = vmatpush.xpose.msra.mxu2 %v1889_v1  ;;  %v1949_v14 = vld [vmem:[#allocation10 + $0x8] sm:$0xff]  ;;  %v1953_v15 = vld [vmem:[#allocation10] sm:$0xff]  ;;  %v128_v22 = vld [vmem:[#allocation5 + $0x38] sm:$0xff]  ;;  %v1107_v36 = vadd.s32 32, %v1998_v26  ;;  %v1113_v39 = vadd.s32 40, %v1998_v26  ;;  %v1119_v40 = vadd.s32 48, %v1998_v26 }
  0x15   :  { %1568 = vmatpush.xpose.msra.mxu3 %v1889_v1  ;;  %1601 = vmatpush.msra.mxu1 %v1895_v2  ;;  %v121_v16 = vld [vmem:[#allocation5] sm:$0xff]  ;;  %v126_v17 = vld [vmem:[#allocation5 + $0x28] sm:$0xff]  ;;  %v127_v19 = vld [vmem:[#allocation5 + $0x30] sm:$0xff]  ;;  %76 = vst.msk [vmem:[#allocation2 + $0x18] sm:$0xff] %vm72_vm0, %v1829_v60  ;;  %s1834_s9 = smov [#allocation14]  }
  0x16   :  { %v133_v18 = vld [vmem:[#allocation5 + $0x60] sm:$0xff]  ;;  %v122_v20 = vld [vmem:[#allocation5 + $0x8] sm:$0xff]  ;;  %v123_v23 = vld [vmem:[#allocation5 + $0x10] sm:$0xff]  ;;  %1643 = vset.pattern.permute.xlu1 %v1089_v27  ;;  %1644 = vset.pattern.permute.xlu0 %v1095_v28  ;;  %77 = vst.msk [vmem:[#allocation2 + $0x20] sm:$0xff] %vm72_vm0, %v1829_v60  ;;  %s1509_s6 = sshll.u32 %s1834_s9, 4  ;;  %s1510_s6 = int_to_ptr.vmem [resolvable:$true] %s1509_s6 }
  0x17   :  { %1603 = vmatpush.msra.mxu1 %v1899_v3  ;;  %v134_v21 = vld [vmem:[#allocation5 + $0x68] sm:$0xff]  ;;  %v135_v24 = vld [vmem:[#allocation5 + $0x70] sm:$0xff]  ;;  %v129_v29 = vld [vmem:[#allocation5 + $0x40] sm:$0xff]  ;;  %78 = vst.msk [vmem:[#allocation2 + $0x28] sm:$0xff] %vm72_vm0, %v1829_v60 }
  0x18   :  { %159 = vmatpush.xpose.msra.mxu0 %v1895_v2  ;;  %1569 = vmatpush.xpose.msra.mxu2 %v1895_v2  ;;  %v124_v30 = vld [vmem:[#allocation5 + $0x18] sm:$0xff]  ;;  %v2009_v32 = vld [vmem:[#allocation8] ss:$0 sm:$0xff]  ;;  %v130_v33 = vld [vmem:[#allocation5 + $0x48] sm:$0xff]  ;;  %79 = vst.msk [vmem:[#allocation2 + $0x30] sm:$0xff] %vm72_vm0, %v1829_v60 }
  0x19   :  { %1570 = vmatpush.xpose.msra.mxu3 %v1895_v2  ;;  %1605 = vmatpush.msra.mxu1 %v1904_v4  ;;  %v136_v31 = vld [vmem:[#allocation5 + $0x78] sm:$0xff]  ;;  %v125_v34 = vld [vmem:[#allocation5 + $0x20] sm:$0xff]  ;;  %v131_v37 = vld [vmem:[#allocation5 + $0x50] sm:$0xff]  ;;  %80 = vst.msk [vmem:[#allocation2 + $0x38] sm:$0xff] %vm72_vm0, %v1829_v60 }
  0x1a   :  { %v132_v38 = vld [vmem:[#allocation5 + $0x58] sm:$0xff]  ;;  %v2034_v41 = vld [vmem:[%s3103_s3] ss:$0 sm:$0xff]  ;;  %81 = vst.msk [vmem:[#allocation2 + $0x40] sm:$0xff] %vm72_vm0, %v1829_v60 }
  0x1b   :  { %1607 = vmatpush.msra.mxu1 %v1908_v5  ;;  %1085 = vperm.xlu2 %1642, %v2009_v32   ;;  %82 = vst.msk [vmem:[#allocation2 + $0x48] sm:$0xff] %vm72_vm0, %v1829_v60 }
  0x1c   :  { %160 = vmatpush.xpose.msra.mxu0 %v1899_v3  ;;  %1571 = vmatpush.xpose.msra.mxu2 %v1899_v3  ;;  %83 = vst.msk [vmem:[#allocation2 + $0x50] sm:$0xff] %vm72_vm0, %v1829_v60 }
  0x1d   :  { %1572 = vmatpush.xpose.msra.mxu3 %v1899_v3  ;;  %1609 = vmatpush.msra.mxu1 %v1913_v6  ;;  %84 = vst.msk [vmem:[#allocation2 + $0x58] sm:$0xff] %vm72_vm0, %v1829_v60 }
  0x1e   :  { %1091 = vperm.xlu1 %1643, %v2009_v32   ;;  %1097 = vperm.xlu0 %1644, %v2009_v32   ;;  %85 = vst.msk [vmem:[#allocation2 + $0x60] sm:$0xff] %vm72_vm0, %v1829_v60 }
  0x1f   :  { %1611 = vmatpush.msra.mxu1 %v1917_v7  ;;  %86 = vst.msk [vmem:[#allocation2 + $0x68] sm:$0xff] %vm72_vm0, %v1829_v60 }
  0x20   :  { %161 = vmatpush.xpose.msra.mxu0 %v1904_v4  ;;  %1573 = vmatpush.xpose.msra.mxu2 %v1904_v4  ;;  %87 = vst.msk [vmem:[#allocation2 + $0x70] sm:$0xff] %vm72_vm0, %v1829_v60 }
  0x21   :  { %1574 = vmatpush.xpose.msra.mxu3 %v1904_v4  ;;  %1613 = vmatpush.msra.mxu1 %v1922_v8  ;;  %88 = vst.msk [vmem:[#allocation2 + $0x78] sm:$0xff] %vm72_vm0, %v1829_v60  ;;  %v2284_v60 = vld [vmem:[#allocation2 + $0x38] sm:$0xff] }
  0x22   :  { %3141 = vst [vmem:[#allocation30_spill] sm:$0xff] %v2284_v60 }
  0x23   :  { %1615 = vmatpush.msra.mxu1 %v1926_v9  ;;  %1645 = vset.pattern.permute.xlu2 %v1101_v35 }
  0x24   :  { %162 = vmatpush.xpose.msra.mxu0 %v1908_v5  ;;  %1575 = vmatpush.xpose.msra.mxu2 %v1908_v5 }
  0x25   :  { %1576 = vmatpush.xpose.msra.mxu3 %v1908_v5  ;;  %1617 = vmatpush.msra.mxu1 %v1931_v10 }
  0x26   :  { %1646 = vset.pattern.permute.xlu1 %v1107_v36  ;;  %v2221_v36 = vld [vmem:[#allocation2 + $0x68] sm:$0xff] }
  0x27   :  { %1619 = vmatpush.msra.mxu1 %v1935_v11  ;;  %3137 = vst [vmem:[#allocation26_spill] sm:$0xff] %v2221_v36 }
  0x28   :  { %163 = vmatpush.xpose.msra.mxu0 %v1913_v6  ;;  %1577 = vmatpush.xpose.msra.mxu2 %v1913_v6 }
  0x29   :  { %1578 = vmatpush.xpose.msra.mxu3 %v1913_v6  ;;  %1621 = vmatpush.msra.mxu1 %v1940_v12 }
  0x2b   :  { %1623 = vmatpush.msra.mxu1 %v1944_v13  ;;  %1103 = vperm.xlu2 %1645, %v2009_v32  }
  0x2c   :  { %164 = vmatpush.xpose.msra.mxu0 %v1917_v7  ;;  %1579 = vmatpush.xpose.msra.mxu2 %v1917_v7 }
  0x2d   :  { %1580 = vmatpush.xpose.msra.mxu3 %v1917_v7  ;;  %1625 = vmatpush.msra.mxu1 %v1949_v14 }
  0x2e   :  { %1109 = vperm.xlu1 %1646, %v2009_v32  }
  0x2f   :  { %1627 = vmatpush.msra.mxu1 %v1953_v15 }
  0x30   :  { %165 = vmatpush.xpose.msra.mxu0 %v1922_v8  ;;  %1581 = vmatpush.xpose.msra.mxu2 %v1922_v8 }
  0x31   :  { %1582 = vmatpush.xpose.msra.mxu3 %v1922_v8 }
  0x33   :  { %1647 = vset.pattern.permute.xlu2 %v1113_v39 }
  0x34   :  { %166 = vmatpush.xpose.msra.mxu0 %v1926_v9  ;;  %1583 = vmatpush.xpose.msra.mxu2 %v1926_v9 }
  0x35   :  { %1584 = vmatpush.xpose.msra.mxu3 %v1926_v9 }
  0x36   :  { %1648 = vset.pattern.permute.xlu1 %v1119_v40 }
  0x38   :  { %167 = vmatpush.xpose.msra.mxu0 %v1931_v10  ;;  %1585 = vmatpush.xpose.msra.mxu2 %v1931_v10 }
  0x39   :  { %1586 = vmatpush.xpose.msra.mxu3 %v1931_v10 }
  0x3b   :  { %1115 = vperm.xlu2 %1647, %v2009_v32  }
  0x3c   :  { %168 = vmatpush.xpose.msra.mxu0 %v1935_v11  ;;  %1587 = vmatpush.xpose.msra.mxu2 %v1935_v11 }
  0x3d   :  { %1588 = vmatpush.xpose.msra.mxu3 %v1935_v11 }
  0x3e   :  { %1121 = vperm.xlu1 %1648, %v2009_v32  }
  0x40   :  { %169 = vmatpush.xpose.msra.mxu0 %v1940_v12  ;;  %1589 = vmatpush.xpose.msra.mxu2 %v1940_v12 }
  0x41   :  { %1590 = vmatpush.xpose.msra.mxu3 %v1940_v12 }
  0x44   :  { %170 = vmatpush.xpose.msra.mxu0 %v1944_v13  ;;  %1591 = vmatpush.xpose.msra.mxu2 %v1944_v13 }
  0x45   :  { %1592 = vmatpush.xpose.msra.mxu3 %v1944_v13 }
  0x48   :  { %171 = vmatpush.xpose.msra.mxu0 %v1949_v14  ;;  %1593 = vmatpush.xpose.msra.mxu2 %v1949_v14 }
  0x49   :  { %1594 = vmatpush.xpose.msra.mxu3 %v1949_v14 }
  0x4c   :  { %172 = vmatpush.xpose.msra.mxu0 %v1953_v15  ;;  %1595 = vmatpush.xpose.msra.mxu2 %v1953_v15 }
  0x4d   :  { %1596 = vmatpush.xpose.msra.mxu3 %v1953_v15 }
  0x4f   :  { %173 = vmatmul.f32.vlgmr.msra.gmra.mxu0 %v121_v16  ;;  %188 = vmatmul.f32.vlgmr.msra.gmra.mxu2 %v126_v17  ;;  %v2162_v17 = vand.u32 127, %v254_v25  ;;  %v2188_v25 = vld [vmem:[#allocation2 + $0x28] sm:$0xff] }
  0x50   :  { %560 = vmatpush.msrb.mxu0 %v1884_v0  ;;  %209 = vmatmul.f32.vlgmr.msra.gmra.mxu3 %v133_v18 }
  0x51   :  { %1598 = vmatpush.msrb.mxu3 %v1884_v0 }
  0x52   :  { %561 = vmatpush.msrb.mxu0 %v1889_v1 }
  0x53   :  { %1600 = vmatpush.msrb.mxu3 %v1889_v1 }
  0x54   :  { %562 = vmatpush.msrb.mxu0 %v1895_v2 }
  0x55   :  { %1602 = vmatpush.msrb.mxu3 %v1895_v2 }
  0x56   :  { %563 = vmatpush.msrb.mxu0 %v1899_v3 }
  0x57   :  { %1604 = vmatpush.msrb.mxu3 %v1899_v3  ;;  %191 = vmatmul.f32.gmra.mxu2 %v127_v19  ;;  %v2166_v19 = vld [vmem:[#allocation2] sm:$0xff] }
  0x58   :  { %564 = vmatpush.msrb.mxu0 %v1904_v4  ;;  %212 = vmatmul.f32.gmra.mxu3 %v134_v21 }
  0x59   :  { %176 = vmatmul.f32.gmra.mxu0 %v122_v20  ;;  %1606 = vmatpush.msrb.mxu3 %v1904_v4 }
  0x5a   :  { %565 = vmatpush.msrb.mxu0 %v1908_v5 }
  0x5b   :  { %1608 = vmatpush.msrb.mxu3 %v1908_v5 }
  0x5c   :  { %566 = vmatpush.msrb.mxu0 %v1913_v6 }
  0x5d   :  { %1610 = vmatpush.msrb.mxu3 %v1913_v6 }
  0x5e   :  { %567 = vmatpush.msrb.mxu0 %v1917_v7 }
  0x5f   :  { %194 = vmatmul.f32.gmra.mxu2 %v128_v22  ;;  %1612 = vmatpush.msrb.mxu3 %v1917_v7 }
  0x60   :  { %568 = vmatpush.msrb.mxu0 %v1922_v8  ;;  %215 = vmatmul.f32.gmra.mxu3 %v135_v24 }
  0x61   :  { %179 = vmatmul.f32.gmra.mxu0 %v123_v23  ;;  %1614 = vmatpush.msrb.mxu3 %v1922_v8 }
  0x62   :  { %569 = vmatpush.msrb.mxu0 %v1926_v9 }
  0x63   :  { %1616 = vmatpush.msrb.mxu3 %v1926_v9 }
  0x64   :  { %570 = vmatpush.msrb.mxu0 %v1931_v10 }
  0x65   :  { %1618 = vmatpush.msrb.mxu3 %v1931_v10 }
  0x66   :  { %571 = vmatpush.msrb.mxu0 %v1935_v11 }
  0x67   :  { %197 = vmatmul.f32.gmra.mxu2 %v129_v29  ;;  %1620 = vmatpush.msrb.mxu3 %v1935_v11  ;;  %v3110_v11 = vmov 0  }
  0x68   :  { %572 = vmatpush.msrb.mxu0 %v1940_v12  ;;  %218 = vmatmul.f32.gmra.mxu3 %v136_v31  ;;  %89 = vst.msk [vmem:[#allocation3] sm:$0xff] %vm72_vm0, %v3110_v11 }
  0x69   :  { %182 = vmatmul.f32.gmra.mxu0 %v124_v30  ;;  %1622 = vmatpush.msrb.mxu3 %v1940_v12  ;;  %90 = vst.msk [vmem:[#allocation3 + $0x8] sm:$0xff] %vm72_vm0, %v3110_v11  ;;  %v2196_v30 = vld [vmem:[#allocation2 + $0x60] sm:$0xff] }
  0x6a   :  { %573 = vmatpush.msrb.mxu0 %v1944_v13  ;;  %1649 = vset.pattern.permute.xlu0 %v3110_v11  ;;  %91 = vst.msk [vmem:[#allocation3 + $0x10] sm:$0xff] %vm72_vm0, %v3110_v11 }
  0x6b   :  { %1624 = vmatpush.msrb.mxu3 %v1944_v13  ;;  %1650 = vset.pattern.permute.xlu2 %v3110_v11  ;;  %92 = vst.msk [vmem:[#allocation3 + $0x18] sm:$0xff] %vm72_vm0, %v3110_v11 }
  0x6c   :  { %574 = vmatpush.msrb.mxu0 %v1949_v14  ;;  %1651 = vset.pattern.permute.xlu1 %v3110_v11  ;;  %93 = vst.msk [vmem:[#allocation3 + $0x20] sm:$0xff] %vm72_vm0, %v3110_v11 }
  0x6d   :  { %1626 = vmatpush.msrb.mxu3 %v1949_v14  ;;  %94 = vst.msk [vmem:[#allocation3 + $0x28] sm:$0xff] %vm72_vm0, %v3110_v11 }
  0x6e   :  { %575 = vmatpush.msrb.mxu0 %v1953_v15  ;;  %95 = vst.msk [vmem:[#allocation3 + $0x30] sm:$0xff] %vm72_vm0, %v3110_v11 }
  0x6f   :  { %200 = vmatmul.f32.gmra.mxu2 %v130_v33  ;;  %1628 = vmatpush.msrb.mxu3 %v1953_v15  ;;  %96 = vst.msk [vmem:[#allocation3 + $0x38] sm:$0xff] %vm72_vm0, %v3110_v11 }
  0x70   :  { %97 = vst.msk [vmem:[#allocation3 + $0x40] sm:$0xff] %vm72_vm0, %v3110_v11 }
  0x71   :  { %185 = vmatmul.f32.gmra.mxu0 %v125_v34  ;;  %98 = vst.msk [vmem:[#allocation3 + $0x48] sm:$0xff] %vm72_vm0, %v3110_v11 }
  0x72   :  { %99 = vst.msk [vmem:[#allocation3 + $0x50] sm:$0xff] %vm72_vm0, %v3110_v11 }
  0x73   :  { %100 = vst.msk [vmem:[#allocation3 + $0x58] sm:$0xff] %vm72_vm0, %v3110_v11 }
  0x74   :  { %101 = vst.msk [vmem:[#allocation3 + $0x60] sm:$0xff] %vm72_vm0, %v3110_v11 }
  0x75   :  { %v2141_v12 = vpop.permute.xlu2 %1085  ;;  %102 = vst.msk [vmem:[#allocation3 + $0x68] sm:$0xff] %vm72_vm0, %v3110_v11 }
  0x76   :  { %3130 = vst [vmem:[#allocation19_spill] sm:$0xff] %v2141_v12 }
  0x77   :  { %203 = vmatmul.f32.gmra.mxu2 %v131_v37  ;;  %103 = vst.msk [vmem:[#allocation3 + $0x70] sm:$0xff] %vm72_vm0, %v3110_v11  ;;  %v2223_v37 = vld [vmem:[#allocation2 + $0x8] sm:$0xff] }
  0x78   :  { %104 = vst.msk [vmem:[#allocation3 + $0x78] sm:$0xff] %vm72_vm0, %v3110_v11 }
  0x7f   :  { %206 = vmatmul.f32.gmra.mxu2 %v132_v38 }
  0x85   :  { %v2155_v14 = vpop.permute.xlu2 %1103 }
  0x86   :  { %3132 = vst [vmem:[#allocation21_spill] sm:$0xff] %v2155_v14 }
  0x90   :  { %v2149_v13 = vpop.permute.xlu1 %1091  ;;  %v2157_v15 = vpop.permute.xlu0 %1097 }
  0x91   :  { %3131 = vst [vmem:[#allocation20_spill] sm:$0xff] %v2149_v13 }
  0x92   :  { %3133 = vst [vmem:[#allocation22_spill] sm:$0xff] %v2157_v15 }
  0x95   :  { %v2164_v18 = vpop.permute.xlu2 %1115 }
  0x96   :  { %3135 = vst [vmem:[#allocation24_spill] sm:$0xff] %v2164_v18  ;;  %v3147_v18 = vmov 0  }
  0xa0   :  { %v2159_v16 = vpop.permute.xlu1 %1109 }
  0xa1   :  { %3134 = vst [vmem:[#allocation23_spill] sm:$0xff] %v2159_v16 }
  0xb0   :  { %v2190_v27 = vpop.permute.xlu1 %1121 }
  0xb1   :  { %3136 = vst [vmem:[#allocation25_spill] sm:$0xff] %v2190_v27 }
  0xcc   :  { %v174_v42 = vpop.f32.mrf.mxu0 }
  0xcd   :  { %v2037_v43 = vadd.f32 %v2034_v41, %v174_v42  ;;  %v2245_v42 = vld [vmem:[#allocation2 + $0x70] sm:$0xff] }
  0xcf   :  { %222 = vmin.xlane.f32.xlu0 %v2037_v43 }
  0xd2   :  { %v189_v44 = vpop.f32.mrf.mxu2 }
  0xd3   :  { %v2041_v45 = vadd.f32 %v2034_v41, %v189_v44  ;;  %v210_v46 = vpop.f32.mrf.mxu3  ;;  %v2249_v44 = vld [vmem:[#allocation2 + $0x30] sm:$0xff] }
  0xd4   :  { %v2044_v47 = vadd.f32 %v2034_v41, %v210_v46  ;;  %3139 = vst [vmem:[#allocation28_spill] sm:$0xff] %v2249_v44 }
  0xd5   :  { %232 = vmin.xlane.f32.xlu2 %v2041_v45 }
  0xd6   :  { %v177_v48 = vpop.f32.mrf.mxu0 }
  0xd7   :  { %246 = vmin.xlane.f32.xlu0 %v2044_v47  ;;  %v2049_v50 = vadd.f32 %v2034_v41, %v177_v48 }
  0xda   :  { %v192_v49 = vpop.f32.mrf.mxu2 }
  0xdb   :  { %v213_v51 = vpop.f32.mrf.mxu3  ;;  %v2060_v56 = vadd.f32 %v2034_v41, %v192_v49 }
  0xdc   :  { %v2052_v52 = vadd.f32 %v2034_v41, %v213_v51 }
  0xde   :  { %v180_v53 = vpop.f32.mrf.mxu0  ;;  %248 = vmin.xlane.f32.xlu1 %v2052_v52 }
  0xdf   :  { %224 = vmin.xlane.f32.xlu0 %v2049_v50  ;;  %v2057_v54 = vadd.f32 %v2034_v41, %v180_v53 }
  0xe2   :  { %v195_v55 = vpop.f32.mrf.mxu2 }
  0xe3   :  { %v216_v57 = vpop.f32.mrf.mxu3  ;;  %v2073_v61 = vadd.f32 %v2034_v41, %v195_v55 }
  0xe4   :  { %v2063_v58 = vadd.f32 %v2034_v41, %v216_v57  ;;  %v1125_v57 = vadd.s32 56, %v1998_v26 }
  0xe6   :  { %v183_v59 = vpop.f32.mrf.mxu0  ;;  %250 = vmin.xlane.f32.xlu2 %v2063_v58  ;;  %226 = vmin.xlane.f32.xlu1 %v2057_v54 }
  0xe7   :  { %234 = vmin.xlane.f32.xlu0 %v2060_v56  ;;  %v2093_v3 = vadd.f32 %v2034_v41, %v183_v59  ;;  %v2282_v59 = vld [vmem:[#allocation2 + $0x40] sm:$0xff] }
  0xea   :  { %v198_v62 = vpop.f32.mrf.mxu2 }
  0xeb   :  { %v2077_v63 = vadd.f32 %v2034_v41, %v198_v62  ;;  %v219_v0 = vpop.f32.mrf.mxu3 }
  0xec   :  { %v2081_v1 = vadd.f32 %v2034_v41, %v219_v0  ;;  %v2290_v0 = vld [vmem:[#allocation2 + $0x78] sm:$0xff] }
  0xed   :  { %3142 = vst [vmem:[#allocation31_spill] sm:$0xff] %v2290_v0 }
  0xee   :  { %238 = vmin.xlane.f32.xlu2 %v2077_v63  ;;  %236 = vmin.xlane.f32.xlu1 %v2073_v61  ;;  %v186_v2 = vpop.f32.mrf.mxu0 }
  0xef   :  { %252 = vmin.xlane.f32.xlu0 %v2081_v1  ;;  %v2096_v4 = vadd.f32 %v2034_v41, %v186_v2 }
  0xf2   :  { %v201_v5 = vpop.f32.mrf.mxu2 }
  0xf3   :  { %v2100_v6 = vadd.f32 %v2034_v41, %v201_v5 }
  0xf6   :  { %230 = vmin.xlane.f32.xlu2 %v2096_v4  ;;  %228 = vmin.xlane.f32.xlu1 %v2093_v3 }
  0xf7   :  { %240 = vmin.xlane.f32.xlu0 %v2100_v6 }
  0xfa   :  { %v204_v7 = vpop.f32.mrf.mxu2 }
  0xfb   :  { %v2109_v8 = vadd.f32 %v2034_v41, %v204_v7 }
  0xfe   :  { %242 = vmin.xlane.f32.xlu1 %v2109_v8 }
 0x102   :  { %v207_v9 = vpop.f32.mrf.mxu2 }
 0x103   :  { %v2113_v10 = vadd.f32 %v2034_v41, %v207_v9 }
 0x105   :  { %244 = vmin.xlane.f32.xlu2 %v2113_v10 }
 0x142   :  { %v2168_v20 = vpop.xlane.xlu0 %222 }
 0x143   :  { %vm256_vm1 = vcmp.le.f32.partialorder %v2037_v43, %v2168_v20  ;;  %vm641_vm2 = vcmp.lt.f32.partialorder %v2168_v20, %v2166_v19  ;;  %v2247_v43 = vld [vmem:[#allocation2 + $0x10] sm:$0xff] }
 0x144   :  { %v657_v21 = vsel %vm641_vm2, %v2168_v20, %v2166_v19  ;;  %v772_v22 = vsel %vm641_vm2, 1, %v3110_v11  ;;  %v2184_v23 = vsel %vm256_vm1, %v2162_v17, 128  ;;  %v3157_v20 = vld [vmem:[#allocation30_spill] sm:$0xff] }
 0x145   :  { %674 = vst.msk [vmem:[#allocation2] sm:$0xff] %vm72_vm0, %v657_v21  ;;  %789 = vperm.xlu0 %1649, %v772_v22   ;;  %v289_v24 = vshra.s32 %v2184_v23, 16  ;;  %v1131_v22 = vadd.s32 64, %v1998_v26 }
 0x147   :  { %v2192_v28 = vcvt.s32.f32 %v289_v24 }
 0x148   :  { %v2194_v29 = vpop.xlane.xlu2 %232 }
 0x149   :  { %vm646_vm3 = vcmp.lt.f32.partialorder %v2194_v29, %v2188_v25  ;;  %292 = vmin.xlane.f32.xlu1 %v2192_v28  ;;  %vm261_vm14 = vcmp.le.f32.partialorder %v2041_v45, %v2194_v29 }
 0x14a   :  { %v662_v31 = vsel %vm646_vm3, %v2194_v29, %v2188_v25  ;;  %v2206_v33 = vpop.xlane.xlu0 %246  ;;  %v777_v34 = vsel %vm646_vm3, 1, %v3110_v11 }
 0x14b   :  { %679 = vst.msk [vmem:[#allocation2 + $0x28] sm:$0xff] %vm72_vm0, %v662_v31  ;;  %vm3113_vm4 = vcmp.lt.f32.partialorder %v2206_v33, %v2196_v30  ;;  %804 = vperm.xlu2 %1650, %v777_v34   ;;  %v2328_v31 = vld [vmem:[#allocation2 + $0x20] sm:$0xff]  ;;  %v2330_v34 = vld [vmem:[#allocation2 + $0x18] sm:$0xff] }
 0x14c   :  { %v669_v35 = vsel %vm3113_vm4, %v2206_v33, %v2196_v30  ;;  %v784_v62 = vsel %vm3113_vm4, 1, %v3110_v11  ;;  %3144 = vst [vmem:[#allocation33_spill] sm:$0xff] %v2330_v34 }
 0x14d   :  { %686 = vst.msk [vmem:[#allocation2 + $0x60] sm:$0xff] %vm72_vm0, %v669_v35  ;;  %1652 = vset.pattern.permute.xlu0 %v1125_v57 }
 0x151   :  { %v2225_v38 = vpop.xlane.xlu1 %248 }
 0x152   :  { %3138 = vst [vmem:[#allocation27_spill] sm:$0xff] %v2225_v38  ;;  %vm3108_vm5 = vcmp.lt.f32.partialorder %v2225_v38, %v2221_v36  ;;  %v2229_v39 = vpop.xlane.xlu0 %224 }
 0x153   :  { %v670_v40 = vsel %vm3108_vm5, %v2225_v38, %v2221_v36  ;;  %vm642_vm6 = vcmp.lt.f32.partialorder %v2229_v39, %v2223_v37  ;;  %vm257_vm12 = vcmp.le.f32.partialorder %v2049_v50, %v2229_v39  ;;  %1653 = vset.pattern.permute.xlu2 %v1131_v22  ;;  %v2378_v22 = vld [vmem:[#allocation2 + $0x50] sm:$0xff] }
 0x154   :  { %687 = vst.msk [vmem:[#allocation2 + $0x68] sm:$0xff] %vm72_vm0, %v670_v40  ;;  %v658_v41 = vsel %vm642_vm6, %v2229_v39, %v2223_v37  ;;  %v2326_v24 = vsel %vm257_vm12, %v2162_v17, 128  ;;  %v773_v35 = vsel %vm642_vm6, 1, %v3110_v11  ;;  %v2338_v40 = vld [vmem:[#allocation2 + $0x48] sm:$0xff] }
 0x155   :  { %675 = vst.msk [vmem:[#allocation2 + $0x8] sm:$0xff] %vm72_vm0, %v658_v41 }
 0x156   :  { %3145 = vst [vmem:[#allocation34_spill] sm:$0xff] %v2378_v22 }
 0x159   :  { %v2251_v46 = vpop.xlane.xlu2 %250  ;;  %v2253_v48 = vpop.xlane.xlu1 %226 }
 0x15a   :  { %vm655_vm7 = vcmp.lt.f32.partialorder %v2251_v46, %v2245_v42  ;;  %vm643_vm8 = vcmp.lt.f32.partialorder %v2253_v48, %v2247_v43  ;;  %v2259_v49 = vpop.xlane.xlu0 %234  ;;  %vm258_vm4 = vcmp.le.f32.partialorder %v2057_v54, %v2253_v48 }
 0x15b   :  { %3140 = vst [vmem:[#allocation29_spill] sm:$0xff] %v2259_v49  ;;  %v671_v51 = vsel %vm655_vm7, %v2251_v46, %v2245_v42  ;;  %v659_v53 = vsel %vm643_vm8, %v2253_v48, %v2247_v43  ;;  %vm647_vm9 = vcmp.lt.f32.partialorder %v2259_v49, %v2249_v44  ;;  %v2451_v16 = vsel %vm258_vm4, %v2162_v17, 128 }
 0x15c   :  { %688 = vst.msk [vmem:[#allocation2 + $0x70] sm:$0xff] %vm72_vm0, %v671_v51  ;;  %v663_v55 = vsel %vm647_vm9, %v2259_v49, %v2249_v44  ;;  %v778_v15 = vsel %vm647_vm9, 1, %v3147_v18  ;;  %v317_v12 = vshra.s32 %v2451_v16, 16  ;;  %vm262_vm4 = vcmp.le.f32.partialorder %v2060_v56, %v2259_v49 }
 0x15d   :  { %676 = vst.msk [vmem:[#allocation2 + $0x10] sm:$0xff] %vm72_vm0, %v659_v53  ;;  %v303_v53 = vshra.s32 %v2326_v24, 16 }
 0x15e   :  { %680 = vst.msk [vmem:[#allocation2 + $0x30] sm:$0xff] %vm72_vm0, %v663_v55  ;;  %v2459_v54 = vcvt.s32.f32 %v317_v12 }
 0x161   :  { %v2292_v2 = vpop.xlane.xlu2 %238  ;;  %v2294_v5 = vpop.xlane.xlu1 %236 }
 0x162   :  { %vm649_vm10 = vcmp.lt.f32.partialorder %v2292_v2, %v2282_v59  ;;  %vm3112_vm11 = vcmp.lt.f32.partialorder %v2294_v5, %v2284_v60  ;;  %v2300_v7 = vpop.xlane.xlu0 %252  ;;  %825 = vperm.xlu1 %1651, %v784_v62   ;;  %v2364_v62 = vsel %vm261_vm14, %v2162_v17, 128 }
 0x163   :  { %3143 = vst [vmem:[#allocation32_spill] sm:$0xff] %v2300_v7  ;;  %v665_v9 = vsel %vm649_vm10, %v2292_v2, %v2282_v59  ;;  %v664_v21 = vsel %vm3112_vm11, %v2294_v5, %v2284_v60  ;;  %vm3129_vm13 = vcmp.lt.f32.partialorder %v2300_v7, %v2290_v0  ;;  %vm263_vm11 = vcmp.le.f32.partialorder %v2073_v61, %v2294_v5 }
 0x164   :  { %682 = vst.msk [vmem:[#allocation2 + $0x40] sm:$0xff] %vm72_vm0, %v665_v9  ;;  %v672_v50 = vsel %vm3129_vm13, %v2300_v7, %v2290_v0 }
 0x165   :  { %681 = vst.msk [vmem:[#allocation2 + $0x38] sm:$0xff] %vm72_vm0, %v664_v21  ;;  %v2373_v21 = vcvt.s32.f32 %v303_v53 }
 0x166   :  { %689 = vst.msk [vmem:[#allocation2 + $0x78] sm:$0xff] %vm72_vm0, %v672_v50  ;;  %v359_v50 = vshra.s32 %v2364_v62, 16 }
 0x169   :  { %v2340_v41 = vpop.xlane.xlu2 %230  ;;  %v2342_v51 = vpop.xlane.xlu1 %228 }
 0x16a   :  { %vm645_vm15 = vcmp.lt.f32.partialorder %v2340_v41, %v2328_v31  ;;  %vm644_vm1 = vcmp.lt.f32.partialorder %v2342_v51, %v2330_v34  ;;  %v2349_v55 = vpop.xlane.xlu0 %240  ;;  %792 = vperm.xlu1 %1651, %v773_v35  }
 0x16b   :  { %v661_v45 = vsel %vm645_vm15, %v2340_v41, %v2328_v31  ;;  %v660_v57 = vsel %vm644_vm1, %v2342_v51, %v2330_v34  ;;  %vm650_vm12 = vcmp.lt.f32.partialorder %v2349_v55, %v2338_v40 }
 0x16c   :  { %678 = vst.msk [vmem:[#allocation2 + $0x20] sm:$0xff] %vm72_vm0, %v661_v45  ;;  %v666_v9 = vsel %vm650_vm12, %v2349_v55, %v2338_v40  ;;  %v2384_v45 = vcvt.s32.f32 %v359_v50  ;;  %v719_v40 = vld [vmem:[#allocation3 + $0x58] sm:$0xff] }
 0x16d   :  { %677 = vst.msk [vmem:[#allocation2 + $0x18] sm:$0xff] %vm72_vm0, %v660_v57  ;;  %v2393_v57 = vld [vmem:[#allocation2 + $0x58] sm:$0xff] }
 0x16e   :  { %683 = vst.msk [vmem:[#allocation2 + $0x48] sm:$0xff] %vm72_vm0, %v666_v9 }
 0x16f   :  { %306 = vmin.xlane.f32.xlu0 %v2373_v21 }
 0x171   :  { %v2380_v35 = vpop.xlane.xlu1 %242 }
 0x172   :  { %3146 = vst [vmem:[#allocation35_spill] sm:$0xff] %v2380_v35  ;;  %vm3109_vm14 = vcmp.lt.f32.partialorder %v2380_v35, %v2378_v22 }
 0x173   :  { %v667_v53 = vsel %vm3109_vm14, %v2380_v35, %v2378_v22  ;;  %vm268_vm14 = vcmp.le.f32.partialorder %v2044_v47, %v2206_v33 }
 0x174   :  { %684 = vst.msk [vmem:[#allocation2 + $0x50] sm:$0xff] %vm72_vm0, %v667_v53  ;;  %362 = vmin.xlane.f32.xlu2 %v2384_v45  ;;  %v2409_v53 = vsel %vm268_vm14, %v2162_v17, 128  ;;  %vm269_vm14 = vcmp.le.f32.partialorder %v2052_v52, %v2225_v38 }
 0x175   :  { %v457_v11 = vshra.s32 %v2409_v53, 16  ;;  %v2424_v47 = vsel %vm269_vm14, %v2162_v17, 128  ;;  %vm260_vm14 = vcmp.le.f32.partialorder %v2096_v4, %v2340_v41 }
 0x176   :  { %v471_v14 = vshra.s32 %v2424_v47, 16 }
 0x177   :  { %v2413_v27 = vcvt.s32.f32 %v457_v11 }
 0x178   :  { %v2395_v9 = vpop.xlane.xlu2 %244  ;;  %v2429_v11 = vcvt.s32.f32 %v471_v14  ;;  %v2447_v14 = vsel %vm260_vm14, %v2162_v17, 128  ;;  %vm259_vm14 = vcmp.le.f32.partialorder %v2093_v3, %v2342_v51  ;;  %v775_v3 = vsel %vm644_vm1, 1, %v3147_v18  ;;  %v3172_v51 = vld [vmem:[#allocation31_spill] sm:$0xff] }
 0x179   :  { %vm652_vm5 = vcmp.lt.f32.partialorder %v2395_v9, %v2393_v57  ;;  %v2485_v36 = vsel %vm259_vm14, %v2162_v17, 128  ;;  %vm270_vm14 = vcmp.le.f32.partialorder %v2063_v58, %v2251_v46  ;;  %v780_v58 = vsel %vm649_vm10, 1, %v3147_v18  ;;  %v708_v46 = vld [vmem:[#allocation3] sm:$0xff] }
 0x17a   :  { %v668_v50 = vsel %vm652_vm5, %v2395_v9, %v2393_v57  ;;  %v331_v49 = vshra.s32 %v2485_v36, 16 }
 0x17b   :  { %685 = vst.msk [vmem:[#allocation2 + $0x58] sm:$0xff] %vm72_vm0, %v668_v50  ;;  %v774_v50 = vsel %vm643_vm8, 1, %v3147_v18 }
 0x17c   :  { %v2495_v38 = vcvt.s32.f32 %v331_v49 }
 0x183   :  { %1127 = vperm.xlu0 %1652, %v2009_v32  }
 0x18c   :  { %1133 = vperm.xlu2 %1653, %v2009_v32  }
 0x194   :  { %1654 = vset.pattern.permute.xlu2 %v3147_v18  ;;  %460 = vmin.xlane.f32.xlu1 %v2413_v27 }
 0x195   :  { %795 = vperm.xlu2 %1654, %v774_v50   ;;  %v2436_v50 = vsel %vm263_vm11, %v2162_v17, 128  ;;  %vm266_vm11 = vcmp.le.f32.partialorder %v2109_v8, %v2380_v35  ;;  %v2473_v8 = vsel %vm262_vm4, %v2162_v17, 128 }
 0x196   :  { %v387_v52 = vshra.s32 %v2436_v50, 16  ;;  %v373_v12 = vshra.s32 %v2473_v8, 16 }
 0x198   :  { %v2444_v61 = vcvt.s32.f32 %v387_v52  ;;  %v2462_v52 = vsel %vm266_vm11, %v2162_v17, 128 }
 0x199   :  { %v429_v13 = vshra.s32 %v2462_v52, 16 }
 0x19b   :  { %v2467_v44 = vcvt.s32.f32 %v429_v13  ;;  %v2482_v13 = vcvt.s32.f32 %v373_v12  ;;  %v302_v12 = vand.u32 65535, %v2326_v24  ;;  %v787_v24 = vsel %vm3129_vm13, 1, %v3147_v18 }
 0x19c   :  { %vm264_vm13 = vcmp.le.f32.partialorder %v2077_v63, %v2292_v2  ;;  %v713_v63 = vld [vmem:[#allocation3 + $0x28] sm:$0xff] }
 0x19d   :  { %v304_v35 = vcvt.s32.f32 %v302_v12  ;;  %v470_v12 = vand.u32 65535, %v2424_v47 }
 0x1ad   :  { %807 = vperm.xlu1 %1651, %v778_v15   ;;  %474 = vmin.xlane.f32.xlu0 %v2429_v11  ;;  %v345_v15 = vshra.s32 %v2447_v14, 16 }
 0x1af   :  { %v2457_v4 = vcvt.s32.f32 %v345_v15  ;;  %v786_v15 = vsel %vm655_vm7, 1, %v3147_v18 }
 0x1b5   :  { %390 = vmin.xlane.f32.xlu0 %v2444_v61 }
 0x1b7   :  { %v2488_v56 = vpop.permute.xlu0 %789 }
 0x1b8   :  { %3148 = vst [vmem:[#allocation36_spill] sm:$0xff] %v2488_v56  ;;  %v358_v56 = vand.u32 65535, %v2364_v62  ;;  %v2516_v62 = vsel %vm270_vm14, %v2162_v17, 128 }
 0x1b9   :  { %v484_v25 = vand.u32 65535, %v2516_v62 }
 0x1ba   :  { %v360_v49 = vcvt.s32.f32 %v358_v56 }
 0x1bc   :  { %v2618_v29 = vpop.xlane.xlu1 %292 }
 0x1bd   :  { %348 = vmin.xlane.f32.xlu0 %v2457_v4 }
 0x1be   :  { %320 = vmin.xlane.f32.xlu2 %v2459_v54 }
 0x1bf   :  { %v3174_v57 = vld [vmem:[#allocation36_spill] sm:$0xff] }
 0x1c5   :  { %432 = vmin.xlane.f32.xlu0 %v2467_v44 }
 0x1d6   :  { %831 = vperm.xlu2 %1654, %v786_v15   ;;  %v2498_v15 = vpop.permute.xlu2 %804 }
 0x1d7   :  { %376 = vmin.xlane.f32.xlu1 %v2482_v13  ;;  %3149 = vst [vmem:[#allocation37_spill] sm:$0xff] %v2498_v15 }
 0x1de   :  { %798 = vperm.xlu2 %1654, %v775_v3  }
 0x1df   :  { %334 = vmin.xlane.f32.xlu1 %v2495_v38 }
 0x1e2   :  { %v2501_v22 = vpop.xlane.xlu0 %306 }
 0x1e3   :  { %vm308_vm11 = vcmp.eq.f32.partialorder %v2373_v21, %v2501_v22  ;;  %v776_v21 = vsel %vm645_vm15, 1, %v3147_v18 }
 0x1e4   :  { %v2506_v60 = vsel %vm308_vm11, %v304_v35, inf  ;;  %v485_v35 = vshra.s32 %v2516_v62, 16  ;;  %vm271_vm11 = vcmp.le.f32.partialorder %v2081_v1, %v2300_v7 }
 0x1e7   :  { %v363_v34 = vpop.xlane.xlu2 %362 }
 0x1e8   :  { %vm364_vm4 = vcmp.eq.f32.partialorder %v2384_v45, %v363_v34  ;;  %v2523_v45 = vcvt.s32.f32 %v485_v35  ;;  %v386_v35 = vand.u32 65535, %v2436_v50 }
 0x1e9   :  { %v365_v3 = vsel %vm364_vm4, %v360_v49, inf }
 0x1ea   :  { %366 = vmin.xlane.f32.xlu0 %v365_v3 }
 0x1ef   :  { %v2535_v49 = vpop.permute.xlu2 %1133 }
 0x1f0   :  { %3151 = vst [vmem:[#allocation39_spill] sm:$0xff] %v2535_v49 }
 0x1f5   :  { %v2526_v56 = vpop.permute.xlu0 %1127 }
 0x1f6   :  { %3150 = vst [vmem:[#allocation38_spill] sm:$0xff] %v2526_v56 }
 0x1f7   :  { %v2552_v49 = vpop.permute.xlu2 %795 }
 0x1f8   :  { %834 = vperm.xlu1 %1651, %v787_v24   ;;  %v472_v24 = vcvt.s32.f32 %v470_v12 }
 0x200   :  { %801 = vperm.xlu1 %1651, %v776_v21   ;;  %v2540_v21 = vsel %vm271_vm11, %v2162_v17, 128 }
 0x201   :  { %v499_v1 = vshra.s32 %v2540_v21, 16 }
 0x203   :  { %v2550_v15 = vcvt.s32.f32 %v499_v1 }
 0x207   :  { %488 = vmin.xlane.f32.xlu2 %v2523_v45 }
 0x21f   :  { %813 = vperm.xlu2 %1654, %v780_v58   ;;  %v388_v58 = vcvt.s32.f32 %v386_v35 }
 0x220   :  { %v2537_v3 = vpop.xlane.xlu0 %474 }
 0x221   :  { %vm476_vm4 = vcmp.eq.f32.partialorder %v2429_v11, %v2537_v3  ;;  %v344_v11 = vand.u32 65535, %v2447_v14  ;;  %v428_v14 = vand.u32 65535, %v2462_v52 }
 0x222   :  { %v2544_v47 = vsel %vm476_vm4, %v472_v24, inf  ;;  %v316_v24 = vand.u32 65535, %v2451_v16 }
 0x223   :  { %v346_v50 = vcvt.s32.f32 %v344_v11  ;;  %v430_v16 = vcvt.s32.f32 %v428_v14  ;;  %v783_v14 = vsel %vm652_vm5, 1, %v3147_v18 }
 0x224   :  { %v318_v1 = vcvt.s32.f32 %v316_v24 }
 0x228   :  { %v2548_v56 = vpop.xlane.xlu0 %390 }
 0x229   :  { %vm392_vm14 = vcmp.eq.f32.partialorder %v2444_v61, %v2548_v56 }
 0x22a   :  { %502 = vmin.xlane.f32.xlu1 %v2550_v15  ;;  %v2557_v12 = vsel %vm392_vm14, %v388_v58, inf }
 0x230   :  { %v2561_v0 = vpop.xlane.xlu0 %348 }
 0x231   :  { %v2563_v7 = vpop.xlane.xlu2 %320  ;;  %vm350_vm11 = vcmp.eq.f32.partialorder %v2457_v4, %v2561_v0  ;;  %v2581_v4 = vsel %vm264_vm13, %v2162_v17, 128  ;;  %vm265_vm13 = vcmp.le.f32.partialorder %v2100_v6, %v2349_v55 }
 0x232   :  { %vm322_vm4 = vcmp.eq.f32.partialorder %v2459_v54, %v2563_v7  ;;  %v2569_v61 = vsel %vm350_vm11, %v346_v50, inf  ;;  %v781_v54 = vsel %vm650_vm12, 1, %v3147_v18  ;;  %v401_v52 = vshra.s32 %v2581_v4, 16 }
 0x233   :  { %v323_v35 = vsel %vm322_vm4, %v318_v1, inf  ;;  %vm267_vm11 = vcmp.le.f32.partialorder %v2113_v10, %v2395_v9  ;;  %vm294_vm4 = vcmp.eq.f32.partialorder %v2192_v28, %v2618_v29  ;;  %v327_v28 = vcvt.f32.s32 %v2563_v7 }
 0x234   :  { %324 = vmin.xlane.f32.xlu0 %v323_v35  ;;  %v2588_v24 = vcvt.s32.f32 %v401_v52  ;;  %v2606_v52 = vsel %vm265_vm13, %v2162_v17, 128 }
 0x238   :  { %v2572_v58 = vpop.xlane.xlu0 %432 }
 0x239   :  { %vm434_vm14 = vcmp.eq.f32.partialorder %v2467_v44, %v2572_v58  ;;  %v369_v44 = vcvt.f32.s32 %v363_v34 }
 0x23a   :  { %v2576_v11 = vsel %vm434_vm14, %v430_v16, inf }
 0x23b   :  { %v370_v1 = vshll.u32 %v369_v44, 16  ;;  %v415_v44 = vshra.s32 %v2606_v52, 16 }
 0x243   :  { %816 = vperm.xlu1 %1651, %v781_v54   ;;  %v1137_v54 = vadd.s32 72, %v1998_v26 }
 0x248   :  { %404 = vmin.xlane.f32.xlu2 %v2588_v24 }
 0x24b   :  { %1655 = vset.pattern.permute.xlu1 %v1137_v54  ;;  %v2629_v54 = vsel %vm267_vm11, %v2162_v17, 128 }
 0x24c   :  { %v442_v39 = vand.u32 65535, %v2629_v54 }
 0x25d   :  { %v367_v50 = vpop.xlane.xlu0 %366 }
 0x25e   :  { %v368_v35 = vcvt.f32.s32 %v367_v50  ;;  %v2609_v50 = vpop.permute.xlu2 %831 }
 0x25f   :  { %3152 = vst [vmem:[#allocation40_spill] sm:$0xff] %v2609_v50 }
 0x260   :  { %v2595_v16 = vadd.s32 %v370_v1, %v368_v35  ;;  %822 = vperm.xlu2 %1654, %v783_v14   ;;  %v2611_v1 = vcvt.s32.f32 %v415_v44 }
 0x262   :  { %v729_v34 = vsel %vm646_vm3, %v2595_v16, %v713_v63  ;;  %v486_v63 = vcvt.s32.f32 %v484_v25  ;;  %v1143_v25 = vadd.s32 80, %v1998_v26 }
 0x263   :  { %745 = vst.msk [vmem:[#allocation3 + $0x28] sm:$0xff] %vm72_vm0, %v729_v34  ;;  %v2626_v34 = vpop.permute.xlu1 %825 }
 0x264   :  { %3154 = vst [vmem:[#allocation42_spill] sm:$0xff] %v2626_v34 }
 0x266   :  { %v2614_v6 = vpop.permute.xlu2 %798 }
 0x267   :  { %3153 = vst [vmem:[#allocation41_spill] sm:$0xff] %v2614_v6 }
 0x268   :  { %1656 = vset.pattern.permute.xlu2 %v1143_v25 }
 0x26b   :  { %v2635_v44 = vpop.permute.xlu1 %792 }
 0x26c   :  { %3155 = vst [vmem:[#allocation43_spill] sm:$0xff] %v2635_v44 }
 0x26d   :  { %418 = vmin.xlane.f32.xlu1 %v2611_v1 }
 0x275   :  { %310 = vmin.xlane.f32.xlu1 %v2506_v60  ;;  %v443_v60 = vshra.s32 %v2629_v54, 16 }
 0x277   :  { %v2632_v62 = vcvt.s32.f32 %v443_v60  ;;  %v456_v60 = vand.u32 65535, %v2409_v53  ;;  %v1831_v53 = vmov 1.0  }
 0x279   :  { %v458_v34 = vcvt.s32.f32 %v456_v60 }
 0x27a   :  { %v2620_v35 = vpop.xlane.xlu2 %488 }
 0x27b   :  { %vm490_vm3 = vcmp.eq.f32.partialorder %v2523_v45, %v2620_v35  ;;  %v288_v45 = vand.u32 65535, %v2184_v23 }
 0x27c   :  { %v491_v14 = vsel %vm490_vm3, %v486_v63, inf }
 0x27d   :  { %492 = vmin.xlane.f32.xlu0 %v491_v14  ;;  %v290_v10 = vcvt.s32.f32 %v288_v45  ;;  %v2642_v14 = vpop.xlane.xlu1 %460  ;;  %v328_v45 = vshll.u32 %v327_v28, 16 }
 0x27e   :  { %vm462_vm14 = vcmp.eq.f32.partialorder %v2413_v27, %v2642_v14 }
 0x27f   :  { %v295_v63 = vsel %vm294_vm4, %v290_v10, inf  ;;  %v463_v23 = vsel %vm462_vm14, %v458_v34, inf  ;;  %v400_v34 = vand.u32 65535, %v2581_v4 }
 0x281   :  { %v402_v48 = vcvt.s32.f32 %v400_v34  ;;  %v941_v34 = vld [vmem:[#allocation3 + $0x28] sm:$0xff] }
 0x282   :  { %v2660_v7 = vpop.permute.xlu2 %813 }
 0x285   :  { %v2648_v25 = vpop.permute.xlu1 %807 }
 0x289   :  { %446 = vmin.xlane.f32.xlu2 %v2632_v62 }
 0x28d   :  { %v2651_v44 = vpop.xlane.xlu1 %376 }
 0x28e   :  { %1139 = vperm.xlu1 %1655, %v2009_v32   ;;  %vm378_vm3 = vcmp.eq.f32.partialorder %v2482_v13, %v2651_v44  ;;  %v383_v31 = vcvt.f32.s32 %v2651_v44 }
 0x291   :  { %296 = vmin.xlane.f32.xlu2 %v295_v63  ;;  %v710_v63 = vld [vmem:[#allocation3 + $0x10] sm:$0xff] }
 0x296   :  { %1657 = vset.pattern.permute.xlu1 %v3147_v18 }
 0x299   :  { %464 = vmin.xlane.f32.xlu2 %v463_v23 }
 0x2a7   :  { %v325_v6 = vpop.xlane.xlu0 %324 }
 0x2a8   :  { %v326_v10 = vcvt.f32.s32 %v325_v6  ;;  %v2662_v6 = vpop.xlane.xlu1 %334 }
 0x2a9   :  { %vm336_vm11 = vcmp.eq.f32.partialorder %v2495_v38, %v2662_v6  ;;  %v709_v38 = vld [vmem:[#allocation3 + $0x8] sm:$0xff] }
 0x2aa   :  { %v329_v50 = vadd.s32 %v328_v45, %v326_v10 }
 0x2ac   :  { %v726_v27 = vsel %vm643_vm8, %v329_v50, %v710_v63  ;;  %vm514_vm13 = vcmp.eq.s32.totalorder %v2162_v17, %v329_v50 }
 0x2ad   :  { %742 = vst.msk [vmem:[#allocation3 + $0x10] sm:$0xff] %vm72_vm0, %v726_v27  ;;  %1551 = vmatmul.msk.f32.vlgmr.msra.gmra.mxu1 %vm514_vm13, %v1831_v53  ;;  %vm3156_vm13 = vcmp.lt.f32.partialorder %v2206_v33, %v2196_v30  ;;  %v3159_v30 = vld [vmem:[#allocation35_spill] sm:$0xff]  ;;  %v3160_v33 = vld [vmem:[#allocation34_spill] sm:$0xff] }
 0x2b0   :  { %v2671_v60 = vpop.permute.xlu1 %834 }
 0x2b1   :  { %1145 = vperm.xlu2 %1656, %v2009_v32  }
 0x2b8   :  { %478 = vmin.xlane.f32.xlu1 %v2544_v47  ;;  %v2674_v23 = vpop.permute.xlu1 %801  ;;  %v372_v47 = vand.u32 65535, %v2473_v8  ;;  %v498_v8 = vand.u32 65535, %v2540_v21 }
 0x2b9   :  { %1658 = vset.pattern.permute.xlu2 %v3147_v18 }
 0x2ba   :  { %v500_v13 = vcvt.s32.f32 %v498_v8 }
 0x2bb   :  { %v2667_v43 = vpop.xlane.xlu2 %404 }
 0x2bc   :  { %vm406_vm8 = vcmp.eq.f32.partialorder %v2588_v24, %v2667_v43  ;;  %v374_v24 = vcvt.s32.f32 %v372_v47  ;;  %v1173_v47 = vadd.s32 120, %v1998_v26 }
 0x2bd   :  { %v407_v50 = vsel %vm406_vm8, %v402_v48, inf  ;;  %vm3158_vm8 = vcmp.lt.f32.partialorder %v2294_v5, %v3157_v20 }
 0x2be   :  { %408 = vmin.xlane.f32.xlu0 %v407_v50  ;;  %v379_v45 = vsel %vm378_vm3, %v374_v24, inf  ;;  %vm3161_vm3 = vcmp.lt.f32.partialorder %v3159_v30, %v3160_v33 }
 0x2bf   :  { %1663 = vset.pattern.permute.xlu0 %v1173_v47 }
 0x2c0   :  { %394 = vmin.xlane.f32.xlu1 %v2557_v12  ;;  %v2677_v4 = vpop.xlane.xlu1 %502  ;;  %v330_v12 = vand.u32 65535, %v2485_v36 }
 0x2c1   :  { %vm504_vm4 = vcmp.eq.f32.partialorder %v2550_v15, %v2677_v4 }
 0x2c2   :  { %v505_v50 = vsel %vm504_vm4, %v500_v13, inf  ;;  %vm919_vm4 = vcmask 261120  }
 0x2c8   :  { %352 = vmin.xlane.f32.xlu1 %v2569_v61  ;;  %v2683_v28 = vpop.permute.xlu1 %816  ;;  %v332_v61 = vcvt.s32.f32 %v330_v12 }
 0x2ca   :  { %v337_v63 = vsel %vm336_vm11, %v332_v61, inf  ;;  %v938_v61 = vld [vmem:[#allocation3 + $0x10] sm:$0xff]  ;;  %vm838_vm11 = vcmp.eq.s32.totalorder %v2552_v49, 1 }
 0x2d0   :  { %436 = vmin.xlane.f32.xlu1 %v2576_v11  ;;  %v313_v11 = vcvt.f32.s32 %v2501_v22  ;;  %v495_v22 = vcvt.f32.s32 %v2620_v35  ;;  %v2705_v35 = vpop.permute.xlu2 %822 }
 0x2d2   :  { %v314_v48 = vshll.u32 %v313_v11, 16 }
 0x2da   :  { %380 = vmin.xlane.f32.xlu2 %v379_v45  ;;  %v414_v45 = vand.u32 65535, %v2606_v52  ;;  %v722_v52 = vld [vmem:[#allocation3 + $0x70] sm:$0xff] }
 0x2dc   :  { %v416_v21 = vcvt.s32.f32 %v414_v45  ;;  %v467_v45 = vcvt.f32.s32 %v2642_v14  ;;  %v779_v14 = vsel %vm3158_vm8, 1, %v3147_v18 }
 0x2e0   :  { %v2688_v10 = vpop.xlane.xlu1 %418 }
 0x2e1   :  { %vm420_vm14 = vcmp.eq.f32.partialorder %v2611_v1, %v2688_v10 }
 0x2e2   :  { %338 = vmin.xlane.f32.xlu2 %v337_v63  ;;  %v496_v63 = vshll.u32 %v495_v22, 16  ;;  %v421_v11 = vsel %vm420_vm14, %v416_v21, inf  ;;  %v720_v21 = vld [vmem:[#allocation3 + $0x60] sm:$0xff] }
 0x2e8   :  { %v311_v27 = vpop.xlane.xlu1 %310 }
 0x2e9   :  { %v312_v36 = vcvt.f32.s32 %v311_v27  ;;  %968 = vperm.xlu1 %1657, %v941_v34   ;;  %v444_v27 = vcvt.s32.f32 %v442_v39 }
 0x2ea   :  { %506 = vmin.xlane.f32.xlu2 %v505_v50 }
 0x2eb   :  { %v315_v24 = vadd.s32 %v314_v48, %v312_v36  ;;  %v299_v36 = vcvt.f32.s32 %v2618_v29 }
 0x2ed   :  { %v725_v15 = vsel %vm642_vm6, %v315_v24, %v709_v38  ;;  %v300_v38 = vshll.u32 %v299_v36, 16  ;;  %v721_v36 = vld [vmem:[#allocation3 + $0x68] sm:$0xff] }
 0x2ee   :  { %741 = vst.msk [vmem:[#allocation3 + $0x8] sm:$0xff] %vm72_vm0, %v725_v15 }
 0x2f0   :  { %v493_v12 = vpop.xlane.xlu0 %492 }
 0x2f1   :  { %v494_v8 = vcvt.f32.s32 %v493_v12  ;;  %959 = vperm.xlu1 %1657, %v938_v61  }
 0x2f2   :  { %422 = vmin.xlane.f32.xlu2 %v421_v11 }
 0x2f3   :  { %v2703_v13 = vadd.s32 %v496_v63, %v494_v8  ;;  %v481_v63 = vcvt.f32.s32 %v2537_v3  ;;  %v397_v3 = vcvt.f32.s32 %v2548_v56 }
 0x2f5   :  { %v738_v37 = vsel %vm655_vm7, %v2703_v13, %v722_v52  ;;  %v937_v22 = vld [vmem:[#allocation3 + $0x8] sm:$0xff] }
 0x2f6   :  { %754 = vst.msk [vmem:[#allocation3 + $0x70] sm:$0xff] %vm72_vm0, %v738_v37  ;;  %v3162_v52 = vld [vmem:[#allocation27_spill] sm:$0xff]  ;;  %v3163_v37 = vld [vmem:[#allocation26_spill] sm:$0xff] }
 0x2f7   :  { %vm3164_vm14 = vcmp.lt.f32.partialorder %v3162_v52, %v3163_v37 }
 0x2f8   :  { %v785_v39 = vsel %vm3164_vm14, 1, %v3147_v18 }
 0x2fc   :  { %v2713_v1 = vpop.xlane.xlu2 %446 }
 0x2fd   :  { %v950_v34 = vld [vmem:[#allocation3 + $0x70] sm:$0xff]  ;;  %vm448_vm6 = vcmp.eq.f32.partialorder %v2632_v62, %v2713_v1  ;;  %v468_v62 = vshll.u32 %v467_v45, 16 }
 0x2fe   :  { %995 = vperm.xlu1 %1657, %v950_v34   ;;  %v449_v48 = vsel %vm448_vm6, %v444_v27, inf  ;;  %v482_v27 = vshll.u32 %v481_v63, 16  ;;  %vm3165_vm6 = vmmov %vm3164_vm14 }
 0x2ff   :  { %450 = vmin.xlane.f32.xlu0 %v449_v48 }
 0x300   :  { %v2740_v61 = vpop.permute.xlu1 %1139 }
 0x304   :  { %v297_v50 = vpop.xlane.xlu2 %296 }
 0x305   :  { %v298_v42 = vcvt.f32.s32 %v297_v50  ;;  %v411_v50 = vcvt.f32.s32 %v2667_v43 }
 0x307   :  { %v301_v47 = vadd.s32 %v300_v38, %v298_v42  ;;  %v412_v43 = vshll.u32 %v411_v50, 16 }
 0x309   :  { %v724_v54 = vsel %vm641_vm2, %v301_v47, %v708_v46  ;;  %vm512_vm7 = vcmp.eq.s32.totalorder %v2162_v17, %v301_v47  ;;  %vm513_vm2 = vcmp.eq.s32.totalorder %v2162_v17, %v315_v24  ;;  %v782_v24 = vsel %vm3161_vm3, 1, %v3147_v18  ;;  %v716_v47 = vld [vmem:[#allocation3 + $0x40] sm:$0xff] }
 0x30a   :  { %740 = vst.msk [vmem:[#allocation3] sm:$0xff] %vm72_vm0, %v724_v54  ;;  %1549 = vmatmul.msk.f32.vlgmr.msrb.gmra.mxu0 %vm512_vm7, %v1831_v53  ;;  %956 = vperm.xlu2 %1658, %v937_v22   ;;  %v398_v22 = vshll.u32 %v397_v3, 16 }
 0x30c   :  { %v465_v29 = vpop.xlane.xlu2 %464 }
 0x30d   :  { %v466_v15 = vcvt.f32.s32 %v465_v29 }
 0x30f   :  { %v2725_v12 = vadd.s32 %v468_v62, %v466_v15  ;;  %v715_v62 = vld [vmem:[#allocation3 + $0x38] sm:$0xff] }
 0x311   :  { %v736_v19 = vsel %vm3156_vm13, %v2725_v12, %v720_v21  ;;  %v936_v54 = vld [vmem:[#allocation3] sm:$0xff]  ;;  %vm3166_vm13 = vmmov %vm3158_vm8 }
 0x312   :  { %752 = vst.msk [vmem:[#allocation3 + $0x60] sm:$0xff] %vm72_vm0, %v736_v19  ;;  %1550 = vmatmul.msk.f32.gmra.mxu0 %vm513_vm2, %v1831_v53  ;;  %v355_v19 = vcvt.f32.s32 %v2561_v0  ;;  %vm526_vm2 = vcmp.eq.s32.totalorder %v2162_v17, %v2703_v13 }
 0x313   :  { %1175 = vperm.xlu0 %1663, %v2009_v32  }
 0x314   :  { %v356_v2 = vshll.u32 %v355_v19, 16 }
 0x31b   :  { %1664 = vset.pattern.permute.xlu0 %v3147_v18 }
 0x31c   :  { %810 = vperm.xlu0 %1664, %v779_v14  }
 0x324   :  { %819 = vperm.xlu0 %1664, %v782_v24  }
 0x32a   :  { %v583_v32 = vpop.f32.mrf.mxu1 }
 0x32b   :  { %v854_v8 = vsel %vm838_vm11, %v583_v32, 0.0  ;;  %v479_v11 = vpop.xlane.xlu1 %478  ;;  %v712_v32 = vld [vmem:[#allocation3 + $0x20] sm:$0xff] }
 0x32c   :  { %v905_v34 = vmul.f32 -0.5, %v854_v8  ;;  %v480_v48 = vcvt.f32.s32 %v479_v11  ;;  %828 = vperm.xlu0 %1664, %v785_v39   ;;  %v439_v11 = vcvt.f32.s32 %v2572_v58  ;;  %v2787_v39 = vpop.permute.xlu2 %1145 }
 0x32e   :  { %922 = vst.msk [vmem:[%s3104_s4 + $0x10] sm:$0xff] %vm919_vm4, %v905_v34  ;;  %v483_v49 = vadd.s32 %v482_v27, %v480_v48  ;;  %v440_v52 = vshll.u32 %v439_v11, 16  ;;  %v718_v27 = vld [vmem:[#allocation3 + $0x50] sm:$0xff]  ;;  %v1155_v11 = vadd.s32 96, %v1998_v26 }
 0x330   :  { %v737_v38 = vsel %vm3165_vm6, %v483_v49, %v721_v36  ;;  %vm525_vm7 = vcmp.eq.s32.totalorder %v2162_v17, %v483_v49  ;;  %v384_v36 = vshll.u32 %v383_v31, 16  ;;  %v714_v49 = vld [vmem:[#allocation3 + $0x30] sm:$0xff]  ;;  %v1063_v31 = vld [vmem:[#allocation2 + $0x8] sm:$0xff] }
 0x331   :  { %753 = vst.msk [vmem:[#allocation3 + $0x68] sm:$0xff] %vm72_vm0, %v737_v38  ;;  %1562 = vmatmul.msk.f32.vlgmr.msrb.gmra.mxu3 %vm525_vm7, %v1831_v53  ;;  %v409_v42 = vpop.xlane.xlu0 %408 }
 0x332   :  { %v410_v46 = vcvt.f32.s32 %v409_v42  ;;  %v341_v42 = vcvt.f32.s32 %v2662_v6 }
 0x333   :  { %v395_v45 = vpop.xlane.xlu1 %394 }
 0x334   :  { %v2764_v29 = vadd.s32 %v412_v43, %v410_v46  ;;  %v396_v56 = vcvt.f32.s32 %v395_v45  ;;  %953 = vperm.xlu0 %1664, %v936_v54   ;;  %v342_v45 = vshll.u32 %v341_v42, 16  ;;  %v711_v54 = vld [vmem:[#allocation3 + $0x18] sm:$0xff]  ;;  %v1670_v43 = vld [vmem:[#allocation5 + $0x8] sm:$0xff] }
 0x336   :  { %v732_v15 = vsel %vm649_vm10, %v2764_v29, %v716_v47  ;;  %v2770_v21 = vadd.s32 %v398_v22, %v396_v56  ;;  %vm3167_vm10 = vmmov %vm3161_vm3  ;;  %v1149_v47 = vadd.s32 88, %v1998_v26  ;;  %v509_v56 = vcvt.f32.s32 %v2677_v4 }
 0x337   :  { %748 = vst.msk [vmem:[#allocation3 + $0x40] sm:$0xff] %vm72_vm0, %v732_v15  ;;  %v425_v4 = vcvt.f32.s32 %v2688_v10  ;;  %v717_v10 = vld [vmem:[#allocation3 + $0x48] sm:$0xff]  ;;  %vm517_vm3 = vcmp.eq.s32.totalorder %v2162_v17, %v2595_v16  ;;  %vm520_vm14 = vcmp.eq.s32.totalorder %v2162_v17, %v2764_v29 }
 0x338   :  { %v731_v14 = vsel %vm3166_vm13, %v2770_v21, %v715_v62  ;;  %v949_v24 = vld [vmem:[#allocation3 + $0x68] sm:$0xff]  ;;  %v510_v19 = vshll.u32 %v509_v56, 16 }
 0x339   :  { %747 = vst.msk [vmem:[#allocation3 + $0x38] sm:$0xff] %vm72_vm0, %v731_v14  ;;  %992 = vperm.xlu2 %1658, %v949_v24   ;;  %1563 = vmatmul.msk.f32.gmra.mxu3 %vm526_vm2, %v1831_v53  ;;  %v723_v24 = vld [vmem:[#allocation3 + $0x78] sm:$0xff]  ;;  %v3176_v29 = vld [vmem:[#allocation43_spill] sm:$0xff] }
 0x33a   :  { %vm837_vm7 = vcmp.eq.s32.totalorder %v3176_v29, 1 }
 0x33b   :  { %v353_v59 = vpop.xlane.xlu1 %352 }
 0x33c   :  { %v354_v63 = vcvt.f32.s32 %v353_v59 }
 0x33e   :  { %v357_v8 = vadd.s32 %v356_v2, %v354_v63  ;;  %v944_v0 = vld [vmem:[#allocation3 + $0x40] sm:$0xff]  ;;  %v3171_v63 = vld [vmem:[#allocation32_spill] sm:$0xff] }
 0x33f   :  { %977 = vperm.xlu1 %1657, %v944_v0   ;;  %v2810_v2 = vld [vmem:[#allocation8] ss:$0 sm:$0xff] }
 0x340   :  { %v728_v5 = vsel %vm645_vm15, %v357_v8, %v712_v32  ;;  %v943_v20 = vld [vmem:[#allocation3 + $0x38] sm:$0xff] }
 0x341   :  { %744 = vst.msk [vmem:[#allocation3 + $0x20] sm:$0xff] %vm72_vm0, %v728_v5  ;;  %974 = vperm.xlu2 %1658, %v943_v20   ;;  %v426_v5 = vshll.u32 %v425_v4, 16 }
 0x343   :  { %v437_v13 = vpop.xlane.xlu1 %436 }
 0x344   :  { %v438_v37 = vcvt.f32.s32 %v437_v13 }
 0x346   :  { %v2789_v34 = vadd.s32 %v440_v52, %v438_v37  ;;  %v453_v52 = vcvt.f32.s32 %v2713_v1 }
 0x348   :  { %v734_v58 = vsel %vm3167_vm10, %v2789_v34, %v718_v27  ;;  %v940_v48 = vld [vmem:[#allocation3 + $0x20] sm:$0xff]  ;;  %v454_v27 = vshll.u32 %v453_v52, 16  ;;  %vm522_vm13 = vcmp.eq.s32.totalorder %v2162_v17, %v2789_v34  ;;  %vm524_vm10 = vcmp.eq.s32.totalorder %v2162_v17, %v2725_v12  ;;  %v3179_v52 = vld [vmem:[#allocation23_spill] sm:$0xff] }
 0x349   :  { %750 = vst.msk [vmem:[#allocation3 + $0x50] sm:$0xff] %vm72_vm0, %v734_v58  ;;  %965 = vperm.xlu2 %1658, %v940_v48   ;;  %v1161_v48 = vadd.s32 104, %v1998_v26 }
 0x34d   :  { %v381_v41 = vpop.xlane.xlu2 %380 }
 0x34e   :  { %v382_v50 = vcvt.f32.s32 %v381_v41 }
 0x350   :  { %v385_v3 = vadd.s32 %v384_v36, %v382_v50  ;;  %v946_v38 = vld [vmem:[#allocation3 + $0x50] sm:$0xff] }
 0x351   :  { %983 = vperm.xlu2 %1658, %v946_v38   ;;  %v3175_v36 = vld [vmem:[#allocation20_spill] sm:$0xff] }
 0x352   :  { %v730_v30 = vsel %vm647_vm9, %v385_v3, %v714_v49  ;;  %vm3173_vm9 = vcmp.lt.f32.partialorder %v3171_v63, %v3172_v51  ;;  %vm518_vm11 = vcmp.eq.s32.totalorder %v2162_v17, %v385_v3  ;;  %v1194_v50 = vadd.f32 %v3175_v36, %v1063_v31  ;;  %v948_v51 = vld [vmem:[#allocation3 + $0x60] sm:$0xff]  ;;  %v1067_v36 = vld [vmem:[#allocation2 + $0x28] sm:$0xff] }
 0x353   :  { %746 = vst.msk [vmem:[#allocation3 + $0x30] sm:$0xff] %vm72_vm0, %v730_v30 }
 0x355   :  { %v339_v33 = vpop.xlane.xlu2 %338 }
 0x356   :  { %v340_v44 = vcvt.f32.s32 %v339_v33  ;;  %v1167_v33 = vadd.s32 112, %v1998_v26 }
 0x358   :  { %v343_v22 = vadd.s32 %v342_v45, %v340_v44 }
 0x359   :  { %1659 = vset.pattern.permute.xlu2 %v1149_v47  ;;  %v1671_v47 = vld [vmem:[#allocation5] sm:$0xff] }
 0x35a   :  { %v727_v6 = vsel %vm644_vm1, %v343_v22, %v711_v54  ;;  %vm515_vm15 = vcmp.eq.s32.totalorder %v2162_v17, %v343_v22  ;;  %vm516_vm1 = vcmp.eq.s32.totalorder %v2162_v17, %v357_v8 }
 0x35b   :  { %743 = vst.msk [vmem:[#allocation3 + $0x18] sm:$0xff] %vm72_vm0, %v727_v6  ;;  %1552 = vmatmul.msk.f32.gmra.mxu1 %vm515_vm15, %v1831_v53  ;;  %v942_v6 = vld [vmem:[#allocation3 + $0x30] sm:$0xff] }
 0x35d   :  { %v507_v15 = vpop.xlane.xlu2 %506 }
 0x35e   :  { %v508_v14 = vcvt.f32.s32 %v507_v15 }
 0x360   :  { %v511_v59 = vadd.s32 %v510_v19, %v508_v14 }
 0x361   :  { %1151 = vperm.xlu2 %1659, %v2810_v2  }
 0x362   :  { %v739_v32 = vsel %vm3173_vm9, %v511_v59, %v723_v24  ;;  %vm527_vm8 = vcmp.eq.s32.totalorder %v2162_v17, %v511_v59  ;;  %v939_v56 = vld [vmem:[#allocation3 + $0x18] sm:$0xff]  ;;  %v3177_v24 = vld [vmem:[#allocation40_spill] sm:$0xff] }
 0x363   :  { %755 = vst.msk [vmem:[#allocation3 + $0x78] sm:$0xff] %vm72_vm0, %v739_v32  ;;  %1553 = vmatmul.msk.f32.gmra.mxu1 %vm516_vm1, %v1831_v53  ;;  %1564 = vmatmul.msk.f32.gmra.mxu3 %vm527_vm8, %v1831_v53  ;;  %vm850_vm9 = vcmp.eq.s32.totalorder %v3177_v24, 1  ;;  %vm840_vm8 = vcmp.eq.s32.totalorder %v2674_v23, 1  ;;  %v1077_v23 = vld [vmem:[#allocation2 + $0x78] sm:$0xff]  ;;  %v2928_v24 = vpop.permute.xlu1 %968 }
 0x365   :  { %v423_v0 = vpop.xlane.xlu2 %422 }
 0x366   :  { %v424_v20 = vcvt.f32.s32 %v423_v0  ;;  %v1062_v0 = vld [vmem:[#allocation2] sm:$0xff] }
 0x368   :  { %v427_v13 = vadd.s32 %v426_v5, %v424_v20  ;;  %v3178_v5 = vld [vmem:[#allocation19_spill] sm:$0xff] }
 0x369   :  { %1660 = vset.pattern.permute.xlu2 %v1155_v11  ;;  %v1193_v20 = vadd.f32 %v3178_v5, %v1062_v0 }
 0x36a   :  { %v733_v8 = vsel %vm650_vm12, %v427_v13, %v717_v10  ;;  %vm519_vm12 = vcmp.eq.s32.totalorder %v2162_v17, %v2770_v21  ;;  %vm521_vm6 = vcmp.eq.s32.totalorder %v2162_v17, %v427_v13  ;;  %v951_v11 = vld [vmem:[#allocation3 + $0x78] sm:$0xff]  ;;  %v1066_v13 = vld [vmem:[#allocation2 + $0x20] sm:$0xff] }
 0x36b   :  { %749 = vst.msk [vmem:[#allocation3 + $0x48] sm:$0xff] %vm72_vm0, %v733_v8  ;;  %1554 = vmatmul.msk.f32.gmra.mxu1 %vm517_vm3, %v1831_v53  ;;  %v1064_v8 = vld [vmem:[#allocation2 + $0x10] sm:$0xff]  ;;  %vm851_vm3 = vcmp.eq.s32.totalorder %v2671_v60, 1 }
 0x36d   :  { %v2875_v54 = vpop.permute.xlu2 %956 }
 0x371   :  { %1157 = vperm.xlu2 %1660, %v2810_v2  }
 0x372   :  { %v451_v37 = vpop.xlane.xlu0 %450  ;;  %v945_v14 = vld [vmem:[#allocation3 + $0x48] sm:$0xff] }
 0x373   :  { %v452_v58 = vcvt.f32.s32 %v451_v37  ;;  %1555 = vmatmul.msk.f32.gmra.mxu1 %vm518_vm11, %v1831_v53  ;;  %v1197_v37 = vadd.f32 %v3179_v52, %v1066_v13 }
 0x375   :  { %v455_v55 = vadd.s32 %v454_v27, %v452_v58  ;;  %v3180_v27 = vld [vmem:[#allocation22_spill] sm:$0xff] }
 0x376   :  { %v1195_v58 = vadd.f32 %v3180_v27, %v1064_v8 }
 0x377   :  { %v735_v16 = vsel %vm652_vm5, %v455_v55, %v719_v40  ;;  %vm836_vm5 = vcmp.eq.s32.totalorder %v3174_v57, 1  ;;  %vm523_vm2 = vcmp.eq.s32.totalorder %v2162_v17, %v455_v55  ;;  %v1065_v40 = vld [vmem:[#allocation2 + $0x18] sm:$0xff] }
 0x378   :  { %751 = vst.msk [vmem:[#allocation3 + $0x58] sm:$0xff] %vm72_vm0, %v735_v16  ;;  %v3181_v55 = vld [vmem:[#allocation41_spill] sm:$0xff] }
 0x379   :  { %1661 = vset.pattern.permute.xlu2 %v1161_v48  ;;  %vm839_vm1 = vcmp.eq.s32.totalorder %v3181_v55, 1  ;;  %v1071_v48 = vld [vmem:[#allocation2 + $0x48] sm:$0xff]  ;;  %v3182_v57 = vld [vmem:[#allocation21_spill] sm:$0xff] }
 0x37b   :  { %1556 = vmatmul.msk.f32.gmra.mxu1 %vm519_vm12, %v1831_v53  ;;  %vm842_vm12 = vcmp.eq.s32.totalorder %v2648_v25, 1 }
 0x37f   :  { %v947_v1 = vld [vmem:[#allocation3 + $0x58] sm:$0xff] }
 0x380   :  { %986 = vperm.xlu1 %1657, %v947_v1  }
 0x381   :  { %1163 = vperm.xlu2 %1661, %v2810_v2  }
 0x383   :  { %1557 = vmatmul.msk.f32.gmra.mxu1 %vm520_vm14, %v1831_v53 }
 0x385   :  { %v2858_v42 = vpop.permute.xlu0 %1175 }
 0x387   :  { %v577_v9 = vpop.f32.mrf.mxu0 }
 0x388   :  { %v852_v41 = vsel %vm836_vm5, %v577_v9, 0.0  ;;  %1662 = vset.pattern.permute.xlu1 %v1167_v33  ;;  %v1196_v9 = vadd.f32 %v3182_v57, %v1065_v40  ;;  %vm844_vm5 = vcmp.eq.s32.totalorder %v2660_v7, 1 }
 0x389   :  { %v903_v49 = vmul.f32 -0.5, %v852_v41  ;;  %1666 = vset.pattern.permute.xlu2 %v3147_v18 }
 0x38a   :  { %1229 = vperm.xlu2 %1666, %v1194_v50   ;;  %v1074_v50 = vld [vmem:[#allocation2 + $0x60] sm:$0xff] }
 0x38b   :  { %920 = vst.msk [vmem:[%s3104_s4] sm:$0xff] %vm919_vm4, %v903_v49  ;;  %1558 = vmatmul.msk.f32.gmra.mxu1 %vm521_vm6, %v1831_v53  ;;  %v1306_v45 = vsub.f32 %v903_v49, %v1671_v47  ;;  %vm845_vm6 = vcmp.eq.s32.totalorder %v2683_v28, 1 }
 0x38d   :  { %v1322_v22 = vmul.f32 %v1306_v45, %v1306_v45  ;;  %v1069_v45 = vld [vmem:[#allocation2 + $0x38] sm:$0xff] }
 0x38e   :  { %v2868_v34 = vpop.permute.xlu0 %810 }
 0x38f   :  { %v580_v21 = vpop.f32.mrf.mxu0  ;;  %vm843_vm14 = vcmp.eq.s32.totalorder %v2868_v34, 1 }
 0x390   :  { %v853_v3 = vsel %vm837_vm7, %v580_v21, 0.0 }
 0x391   :  { %v904_v38 = vmul.f32 -0.5, %v853_v3  ;;  %v3183_v3 = vld [vmem:[#allocation24_spill] sm:$0xff] }
 0x393   :  { %921 = vst.msk [vmem:[%s3104_s4 + $0x8] sm:$0xff] %vm919_vm4, %v904_v38  ;;  %1559 = vmatmul.msk.f32.gmra.mxu1 %vm522_vm13, %v1831_v53  ;;  %v1307_v46 = vsub.f32 %v904_v38, %v1670_v43  ;;  %v2877_v62 = vpop.permute.xlu2 %992  ;;  %v1198_v38 = vadd.f32 %v3183_v3, %v1067_v36  ;;  %vm847_vm13 = vcmp.eq.s32.totalorder %v2705_v35, 1 }
 0x395   :  { %v1323_v30 = vmul.f32 %v1307_v46, %v1307_v46 }
 0x396   :  { %v2873_v44 = vpop.permute.xlu0 %819 }
 0x397   :  { %1340 = vadd.xlane.f32.xlu0 %v1323_v30  ;;  %v3184_v30 = vld [vmem:[#allocation37_spill] sm:$0xff]  ;;  %vm846_vm7 = vcmp.eq.s32.totalorder %v2873_v44, 1  ;;  %v2966_v44 = vadd.s32 4294967280, %v2162_v17 }
 0x398   :  { %vm841_vm11 = vcmp.eq.s32.totalorder %v3184_v30, 1 }
 0x39b   :  { %1560 = vmatmul.msk.f32.gmra.mxu1 %vm523_vm2, %v1831_v53  ;;  %vm1003_vm2 = vcmask 130112  }
 0x39e   :  { %v829_v26 = vpop.permute.xlu0 %828 }
 0x39f   :  { %vm849_vm15 = vcmp.eq.s32.totalorder %v829_v26, 1  ;;  %v3185_v26 = vld [vmem:[#allocation38_spill] sm:$0xff] }
 0x3a3   :  { %1561 = vmatmul.msk.f32.gmra.mxu1 %vm524_vm10, %v1831_v53  ;;  %v2883_v53 = vpop.permute.xlu2 %974  ;;  %vm1007_vm10 = vcmask 195712  }
 0x3a6   :  { %v954_v7 = vpop.permute.xlu0 %953 }
 0x3aa   :  { %1338 = vadd.xlane.f32.xlu1 %v1322_v22  ;;  %v1208_v22 = vadd.f32 %v2858_v42, %v1077_v23  ;;  %v1072_v42 = vld [vmem:[#allocation2 + $0x50] sm:$0xff]  ;;  %v2991_v23 = vadd.s32 4294967256, %v2162_v17 }
 0x3ab   :  { %962 = vperm.xlu0 %1664, %v939_v56   ;;  %v2891_v32 = vpop.permute.xlu2 %965 }
 0x3b3   :  { %971 = vperm.xlu0 %1664, %v942_v6   ;;  %v2895_v10 = vpop.permute.xlu2 %983  ;;  %v1200_v6 = vadd.f32 %v3185_v26, %v1069_v45 }
 0x3b4   :  { %v616_v15 = vpop.f32.mrf.mxu3 }
 0x3b5   :  { %v865_v12 = vsel %vm849_vm15, %v616_v15, 0.0  ;;  %vm1011_vm15 = vcmask 261312  }
 0x3b6   :  { %v916_v19 = vmul.f32 -0.5, %v865_v12 }
 0x3b8   :  { %933 = vst.msk [vmem:[%s3104_s4 + $0x68] sm:$0xff] %vm919_vm4, %v916_v19  ;;  %v1203_v19 = vadd.f32 %v2787_v39, %v1072_v42  ;;  %v960_v39 = vpop.permute.xlu1 %959 }
 0x3b9   :  { %v1006_v36 = vperm.slane %v960_v39, %v2966_v44 }
 0x3bb   :  { %980 = vperm.xlu0 %1664, %v945_v14  }
 0x3bc   :  { %v619_v59 = vpop.f32.mrf.mxu3 }
 0x3bd   :  { %v866_v4 = vsel %vm850_vm9, %v619_v59, 0.0  ;;  %vm1015_vm9 = vcmask 326912  }
 0x3be   :  { %v917_v63 = vmul.f32 -0.5, %v866_v4 }
 0x3c0   :  { %934 = vst.msk [vmem:[%s3104_s4 + $0x70] sm:$0xff] %vm919_vm4, %v917_v63  ;;  %v1075_v63 = vld [vmem:[#allocation2 + $0x68] sm:$0xff]  ;;  %v2944_v34 = vpop.permute.xlu1 %995 }
 0x3c3   :  { %1169 = vperm.xlu1 %1662, %v2810_v2   ;;  %989 = vperm.xlu0 %1664, %v948_v51   ;;  %v2899_v2 = vpop.permute.xlu2 %1151 }
 0x3cb   :  { %1665 = vset.pattern.permute.xlu1 %v3147_v18  ;;  %998 = vperm.xlu0 %1664, %v951_v11   ;;  %v1202_v18 = vadd.f32 %v2740_v61, %v1071_v48  ;;  %v1158_v41 = vpop.permute.xlu2 %1157  ;;  %v2961_v48 = vadd.s32 4294967288, %v2162_v17 }
 0x3cc   :  { %1226 = vperm.xlu1 %1665, %v1193_v20   ;;  %v1205_v29 = vadd.f32 %v1158_v41, %v1074_v50  ;;  %v2974_v41 = vadd.s32 4294967264, %v2162_v17 }
 0x3d3   :  { %1238 = vperm.xlu0 %1664, %v1197_v37   ;;  %v2951_v37 = vpop.permute.xlu1 %977 }
 0x3d4   :  { %1232 = vperm.xlu1 %1665, %v1195_v58  }
 0x3d8   :  { %v586_v16 = vpop.f32.mrf.mxu1 }
 0x3d9   :  { %v855_v1 = vsel %vm839_vm1, %v586_v16, 0.0  ;;  %v1000_v16 = vperm.slane %v954_v7, %v2162_v17 }
 0x3da   :  { %v906_v31 = vmul.f32 -0.5, %v855_v1 }
 0x3db   :  { %1253 = vperm.xlu0 %1664, %v1202_v18   ;;  %v1164_v59 = vpop.permute.xlu2 %1163 }
 0x3dc   :  { %923 = vst.msk [vmem:[%s3104_s4 + $0x18] sm:$0xff] %vm919_vm4, %v906_v31  ;;  %1235 = vperm.xlu1 %1665, %v1196_v9   ;;  %v1206_v51 = vadd.f32 %v1164_v59, %v1075_v63  ;;  %v1002_v31 = vperm.slane %v2875_v54, %v2961_v48  ;;  %v2971_v9 = vadd.s32 4294967272, %v2162_v17 }
 0x3de   :  { %v1004_v35 = vsel %vm1003_vm2, %v1002_v31, %v1000_v16  ;;  %v3051_v16 = vadd.s32 4294967176, %v2162_v17 }
 0x3df   :  { %v1008_v3 = vsel %vm1007_vm10, %v1006_v36, %v1004_v35  ;;  %v3188_v35 = vld [vmem:[#allocation39_spill] sm:$0xff] }
 0x3e0   :  { %v589_v49 = vpop.f32.mrf.mxu1 }
 0x3e1   :  { %v856_v21 = vsel %vm840_vm8, %v589_v49, 0.0  ;;  %vm1023_vm8 = vcmask 458112  }
 0x3e2   :  { %v907_v61 = vmul.f32 -0.5, %v856_v21 }
 0x3e3   :  { %1262 = vperm.xlu0 %1664, %v1205_v29  }
 0x3e4   :  { %924 = vst.msk [vmem:[%s3104_s4 + $0x20] sm:$0xff] %vm919_vm4, %v907_v61  ;;  %1241 = vperm.xlu1 %1665, %v1198_v38   ;;  %v1014_v61 = vperm.slane %v2891_v32, %v2974_v41  ;;  %v2998_v32 = vadd.s32 4294967240, %v2162_v17 }
 0x3e6   :  { %v622_v43 = vpop.f32.mrf.mxu3 }
 0x3e7   :  { %v867_v46 = vsel %vm851_vm3, %v622_v43, 0.0  ;;  %v3186_v43 = vld [vmem:[#allocation42_spill] sm:$0xff]  ;;  %vm1027_vm3 = vcmask 523712  }
 0x3e8   :  { %v918_v33 = vmul.f32 -0.5, %v867_v46  ;;  %v592_v47 = vpop.f32.mrf.mxu1  ;;  %vm848_vm1 = vcmp.eq.s32.totalorder %v3186_v43, 1 }
 0x3e9   :  { %v857_v56 = vsel %vm841_vm11, %v592_v47, 0.0  ;;  %vm1035_vm11 = vcmask 654912  }
 0x3ea   :  { %935 = vst.msk [vmem:[%s3104_s4 + $0x78] sm:$0xff] %vm919_vm4, %v918_v33  ;;  %v908_v15 = vmul.f32 -0.5, %v857_v56  ;;  %v1018_v56 = vperm.slane %v2928_v24, %v2991_v23  ;;  %v3019_v24 = vadd.s32 4294967216, %v2162_v17 }
 0x3eb   :  { %1271 = vperm.xlu0 %1664, %v1208_v22   ;;  %v2995_v22 = vadd.s32 4294967248, %v2162_v17 }
 0x3ec   :  { %925 = vst.msk [vmem:[%s3104_s4 + $0x28] sm:$0xff] %vm919_vm4, %v908_v15  ;;  %1247 = vperm.xlu1 %1665, %v1200_v6   ;;  %v1026_v15 = vperm.slane %v2883_v53, %v2998_v32  ;;  %v1038_v63 = vperm.slane %v2895_v10, %v3019_v24 }
 0x3f0   :  { %v595_v60 = vpop.f32.mrf.mxu1 }
 0x3f1   :  { %v858_v12 = vsel %vm842_vm12, %v595_v60, 0.0  ;;  %vm1039_vm12 = vcmask 720512  }
 0x3f2   :  { %v909_v14 = vmul.f32 -0.5, %v858_v12  ;;  %v2958_v28 = vpop.permute.xlu1 %986  ;;  %v3012_v12 = vadd.s32 4294967232, %v2162_v17 }
 0x3f4   :  { %926 = vst.msk [vmem:[%s3104_s4 + $0x30] sm:$0xff] %vm919_vm4, %v909_v14  ;;  %1256 = vperm.xlu1 %1665, %v1203_v19   ;;  %v3016_v14 = vadd.s32 4294967224, %v2162_v17  ;;  %v1030_v59 = vperm.slane %v2951_v37, %v3012_v12 }
 0x3f8   :  { %v598_v4 = vpop.f32.mrf.mxu1 }
 0x3f9   :  { %v859_v25 = vsel %vm843_vm14, %v598_v4, 0.0  ;;  %vm1043_vm14 = vcmask 786112  }
 0x3fa   :  { %v910_v0 = vmul.f32 -0.5, %v859_v25 }
 0x3fc   :  { %927 = vst.msk [vmem:[%s3104_s4 + $0x38] sm:$0xff] %vm919_vm4, %v910_v0  ;;  %1265 = vperm.xlu1 %1665, %v1206_v51   ;;  %v3029_v0 = vadd.s32 4294967208, %v2162_v17 }
 0x3fe   :  { %v1042_v10 = vperm.slane %v2958_v28, %v3029_v0 }
 0x400   :  { %v601_v11 = vpop.f32.mrf.mxu1 }
 0x401   :  { %v860_v5 = vsel %vm844_vm5, %v601_v11, 0.0  ;;  %v3033_v11 = vadd.s32 4294967200, %v2162_v17  ;;  %vm1047_vm5 = vcmask 851712  }
 0x402   :  { %v911_v20 = vmul.f32 -0.5, %v860_v5  ;;  %v3036_v5 = vadd.s32 4294967192, %v2162_v17 }
 0x404   :  { %928 = vst.msk [vmem:[%s3104_s4 + $0x40] sm:$0xff] %vm919_vm4, %v911_v20  ;;  %v1068_v20 = vld [vmem:[#allocation2 + $0x30] sm:$0xff]  ;;  %v1050_v7 = vperm.slane %v2877_v62, %v3036_v5 }
 0x408   :  { %v604_v13 = vpop.f32.mrf.mxu1 }
 0x409   :  { %v861_v8 = vsel %vm845_vm6, %v604_v13, 0.0  ;;  %vm1051_vm6 = vcmask 917312  }
 0x40a   :  { %v912_v52 = vmul.f32 -0.5, %v861_v8  ;;  %v1341_v55 = vpop.xlane.xlu0 %1340 }
 0x40b   :  { %v1438_v49 = vsel %vm72_vm0, %v1341_v55, 0.0  ;;  %v3047_v55 = vadd.s32 4294967184, %v2162_v17 }
 0x40c   :  { %929 = vst.msk [vmem:[%s3104_s4 + $0x48] sm:$0xff] %vm919_vm4, %v912_v52 }
 0x410   :  { %v607_v27 = vpop.f32.mrf.mxu1 }
 0x411   :  { %v862_v58 = vsel %vm846_vm7, %v607_v27, 0.0  ;;  %v3187_v27 = vld [vmem:[#allocation25_spill] sm:$0xff]  ;;  %vm1055_vm7 = vcmask 982912  }
 0x412   :  { %v913_v40 = vmul.f32 -0.5, %v862_v58  ;;  %v1199_v58 = vadd.f32 %v3187_v27, %v1068_v20 }
 0x414   :  { %930 = vst.msk [vmem:[%s3104_s4 + $0x50] sm:$0xff] %vm919_vm4, %v913_v40 }
 0x418   :  { %v610_v18 = vpop.f32.mrf.mxu1 }
 0x419   :  { %v863_v1 = vsel %vm847_vm13, %v610_v18, 0.0  ;;  %v1054_v18 = vperm.slane %v2944_v34, %v3047_v55  ;;  %vm1059_vm13 = vcmask 1048512   ;;  %v1230_v34 = vpop.permute.xlu2 %1229 }
 0x41a   :  { %v914_v57 = vmul.f32 -0.5, %v863_v1  ;;  %v1070_v1 = vld [vmem:[#allocation2 + $0x40] sm:$0xff] }
 0x41b   :  { %v1201_v36 = vadd.f32 %v3188_v35, %v1070_v1 }
 0x41c   :  { %931 = vst.msk [vmem:[%s3104_s4 + $0x58] sm:$0xff] %vm919_vm4, %v914_v57 }
 0x41d   :  { %v1339_v50 = vpop.xlane.xlu1 %1338  ;;  %v963_v54 = vpop.permute.xlu0 %962 }
 0x41e   :  { %v1437_v29 = vsel %vm72_vm0, %v1339_v50, 0.0  ;;  %v1010_v21 = vperm.slane %v963_v54, %v2971_v9  ;;  %vm1019_vm0 = vcmask 392512  }
 0x41f   :  { %v1439_v38 = vadd.f32 %v1438_v49, %v1437_v29  ;;  %v1073_v49 = vld [vmem:[#allocation2 + $0x58] sm:$0xff] }
 0x420   :  { %v1012_v46 = vsel %vm1011_vm15, %v1010_v21, %v1008_v3  ;;  %v613_v30 = vpop.f32.mrf.mxu1  ;;  %v1204_v21 = vadd.f32 %v2899_v2, %v1073_v49 }
 0x421   :  { %v1016_v33 = vsel %vm1015_vm9, %v1014_v61, %v1012_v46  ;;  %v864_v47 = vsel %vm848_vm1, %v613_v30, 0.0  ;;  %1468 = vadd.xlane.f32.xlu2 %v1439_v38  ;;  %v1274_v38 = vperm.slane %v1230_v34, %v2961_v48  ;;  %v1076_v46 = vld [vmem:[#allocation2 + $0x70] sm:$0xff] }
 0x422   :  { %v915_v45 = vmul.f32 -0.5, %v864_v47  ;;  %v1020_v60 = vsel %vm1019_vm0, %v1018_v56, %v1016_v33 }
 0x424   :  { %932 = vst.msk [vmem:[%s3104_s4 + $0x60] sm:$0xff] %vm919_vm4, %v915_v45  ;;  %vm1031_vm4 = vcmask 589312   ;;  %s1832_s4 = smov [#allocation11]  }
 0x425   :  { %v972_v26 = vpop.permute.xlu0 %971  ;;  %s1487_s21 = sshll.u32 %s1832_s4, 4  ;;  %s1488_s21 = int_to_ptr.vmem [resolvable:$true] %s1487_s21 }
 0x426   :  { %v1022_v6 = vperm.slane %v972_v26, %v2995_v22 }
 0x428   :  { %v1024_v42 = vsel %vm1023_vm8, %v1022_v6, %v1020_v60 }
 0x429   :  { %v1028_v19 = vsel %vm1027_vm3, %v1026_v15, %v1024_v42 }
 0x42a   :  { %v1032_v25 = vsel %vm1031_vm4, %v1030_v59, %v1028_v19 }
 0x42d   :  { %v981_v53 = vpop.permute.xlu0 %980 }
 0x42e   :  { %v1034_v4 = vperm.slane %v981_v53, %v3016_v14 }
 0x430   :  { %v1036_v51 = vsel %vm1035_vm11, %v1034_v4, %v1032_v25 }
 0x431   :  { %v1040_v39 = vsel %vm1039_vm12, %v1038_v63, %v1036_v51 }
 0x432   :  { %v1044_v37 = vsel %vm1043_vm14, %v1042_v10, %v1040_v39 }
 0x435   :  { %v1170_v13 = vpop.permute.xlu1 %1169  ;;  %v990_v8 = vpop.permute.xlu0 %989 }
 0x436   :  { %v1046_v52 = vperm.slane %v990_v8, %v3033_v11  ;;  %v1207_v33 = vadd.f32 %v1170_v13, %v1076_v46 }
 0x438   :  { %v1048_v40 = vsel %vm1047_vm5, %v1046_v52, %v1044_v37 }
 0x439   :  { %v1052_v28 = vsel %vm1051_vm6, %v1050_v7, %v1048_v40  ;;  %1244 = vperm.xlu2 %1666, %v1199_v58  }
 0x43a   :  { %v1056_v50 = vsel %vm1055_vm7, %v1054_v18, %v1052_v28 }
 0x43d   :  { %v999_v62 = vpop.permute.xlu0 %998 }
 0x43e   :  { %v1058_v31 = vperm.slane %v999_v62, %v3051_v16  ;;  %v1227_v57 = vpop.permute.xlu1 %1226 }
 0x43f   :  { %v1273_v61 = vperm.slane %v1227_v57, %v2162_v17 }
 0x440   :  { %v1060_v54 = vsel %vm1059_vm13, %v1058_v31, %v1056_v50 }
 0x441   :  { %1250 = vperm.xlu2 %1666, %v1201_v36   ;;  %1061 = vst [vmem:[#allocation11] sm:$0x1] %v1060_v54  ;;  %v1275_v47 = vsel %vm1003_vm2, %v1274_v38, %v1273_v61  ;;  %vm1478_vm2 = vcmask 0  }
 0x442   :  { %1492 = dma.vmem_to_hbm [thread:$0]  %s1488_s21, 16, %s1490_s24, [#allocation7]  }
 0x445   :  { %v1239_v43 = vpop.permute.xlu0 %1238 }
 0x446   :  { %v1233_v29 = vpop.permute.xlu1 %1232  ;;  %v1280_v56 = vperm.slane %v1239_v43, %v2974_v41 }
 0x447   :  { %v1276_v3 = vperm.slane %v1233_v29, %v2966_v44 }
 0x449   :  { %1259 = vperm.xlu2 %1666, %v1204_v21   ;;  %v1277_v2 = vsel %vm1007_vm10, %v1276_v3, %v1275_v47 }
 0x44e   :  { %v1236_v30 = vpop.permute.xlu1 %1235 }
 0x44f   :  { %v1278_v45 = vperm.slane %v1236_v30, %v2971_v9 }
 0x451   :  { %v1279_v26 = vsel %vm1011_vm15, %v1278_v45, %v1277_v2  ;;  %1268 = vperm.xlu2 %1666, %v1207_v33  }
 0x452   :  { %v1281_v17 = vsel %vm1015_vm9, %v1280_v56, %v1279_v26 }
 0x456   :  { %v1242_v44 = vpop.permute.xlu1 %1241 }
 0x457   :  { %v1282_v48 = vperm.slane %v1242_v44, %v2991_v23  ;;  %v1254_v23 = vpop.permute.xlu0 %1253 }
 0x458   :  { %v1290_v10 = vperm.slane %v1254_v23, %v3016_v14 }
 0x459   :  { %v1283_v9 = vsel %vm1019_vm0, %v1282_v48, %v1281_v17 }
 0x45e   :  { %v1248_v59 = vpop.permute.xlu1 %1247 }
 0x45f   :  { %v1286_v51 = vperm.slane %v1248_v59, %v2998_v32  ;;  %v1263_v37 = vpop.permute.xlu0 %1262 }
 0x460   :  { %v1296_v32 = vperm.slane %v1263_v37, %v3033_v11 }
 0x466   :  { %v1257_v8 = vpop.permute.xlu1 %1256 }
 0x467   :  { %v1272_v18 = vpop.permute.xlu0 %1271 }
 0x46e   :  { %v1266_v28 = vpop.permute.xlu1 %1265 }
 0x46f   :  { %v1298_v62 = vperm.slane %v1266_v28, %v3036_v5 }
 0x494   :  { %v1469_v41 = vpop.xlane.xlu2 %1468 }
 0x495   :  { %v1470_v6 = vrot.slane %v1469_v41, 4 }
 0x497   :  { %v1471_v15 = vadd.f32 %v1470_v6, %v1469_v41 }
 0x499   :  { %v1472_v60 = vrot.slane %v1471_v15, 2 }
 0x49b   :  { %v1473_v42 = vadd.f32 %v1472_v60, %v1471_v15 }
 0x49c   :  { %v1245_v19 = vpop.permute.xlu2 %1244 }
 0x49d   :  { %v1474_v53 = vrot.slane %v1473_v42, 1  ;;  %v1284_v4 = vperm.slane %v1245_v19, %v2995_v22  ;;  %v1292_v22 = vperm.slane %v1257_v8, %v3019_v24 }
 0x49f   :  { %v1475_v63 = vadd.f32 %v1474_v53, %v1473_v42  ;;  %v1285_v25 = vsel %vm1023_vm8, %v1284_v4, %v1283_v9 }
 0x4a0   :  { %v1287_v13 = vsel %vm1027_vm3, %v1286_v51, %v1285_v25 }
 0x4a1   :  { %1629 = vpush %v1475_v63 }
 0x4a4   :  { %v1251_v39 = vpop.permute.xlu2 %1250 }
 0x4a5   :  { %v1288_v20 = vperm.slane %v1251_v39, %v3012_v12 }
 0x4a7   :  { %v1289_v52 = vsel %vm1031_vm4, %v1288_v20, %v1287_v13 }
 0x4a8   :  { %v1291_v7 = vsel %vm1035_vm11, %v1290_v10, %v1289_v52 }
 0x4a9   :  { %v1293_v40 = vsel %vm1039_vm12, %v1292_v22, %v1291_v7 }
 0x4ac   :  { %v1260_v27 = vpop.permute.xlu2 %1259 }
 0x4ad   :  { %v1294_v58 = vperm.slane %v1260_v27, %v3029_v0  ;;  %v1302_v0 = vperm.slane %v1272_v18, %v3051_v16 }
 0x4af   :  { %v1295_v12 = vsel %vm1043_vm14, %v1294_v58, %v1293_v40 }
 0x4b0   :  { %v1297_v14 = vsel %vm1047_vm5, %v1296_v32, %v1295_v12 }
 0x4b1   :  { %v1299_v11 = vsel %vm1051_vm6, %v1298_v62, %v1297_v14 }
 0x4b4   :  { %v1269_v1 = vpop.permute.xlu2 %1268 }
 0x4b5   :  { %v1300_v24 = vperm.slane %v1269_v1, %v3047_v55 }
 0x4b7   :  { %v1301_v31 = vsel %vm1055_vm7, %v1300_v24, %v1299_v11 }
 0x4b8   :  { %v1303_v57 = vsel %vm1059_vm13, %v1302_v0, %v1301_v31 }
 0x4b9   :  { %1305 = vst [vmem:[#allocation12] sm:$0x1] %v1303_v57 }
 0x4ba   :  { %1503 = dma.vmem_to_hbm [thread:$0]  %s1499_s25, 16, %s1501_s28, [#allocation13]  }
 0x4d2   :  { %s1630_s10 = spop %1629 }
 0x4d3   :  { %v1477_v5 = vstv %s1630_s10 }
 0x4d4   :  { %1479 = vst.msk [vmem:[#allocation14] sm:$0x1] %vm1478_vm2, %v1477_v5 }
 0x4d5   :  { %1514 = dma.vmem_to_hbm [thread:$0]  %s1510_s6, 16, %s1512_s8, [#allocation13]  }
 0x4d6   :  { %1820 = dma.done.wait [#allocation7], 16  }
 0x4d7   :  { %1821 = vsyncadd [#allocation7], 4294967280 }
 0x4d8   :  { %1822 = dma.done.wait [#allocation13], 32  }
 0x4d9   :  { %1823 = vsyncadd [#allocation13], 4294967264 }
 0x4da   :  { %1529 = vsyncpa [#allocation6], 1 }
 0x4db   :  { %1530 = vsyncpa [#allocation9], 1 }
 0x4dc   :  { %1531 = vsyncpa [#allocation7], 1 }
 0x4dd   :  { %1532 = vsyncpa [#allocation13], 1 }

// kernel: tpu_custom_call.1
= control target key start
LH: loop header
LB: loop body
LE: loop exit
PB: predicated region body
PF: predicated region fallthrough
CT: control target
= control target key end

     0   :  { %13 = vsyncpa [#allocation6], 0  ;;  %s3100_s0 = inlined_call_operand.hbm [shape: f32[128,128], index: 0, kind: input, shape index: {}]   ;;  %s3101_s1 = inlined_call_operand.hbm [shape: f32[1,1,128], index: 1, kind: input, shape index: {}]   ;;  %s3102_s2 = inlined_call_operand.hbm [shape: f32[128,128], index: 2, kind: input, shape index: {}]   ;;  %s3103_s3 = inlined_call_operand.vmem [shape: f32[1,128], index: 3, kind: input, shape index: {}]   ;;  %s3104_s4 = inlined_call_operand.vmem [shape: f32[128,32], index: 4, kind: output, shape index: {0}]   ;;  %s3105_s5 = inlined_call_operand.hbm [shape: s32[1,1,128], index: 5, kind: output, shape index: {1}]   ;;  %s3106_s6 = inlined_call_operand.hbm [shape: f32[1,1,128], index: 6, kind: output, shape index: {2}]   ;;  %s3107_s7 = inlined_call_operand.hbm [shape: f32[1,1,1], index: 7, kind: output, shape index: {3}]  }
   0x1   :  { %14 = vsyncpa [#allocation9], 0 }
   0x2   :  { %15 = vsyncpa [#allocation7], 0  ;;  %s35_s26 = sshll.u32 %s3101_s1, 4  ;;  %s36_s26 = int_to_ptr.hbm [resolvable:$true] %s35_s26 }
   0x3   :  { %16 = vsyncpa [#allocation13], 0  ;;  %s1824_s27 = smov [#allocation8]   ;;  %s21_s8 = sshll.u32 %s3100_s0, 4  ;;  %s22_s8 = int_to_ptr.hbm [resolvable:$true] %s21_s8 }
   0x4   :  { %s37_s28 = sshll.u32 %s1824_s27, 4  ;;  %s1825_s9 = smov [#allocation5]   ;;  %s38_s28 = int_to_ptr.vmem [resolvable:$true] %s37_s28 }
   0x5   :  { %40 = dma.hbm_to_vmem [thread:$0]  %s36_s26, 16, %s38_s28, [#allocation9]  }
   0x6   :  { %s23_s10 = sshll.u32 %s1825_s9, 4  ;;  %s1826_s11 = smov 128   ;;  %s24_s10 = int_to_ptr.vmem [resolvable:$true] %s23_s10 }
   0x7   :  { %s1827_s12 = smov 8   ;;  %s45_s1 = sshll.u32 %s3102_s2, 4  ;;  %s46_s1 = int_to_ptr.hbm [resolvable:$true] %s45_s1 }
   0x8   :  { %29 = dma.hbm_to_vmem [thread:$0]  %s22_s8, 2048, %s24_s10, [#allocation6], %s1826_s11, %s1826_s11, %s1827_s12  }
   0x9   :  { %s1828_s15 = smov [#allocation10]  }
   0xa   :  { %s47_s16 = sshll.u32 %s1828_s15, 4  ;;  %s48_s16 = int_to_ptr.vmem [resolvable:$true] %s47_s16 }
   0xb   :  { %53 = dma.hbm_to_vmem [thread:$0]  %s46_s1, 2048, %s48_s16, [#allocation9], %s1826_s11, %s1826_s11, %s1827_s12  }
   0xc   :  { %1816 = dma.done.wait [#allocation6], 2048  }
   0xd   :  { %1817 = vsyncadd [#allocation6], 4294965248 }
   0xe   :  { %1818 = dma.done.wait [#allocation9], 2064  }
   0xf   :  { %1819 = vsyncadd [#allocation9], 4294965232  ;;  %v1884_v0 = vld [vmem:[#allocation10 + $0x78] sm:$0xff]  ;;  %v1889_v1 = vld [vmem:[#allocation10 + $0x70] sm:$0xff]  ;;  %v254_v25 = vlaneseq  ;;  %vm72_vm0 = vcmask 7168   ;;  %v1829_v60 = vmov inf  }
  0x10   :  { %157 = vmatpush.xpose.msra.mxu0 %v1884_v0  ;;  %1565 = vmatpush.xpose.msra.mxu2 %v1884_v0  ;;  %v1895_v2 = vld [vmem:[#allocation10 + $0x68] sm:$0xff]  ;;  %v1899_v3 = vld [vmem:[#allocation10 + $0x60] sm:$0xff]  ;;  %v1904_v4 = vld [vmem:[#allocation10 + $0x58] sm:$0xff]  ;;  %73 = vst.msk [vmem:[#allocation2] sm:$0xff] %vm72_vm0, %v1829_v60  ;;  %s1489_s24 = sshll.u32 %s3105_s5, 4  ;;  %s1833_s5 = smov [#allocation12]   ;;  %s1490_s24 = int_to_ptr.hbm [resolvable:$true] %s1489_s24 }
  0x11   :  { %1566 = vmatpush.xpose.msra.mxu3 %v1884_v0  ;;  %1597 = vmatpush.msra.mxu1 %v1884_v0  ;;  %v1908_v5 = vld [vmem:[#allocation10 + $0x50] sm:$0xff]  ;;  %v1913_v6 = vld [vmem:[#allocation10 + $0x48] sm:$0xff]  ;;  %v1917_v7 = vld [vmem:[#allocation10 + $0x40] sm:$0xff]  ;;  %v1998_v26 = vshrl.u32 %v254_v25, 7  ;;  %74 = vst.msk [vmem:[#allocation2 + $0x8] sm:$0xff] %vm72_vm0, %v1829_v60  ;;  %s1498_s25 = sshll.u32 %s1833_s5, 4  ;;  %s1499_s25 = int_to_ptr.vmem [resolvable:$true] %s1498_s25 }
  0x12   :  { %v1922_v8 = vld [vmem:[#allocation10 + $0x38] sm:$0xff]  ;;  %v1926_v9 = vld [vmem:[#allocation10 + $0x30] sm:$0xff]  ;;  %v1931_v10 = vld [vmem:[#allocation10 + $0x28] sm:$0xff]  ;;  %75 = vst.msk [vmem:[#allocation2 + $0x10] sm:$0xff] %vm72_vm0, %v1829_v60  ;;  %s1500_s28 = sshll.u32 %s3106_s6, 4  ;;  %s1511_s8 = sshll.u32 %s3107_s7, 4  ;;  %s1501_s28 = int_to_ptr.hbm [resolvable:$true] %s1500_s28  ;;  %s1512_s8 = int_to_ptr.hbm [resolvable:$true] %s1511_s8 }
  0x13   :  { %1599 = vmatpush.msra.mxu1 %v1889_v1  ;;  %v1935_v11 = vld [vmem:[#allocation10 + $0x20] sm:$0xff]  ;;  %v1940_v12 = vld [vmem:[#allocation10 + $0x18] sm:$0xff]  ;;  %v1944_v13 = vld [vmem:[#allocation10 + $0x10] sm:$0xff]  ;;  %1642 = vset.pattern.permute.xlu2 %v1998_v26  ;;  %v1089_v27 = vadd.s32 8, %v1998_v26  ;;  %v1095_v28 = vadd.s32 16, %v1998_v26  ;;  %v1101_v35 = vadd.s32 24, %v1998_v26 }
  0x14   :  { %158 = vmatpush.xpose.msra.mxu0 %v1889_v1  ;;  %1567 = vmatpush.xpose.msra.mxu2 %v1889_v1  ;;  %v1949_v14 = vld [vmem:[#allocation10 + $0x8] sm:$0xff]  ;;  %v1953_v15 = vld [vmem:[#allocation10] sm:$0xff]  ;;  %v128_v22 = vld [vmem:[#allocation5 + $0x38] sm:$0xff]  ;;  %v1107_v36 = vadd.s32 32, %v1998_v26  ;;  %v1113_v39 = vadd.s32 40, %v1998_v26  ;;  %v1119_v40 = vadd.s32 48, %v1998_v26 }
  0x15   :  { %1568 = vmatpush.xpose.msra.mxu3 %v1889_v1  ;;  %1601 = vmatpush.msra.mxu1 %v1895_v2  ;;  %v121_v16 = vld [vmem:[#allocation5] sm:$0xff]  ;;  %v126_v17 = vld [vmem:[#allocation5 + $0x28] sm:$0xff]  ;;  %v127_v19 = vld [vmem:[#allocation5 + $0x30] sm:$0xff]  ;;  %76 = vst.msk [vmem:[#allocation2 + $0x18] sm:$0xff] %vm72_vm0, %v1829_v60  ;;  %s1834_s9 = smov [#allocation14]  }
  0x16   :  { %v133_v18 = vld [vmem:[#allocation5 + $0x60] sm:$0xff]  ;;  %v122_v20 = vld [vmem:[#allocation5 + $0x8] sm:$0xff]  ;;  %v123_v23 = vld [vmem:[#allocation5 + $0x10] sm:$0xff]  ;;  %1643 = vset.pattern.permute.xlu1 %v1089_v27  ;;  %1644 = vset.pattern.permute.xlu0 %v1095_v28  ;;  %77 = vst.msk [vmem:[#allocation2 + $0x20] sm:$0xff] %vm72_vm0, %v1829_v60  ;;  %s1509_s6 = sshll.u32 %s1834_s9, 4  ;;  %s1510_s6 = int_to_ptr.vmem [resolvable:$true] %s1509_s6 }
  0x17   :  { %1603 = vmatpush.msra.mxu1 %v1899_v3  ;;  %v134_v21 = vld [vmem:[#allocation5 + $0x68] sm:$0xff]  ;;  %v135_v24 = vld [vmem:[#allocation5 + $0x70] sm:$0xff]  ;;  %v129_v29 = vld [vmem:[#allocation5 + $0x40] sm:$0xff]  ;;  %78 = vst.msk [vmem:[#allocation2 + $0x28] sm:$0xff] %vm72_vm0, %v1829_v60 }
  0x18   :  { %159 = vmatpush.xpose.msra.mxu0 %v1895_v2  ;;  %1569 = vmatpush.xpose.msra.mxu2 %v1895_v2  ;;  %v124_v30 = vld [vmem:[#allocation5 + $0x18] sm:$0xff]  ;;  %v2009_v32 = vld [vmem:[#allocation8] ss:$0 sm:$0xff]  ;;  %v130_v33 = vld [vmem:[#allocation5 + $0x48] sm:$0xff]  ;;  %79 = vst.msk [vmem:[#allocation2 + $0x30] sm:$0xff] %vm72_vm0, %v1829_v60 }
  0x19   :  { %1570 = vmatpush.xpose.msra.mxu3 %v1895_v2  ;;  %1605 = vmatpush.msra.mxu1 %v1904_v4  ;;  %v136_v31 = vld [vmem:[#allocation5 + $0x78] sm:$0xff]  ;;  %v125_v34 = vld [vmem:[#allocation5 + $0x20] sm:$0xff]  ;;  %v131_v37 = vld [vmem:[#allocation5 + $0x50] sm:$0xff]  ;;  %80 = vst.msk [vmem:[#allocation2 + $0x38] sm:$0xff] %vm72_vm0, %v1829_v60 }
  0x1a   :  { %v132_v38 = vld [vmem:[#allocation5 + $0x58] sm:$0xff]  ;;  %v2034_v41 = vld [vmem:[%s3103_s3] ss:$0 sm:$0xff]  ;;  %81 = vst.msk [vmem:[#allocation2 + $0x40] sm:$0xff] %vm72_vm0, %v1829_v60 }
  0x1b   :  { %1607 = vmatpush.msra.mxu1 %v1908_v5  ;;  %1085 = vperm.xlu2 %1642, %v2009_v32   ;;  %82 = vst.msk [vmem:[#allocation2 + $0x48] sm:$0xff] %vm72_vm0, %v1829_v60 }
  0x1c   :  { %160 = vmatpush.xpose.msra.mxu0 %v1899_v3  ;;  %1571 = vmatpush.xpose.msra.mxu2 %v1899_v3  ;;  %83 = vst.msk [vmem:[#allocation2 + $0x50] sm:$0xff] %vm72_vm0, %v1829_v60 }
  0x1d   :  { %1572 = vmatpush.xpose.msra.mxu3 %v1899_v3  ;;  %1609 = vmatpush.msra.mxu1 %v1913_v6  ;;  %84 = vst.msk [vmem:[#allocation2 + $0x58] sm:$0xff] %vm72_vm0, %v1829_v60 }
  0x1e   :  { %1091 = vperm.xlu1 %1643, %v2009_v32   ;;  %1097 = vperm.xlu0 %1644, %v2009_v32   ;;  %85 = vst.msk [vmem:[#allocation2 + $0x60] sm:$0xff] %vm72_vm0, %v1829_v60 }
  0x1f   :  { %1611 = vmatpush.msra.mxu1 %v1917_v7  ;;  %86 = vst.msk [vmem:[#allocation2 + $0x68] sm:$0xff] %vm72_vm0, %v1829_v60 }
  0x20   :  { %161 = vmatpush.xpose.msra.mxu0 %v1904_v4  ;;  %1573 = vmatpush.xpose.msra.mxu2 %v1904_v4  ;;  %87 = vst.msk [vmem:[#allocation2 + $0x70] sm:$0xff] %vm72_vm0, %v1829_v60 }
  0x21   :  { %1574 = vmatpush.xpose.msra.mxu3 %v1904_v4  ;;  %1613 = vmatpush.msra.mxu1 %v1922_v8  ;;  %88 = vst.msk [vmem:[#allocation2 + $0x78] sm:$0xff] %vm72_vm0, %v1829_v60  ;;  %v2284_v60 = vld [vmem:[#allocation2 + $0x38] sm:$0xff] }
  0x22   :  { %3141 = vst [vmem:[#allocation30_spill] sm:$0xff] %v2284_v60 }
  0x23   :  { %1615 = vmatpush.msra.mxu1 %v1926_v9  ;;  %1645 = vset.pattern.permute.xlu2 %v1101_v35 }
  0x24   :  { %162 = vmatpush.xpose.msra.mxu0 %v1908_v5  ;;  %1575 = vmatpush.xpose.msra.mxu2 %v1908_v5 }
  0x25   :  { %1576 = vmatpush.xpose.msra.mxu3 %v1908_v5  ;;  %1617 = vmatpush.msra.mxu1 %v1931_v10 }
  0x26   :  { %1646 = vset.pattern.permute.xlu1 %v1107_v36  ;;  %v2221_v36 = vld [vmem:[#allocation2 + $0x68] sm:$0xff] }
  0x27   :  { %1619 = vmatpush.msra.mxu1 %v1935_v11  ;;  %3137 = vst [vmem:[#allocation26_spill] sm:$0xff] %v2221_v36 }
  0x28   :  { %163 = vmatpush.xpose.msra.mxu0 %v1913_v6  ;;  %1577 = vmatpush.xpose.msra.mxu2 %v1913_v6 }
  0x29   :  { %1578 = vmatpush.xpose.msra.mxu3 %v1913_v6  ;;  %1621 = vmatpush.msra.mxu1 %v1940_v12 }
  0x2b   :  { %1623 = vmatpush.msra.mxu1 %v1944_v13  ;;  %1103 = vperm.xlu2 %1645, %v2009_v32  }
  0x2c   :  { %164 = vmatpush.xpose.msra.mxu0 %v1917_v7  ;;  %1579 = vmatpush.xpose.msra.mxu2 %v1917_v7 }
  0x2d   :  { %1580 = vmatpush.xpose.msra.mxu3 %v1917_v7  ;;  %1625 = vmatpush.msra.mxu1 %v1949_v14 }
  0x2e   :  { %1109 = vperm.xlu1 %1646, %v2009_v32  }
  0x2f   :  { %1627 = vmatpush.msra.mxu1 %v1953_v15 }
  0x30   :  { %165 = vmatpush.xpose.msra.mxu0 %v1922_v8  ;;  %1581 = vmatpush.xpose.msra.mxu2 %v1922_v8 }
  0x31   :  { %1582 = vmatpush.xpose.msra.mxu3 %v1922_v8 }
  0x33   :  { %1647 = vset.pattern.permute.xlu2 %v1113_v39 }
  0x34   :  { %166 = vmatpush.xpose.msra.mxu0 %v1926_v9  ;;  %1583 = vmatpush.xpose.msra.mxu2 %v1926_v9 }
  0x35   :  { %1584 = vmatpush.xpose.msra.mxu3 %v1926_v9 }
  0x36   :  { %1648 = vset.pattern.permute.xlu1 %v1119_v40 }
  0x38   :  { %167 = vmatpush.xpose.msra.mxu0 %v1931_v10  ;;  %1585 = vmatpush.xpose.msra.mxu2 %v1931_v10 }
  0x39   :  { %1586 = vmatpush.xpose.msra.mxu3 %v1931_v10 }
  0x3b   :  { %1115 = vperm.xlu2 %1647, %v2009_v32  }
  0x3c   :  { %168 = vmatpush.xpose.msra.mxu0 %v1935_v11  ;;  %1587 = vmatpush.xpose.msra.mxu2 %v1935_v11 }
  0x3d   :  { %1588 = vmatpush.xpose.msra.mxu3 %v1935_v11 }
  0x3e   :  { %1121 = vperm.xlu1 %1648, %v2009_v32  }
  0x40   :  { %169 = vmatpush.xpose.msra.mxu0 %v1940_v12  ;;  %1589 = vmatpush.xpose.msra.mxu2 %v1940_v12 }
  0x41   :  { %1590 = vmatpush.xpose.msra.mxu3 %v1940_v12 }
  0x44   :  { %170 = vmatpush.xpose.msra.mxu0 %v1944_v13  ;;  %1591 = vmatpush.xpose.msra.mxu2 %v1944_v13 }
  0x45   :  { %1592 = vmatpush.xpose.msra.mxu3 %v1944_v13 }
  0x48   :  { %171 = vmatpush.xpose.msra.mxu0 %v1949_v14  ;;  %1593 = vmatpush.xpose.msra.mxu2 %v1949_v14 }
  0x49   :  { %1594 = vmatpush.xpose.msra.mxu3 %v1949_v14 }
  0x4c   :  { %172 = vmatpush.xpose.msra.mxu0 %v1953_v15  ;;  %1595 = vmatpush.xpose.msra.mxu2 %v1953_v15 }
  0x4d   :  { %1596 = vmatpush.xpose.msra.mxu3 %v1953_v15 }
  0x4f   :  { %173 = vmatmul.f32.vlgmr.msra.gmra.mxu0 %v121_v16  ;;  %188 = vmatmul.f32.vlgmr.msra.gmra.mxu2 %v126_v17  ;;  %v2162_v17 = vand.u32 127, %v254_v25  ;;  %v2188_v25 = vld [vmem:[#allocation2 + $0x28] sm:$0xff] }
  0x50   :  { %560 = vmatpush.msrb.mxu0 %v1884_v0  ;;  %209 = vmatmul.f32.vlgmr.msra.gmra.mxu3 %v133_v18 }
  0x51   :  { %1598 = vmatpush.msrb.mxu3 %v1884_v0 }
  0x52   :  { %561 = vmatpush.msrb.mxu0 %v1889_v1 }
  0x53   :  { %1600 = vmatpush.msrb.mxu3 %v1889_v1 }
  0x54   :  { %562 = vmatpush.msrb.mxu0 %v1895_v2 }
  0x55   :  { %1602 = vmatpush.msrb.mxu3 %v1895_v2 }
  0x56   :  { %563 = vmatpush.msrb.mxu0 %v1899_v3 }
  0x57   :  { %1604 = vmatpush.msrb.mxu3 %v1899_v3  ;;  %191 = vmatmul.f32.gmra.mxu2 %v127_v19  ;;  %v2166_v19 = vld [vmem:[#allocation2] sm:$0xff] }
  0x58   :  { %564 = vmatpush.msrb.mxu0 %v1904_v4  ;;  %212 = vmatmul.f32.gmra.mxu3 %v134_v21 }
  0x59   :  { %176 = vmatmul.f32.gmra.mxu0 %v122_v20  ;;  %1606 = vmatpush.msrb.mxu3 %v1904_v4 }
  0x5a   :  { %565 = vmatpush.msrb.mxu0 %v1908_v5 }
  0x5b   :  { %1608 = vmatpush.msrb.mxu3 %v1908_v5 }
  0x5c   :  { %566 = vmatpush.msrb.mxu0 %v1913_v6 }
  0x5d   :  { %1610 = vmatpush.msrb.mxu3 %v1913_v6 }
  0x5e   :  { %567 = vmatpush.msrb.mxu0 %v1917_v7 }
  0x5f   :  { %194 = vmatmul.f32.gmra.mxu2 %v128_v22  ;;  %1612 = vmatpush.msrb.mxu3 %v1917_v7 }
  0x60   :  { %568 = vmatpush.msrb.mxu0 %v1922_v8  ;;  %215 = vmatmul.f32.gmra.mxu3 %v135_v24 }
  0x61   :  { %179 = vmatmul.f32.gmra.mxu0 %v123_v23  ;;  %1614 = vmatpush.msrb.mxu3 %v1922_v8 }
  0x62   :  { %569 = vmatpush.msrb.mxu0 %v1926_v9 }
  0x63   :  { %1616 = vmatpush.msrb.mxu3 %v1926_v9 }
  0x64   :  { %570 = vmatpush.msrb.mxu0 %v1931_v10 }
  0x65   :  { %1618 = vmatpush.msrb.mxu3 %v1931_v10 }
  0x66   :  { %571 = vmatpush.msrb.mxu0 %v1935_v11 }
  0x67   :  { %197 = vmatmul.f32.gmra.mxu2 %v129_v29  ;;  %1620 = vmatpush.msrb.mxu3 %v1935_v11  ;;  %v3110_v11 = vmov 0  }
  0x68   :  { %572 = vmatpush.msrb.mxu0 %v1940_v12  ;;  %218 = vmatmul.f32.gmra.mxu3 %v136_v31  ;;  %89 = vst.msk [vmem:[#allocation3] sm:$0xff] %vm72_vm0, %v3110_v11 }
  0x69   :  { %182 = vmatmul.f32.gmra.mxu0 %v124_v30  ;;  %1622 = vmatpush.msrb.mxu3 %v1940_v12  ;;  %90 = vst.msk [vmem:[#allocation3 + $0x8] sm:$0xff] %vm72_vm0, %v3110_v11  ;;  %v2196_v30 = vld [vmem:[#allocation2 + $0x60] sm:$0xff] }
  0x6a   :  { %573 = vmatpush.msrb.mxu0 %v1944_v13  ;;  %1649 = vset.pattern.permute.xlu0 %v3110_v11  ;;  %91 = vst.msk [vmem:[#allocation3 + $0x10] sm:$0xff] %vm72_vm0, %v3110_v11 }
  0x6b   :  { %1624 = vmatpush.msrb.mxu3 %v1944_v13  ;;  %1650 = vset.pattern.permute.xlu2 %v3110_v11  ;;  %92 = vst.msk [vmem:[#allocation3 + $0x18] sm:$0xff] %vm72_vm0, %v3110_v11 }
  0x6c   :  { %574 = vmatpush.msrb.mxu0 %v1949_v14  ;;  %1651 = vset.pattern.permute.xlu1 %v3110_v11  ;;  %93 = vst.msk [vmem:[#allocation3 + $0x20] sm:$0xff] %vm72_vm0, %v3110_v11 }
  0x6d   :  { %1626 = vmatpush.msrb.mxu3 %v1949_v14  ;;  %94 = vst.msk [vmem:[#allocation3 + $0x28] sm:$0xff] %vm72_vm0, %v3110_v11 }
  0x6e   :  { %575 = vmatpush.msrb.mxu0 %v1953_v15  ;;  %95 = vst.msk [vmem:[#allocation3 + $0x30] sm:$0xff] %vm72_vm0, %v3110_v11 }
  0x6f   :  { %200 = vmatmul.f32.gmra.mxu2 %v130_v33  ;;  %1628 = vmatpush.msrb.mxu3 %v1953_v15  ;;  %96 = vst.msk [vmem:[#allocation3 + $0x38] sm:$0xff] %vm72_vm0, %v3110_v11 }
  0x70   :  { %97 = vst.msk [vmem:[#allocation3 + $0x40] sm:$0xff] %vm72_vm0, %v3110_v11 }
  0x71   :  { %185 = vmatmul.f32.gmra.mxu0 %v125_v34  ;;  %98 = vst.msk [vmem:[#allocation3 + $0x48] sm:$0xff] %vm72_vm0, %v3110_v11 }
  0x72   :  { %99 = vst.msk [vmem:[#allocation3 + $0x50] sm:$0xff] %vm72_vm0, %v3110_v11 }
  0x73   :  { %100 = vst.msk [vmem:[#allocation3 + $0x58] sm:$0xff] %vm72_vm0, %v3110_v11 }
  0x74   :  { %101 = vst.msk [vmem:[#allocation3 + $0x60] sm:$0xff] %vm72_vm0, %v3110_v11 }
  0x75   :  { %v2141_v12 = vpop.permute.xlu2 %1085  ;;  %102 = vst.msk [vmem:[#allocation3 + $0x68] sm:$0xff] %vm72_vm0, %v3110_v11 }
  0x76   :  { %3130 = vst [vmem:[#allocation19_spill] sm:$0xff] %v2141_v12 }
  0x77   :  { %203 = vmatmul.f32.gmra.mxu2 %v131_v37  ;;  %103 = vst.msk [vmem:[#allocation3 + $0x70] sm:$0xff] %vm72_vm0, %v3110_v11  ;;  %v2223_v37 = vld [vmem:[#allocation2 + $0x8] sm:$0xff] }
  0x78   :  { %104 = vst.msk [vmem:[#allocation3 + $0x78] sm:$0xff] %vm72_vm0, %v3110_v11 }
  0x7f   :  { %206 = vmatmul.f32.gmra.mxu2 %v132_v38 }
  0x85   :  { %v2155_v14 = vpop.permute.xlu2 %1103 }
  0x86   :  { %3132 = vst [vmem:[#allocation21_spill] sm:$0xff] %v2155_v14 }
  0x90   :  { %v2149_v13 = vpop.permute.xlu1 %1091  ;;  %v2157_v15 = vpop.permute.xlu0 %1097 }
  0x91   :  { %3131 = vst [vmem:[#allocation20_spill] sm:$0xff] %v2149_v13 }
  0x92   :  { %3133 = vst [vmem:[#allocation22_spill] sm:$0xff] %v2157_v15 }
  0x95   :  { %v2164_v18 = vpop.permute.xlu2 %1115 }
  0x96   :  { %3135 = vst [vmem:[#allocation24_spill] sm:$0xff] %v2164_v18  ;;  %v3147_v18 = vmov 0  }
  0xa0   :  { %v2159_v16 = vpop.permute.xlu1 %1109 }
  0xa1   :  { %3134 = vst [vmem:[#allocation23_spill] sm:$0xff] %v2159_v16 }
  0xb0   :  { %v2190_v27 = vpop.permute.xlu1 %1121 }
  0xb1   :  { %3136 = vst [vmem:[#allocation25_spill] sm:$0xff] %v2190_v27 }
  0xcc   :  { %v174_v42 = vpop.f32.mrf.mxu0 }
  0xcd   :  { %v2037_v43 = vadd.f32 %v2034_v41, %v174_v42  ;;  %v2245_v42 = vld [vmem:[#allocation2 + $0x70] sm:$0xff] }
  0xcf   :  { %222 = vmin.xlane.f32.xlu0 %v2037_v43 }
  0xd2   :  { %v189_v44 = vpop.f32.mrf.mxu2 }
  0xd3   :  { %v2041_v45 = vadd.f32 %v2034_v41, %v189_v44  ;;  %v210_v46 = vpop.f32.mrf.mxu3  ;;  %v2249_v44 = vld [vmem:[#allocation2 + $0x30] sm:$0xff] }
  0xd4   :  { %v2044_v47 = vadd.f32 %v2034_v41, %v210_v46  ;;  %3139 = vst [vmem:[#allocation28_spill] sm:$0xff] %v2249_v44 }
  0xd5   :  { %232 = vmin.xlane.f32.xlu2 %v2041_v45 }
  0xd6   :  { %v177_v48 = vpop.f32.mrf.mxu0 }
  0xd7   :  { %246 = vmin.xlane.f32.xlu0 %v2044_v47  ;;  %v2049_v50 = vadd.f32 %v2034_v41, %v177_v48 }
  0xda   :  { %v192_v49 = vpop.f32.mrf.mxu2 }
  0xdb   :  { %v213_v51 = vpop.f32.mrf.mxu3  ;;  %v2060_v56 = vadd.f32 %v2034_v41, %v192_v49 }
  0xdc   :  { %v2052_v52 = vadd.f32 %v2034_v41, %v213_v51 }
  0xde   :  { %v180_v53 = vpop.f32.mrf.mxu0  ;;  %248 = vmin.xlane.f32.xlu1 %v2052_v52 }
  0xdf   :  { %224 = vmin.xlane.f32.xlu0 %v2049_v50  ;;  %v2057_v54 = vadd.f32 %v2034_v41, %v180_v53 }
  0xe2   :  { %v195_v55 = vpop.f32.mrf.mxu2 }
  0xe3   :  { %v216_v57 = vpop.f32.mrf.mxu3  ;;  %v2073_v61 = vadd.f32 %v2034_v41, %v195_v55 }
  0xe4   :  { %v2063_v58 = vadd.f32 %v2034_v41, %v216_v57  ;;  %v1125_v57 = vadd.s32 56, %v1998_v26 }
  0xe6   :  { %v183_v59 = vpop.f32.mrf.mxu0  ;;  %250 = vmin.xlane.f32.xlu2 %v2063_v58  ;;  %226 = vmin.xlane.f32.xlu1 %v2057_v54 }
  0xe7   :  { %234 = vmin.xlane.f32.xlu0 %v2060_v56  ;;  %v2093_v3 = vadd.f32 %v2034_v41, %v183_v59  ;;  %v2282_v59 = vld [vmem:[#allocation2 + $0x40] sm:$0xff] }
  0xea   :  { %v198_v62 = vpop.f32.mrf.mxu2 }
  0xeb   :  { %v2077_v63 = vadd.f32 %v2034_v41, %v198_v62  ;;  %v219_v0 = vpop.f32.mrf.mxu3 }
  0xec   :  { %v2081_v1 = vadd.f32 %v2034_v41, %v219_v0  ;;  %v2290_v0 = vld [vmem:[#allocation2 + $0x78] sm:$0xff] }
  0xed   :  { %3142 = vst [vmem:[#allocation31_spill] sm:$0xff] %v2290_v0 }
  0xee   :  { %238 = vmin.xlane.f32.xlu2 %v2077_v63  ;;  %236 = vmin.xlane.f32.xlu1 %v2073_v61  ;;  %v186_v2 = vpop.f32.mrf.mxu0 }
  0xef   :  { %252 = vmin.xlane.f32.xlu0 %v2081_v1  ;;  %v2096_v4 = vadd.f32 %v2034_v41, %v186_v2 }
  0xf2   :  { %v201_v5 = vpop.f32.mrf.mxu2 }
  0xf3   :  { %v2100_v6 = vadd.f32 %v2034_v41, %v201_v5 }
  0xf6   :  { %230 = vmin.xlane.f32.xlu2 %v2096_v4  ;;  %228 = vmin.xlane.f32.xlu1 %v2093_v3 }
  0xf7   :  { %240 = vmin.xlane.f32.xlu0 %v2100_v6 }
  0xfa   :  { %v204_v7 = vpop.f32.mrf.mxu2 }
  0xfb   :  { %v2109_v8 = vadd.f32 %v2034_v41, %v204_v7 }
  0xfe   :  { %242 = vmin.xlane.f32.xlu1 %v2109_v8 }
 0x102   :  { %v207_v9 = vpop.f32.mrf.mxu2 }
 0x103   :  { %v2113_v10 = vadd.f32 %v2034_v41, %v207_v9 }
 0x105   :  { %244 = vmin.xlane.f32.xlu2 %v2113_v10 }
 0x142   :  { %v2168_v20 = vpop.xlane.xlu0 %222 }
 0x143   :  { %vm256_vm1 = vcmp.le.f32.partialorder %v2037_v43, %v2168_v20  ;;  %vm641_vm2 = vcmp.lt.f32.partialorder %v2168_v20, %v2166_v19  ;;  %v2247_v43 = vld [vmem:[#allocation2 + $0x10] sm:$0xff] }
 0x144   :  { %v657_v21 = vsel %vm641_vm2, %v2168_v20, %v2166_v19  ;;  %v772_v22 = vsel %vm641_vm2, 1, %v3110_v11  ;;  %v2184_v23 = vsel %vm256_vm1, %v2162_v17, 128  ;;  %v3157_v20 = vld [vmem:[#allocation30_spill] sm:$0xff] }
 0x145   :  { %674 = vst.msk [vmem:[#allocation2] sm:$0xff] %vm72_vm0, %v657_v21  ;;  %789 = vperm.xlu0 %1649, %v772_v22   ;;  %v289_v24 = vshra.s32 %v2184_v23, 16  ;;  %v1131_v22 = vadd.s32 64, %v1998_v26 }
 0x147   :  { %v2192_v28 = vcvt.s32.f32 %v289_v24 }
 0x148   :  { %v2194_v29 = vpop.xlane.xlu2 %232 }
 0x149   :  { %vm646_vm3 = vcmp.lt.f32.partialorder %v2194_v29, %v2188_v25  ;;  %292 = vmin.xlane.f32.xlu1 %v2192_v28  ;;  %vm261_vm14 = vcmp.le.f32.partialorder %v2041_v45, %v2194_v29 }
 0x14a   :  { %v662_v31 = vsel %vm646_vm3, %v2194_v29, %v2188_v25  ;;  %v2206_v33 = vpop.xlane.xlu0 %246  ;;  %v777_v34 = vsel %vm646_vm3, 1, %v3110_v11 }
 0x14b   :  { %679 = vst.msk [vmem:[#allocation2 + $0x28] sm:$0xff] %vm72_vm0, %v662_v31  ;;  %vm3113_vm4 = vcmp.lt.f32.partialorder %v2206_v33, %v2196_v30  ;;  %804 = vperm.xlu2 %1650, %v777_v34   ;;  %v2328_v31 = vld [vmem:[#allocation2 + $0x20] sm:$0xff]  ;;  %v2330_v34 = vld [vmem:[#allocation2 + $0x18] sm:$0xff] }
 0x14c   :  { %v669_v35 = vsel %vm3113_vm4, %v2206_v33, %v2196_v30  ;;  %v784_v62 = vsel %vm3113_vm4, 1, %v3110_v11  ;;  %3144 = vst [vmem:[#allocation33_spill] sm:$0xff] %v2330_v34 }
 0x14d   :  { %686 = vst.msk [vmem:[#allocation2 + $0x60] sm:$0xff] %vm72_vm0, %v669_v35  ;;  %1652 = vset.pattern.permute.xlu0 %v1125_v57 }
 0x151   :  { %v2225_v38 = vpop.xlane.xlu1 %248 }
 0x152   :  { %3138 = vst [vmem:[#allocation27_spill] sm:$0xff] %v2225_v38  ;;  %vm3108_vm5 = vcmp.lt.f32.partialorder %v2225_v38, %v2221_v36  ;;  %v2229_v39 = vpop.xlane.xlu0 %224 }
 0x153   :  { %v670_v40 = vsel %vm3108_vm5, %v2225_v38, %v2221_v36  ;;  %vm642_vm6 = vcmp.lt.f32.partialorder %v2229_v39, %v2223_v37  ;;  %vm257_vm12 = vcmp.le.f32.partialorder %v2049_v50, %v2229_v39  ;;  %1653 = vset.pattern.permute.xlu2 %v1131_v22  ;;  %v2378_v22 = vld [vmem:[#allocation2 + $0x50] sm:$0xff] }
 0x154   :  { %687 = vst.msk [vmem:[#allocation2 + $0x68] sm:$0xff] %vm72_vm0, %v670_v40  ;;  %v658_v41 = vsel %vm642_vm6, %v2229_v39, %v2223_v37  ;;  %v2326_v24 = vsel %vm257_vm12, %v2162_v17, 128  ;;  %v773_v35 = vsel %vm642_vm6, 1, %v3110_v11  ;;  %v2338_v40 = vld [vmem:[#allocation2 + $0x48] sm:$0xff] }
 0x155   :  { %675 = vst.msk [vmem:[#allocation2 + $0x8] sm:$0xff] %vm72_vm0, %v658_v41 }
 0x156   :  { %3145 = vst [vmem:[#allocation34_spill] sm:$0xff] %v2378_v22 }
 0x159   :  { %v2251_v46 = vpop.xlane.xlu2 %250  ;;  %v2253_v48 = vpop.xlane.xlu1 %226 }
 0x15a   :  { %vm655_vm7 = vcmp.lt.f32.partialorder %v2251_v46, %v2245_v42  ;;  %vm643_vm8 = vcmp.lt.f32.partialorder %v2253_v48, %v2247_v43  ;;  %v2259_v49 = vpop.xlane.xlu0 %234  ;;  %vm258_vm4 = vcmp.le.f32.partialorder %v2057_v54, %v2253_v48 }
 0x15b   :  { %3140 = vst [vmem:[#allocation29_spill] sm:$0xff] %v2259_v49  ;;  %v671_v51 = vsel %vm655_vm7, %v2251_v46, %v2245_v42  ;;  %v659_v53 = vsel %vm643_vm8, %v2253_v48, %v2247_v43  ;;  %vm647_vm9 = vcmp.lt.f32.partialorder %v2259_v49, %v2249_v44  ;;  %v2451_v16 = vsel %vm258_vm4, %v2162_v17, 128 }
 0x15c   :  { %688 = vst.msk [vmem:[#allocation2 + $0x70] sm:$0xff] %vm72_vm0, %v671_v51  ;;  %v663_v55 = vsel %vm647_vm9, %v2259_v49, %v2249_v44  ;;  %v778_v15 = vsel %vm647_vm9, 1, %v3147_v18  ;;  %v317_v12 = vshra.s32 %v2451_v16, 16  ;;  %vm262_vm4 = vcmp.le.f32.partialorder %v2060_v56, %v2259_v49 }
 0x15d   :  { %676 = vst.msk [vmem:[#allocation2 + $0x10] sm:$0xff] %vm72_vm0, %v659_v53  ;;  %v303_v53 = vshra.s32 %v2326_v24, 16 }
 0x15e   :  { %680 = vst.msk [vmem:[#allocation2 + $0x30] sm:$0xff] %vm72_vm0, %v663_v55  ;;  %v2459_v54 = vcvt.s32.f32 %v317_v12 }
 0x161   :  { %v2292_v2 = vpop.xlane.xlu2 %238  ;;  %v2294_v5 = vpop.xlane.xlu1 %236 }
 0x162   :  { %vm649_vm10 = vcmp.lt.f32.partialorder %v2292_v2, %v2282_v59  ;;  %vm3112_vm11 = vcmp.lt.f32.partialorder %v2294_v5, %v2284_v60  ;;  %v2300_v7 = vpop.xlane.xlu0 %252  ;;  %825 = vperm.xlu1 %1651, %v784_v62   ;;  %v2364_v62 = vsel %vm261_vm14, %v2162_v17, 128 }
 0x163   :  { %3143 = vst [vmem:[#allocation32_spill] sm:$0xff] %v2300_v7  ;;  %v665_v9 = vsel %vm649_vm10, %v2292_v2, %v2282_v59  ;;  %v664_v21 = vsel %vm3112_vm11, %v2294_v5, %v2284_v60  ;;  %vm3129_vm13 = vcmp.lt.f32.partialorder %v2300_v7, %v2290_v0  ;;  %vm263_vm11 = vcmp.le.f32.partialorder %v2073_v61, %v2294_v5 }
 0x164   :  { %682 = vst.msk [vmem:[#allocation2 + $0x40] sm:$0xff] %vm72_vm0, %v665_v9  ;;  %v672_v50 = vsel %vm3129_vm13, %v2300_v7, %v2290_v0 }
 0x165   :  { %681 = vst.msk [vmem:[#allocation2 + $0x38] sm:$0xff] %vm72_vm0, %v664_v21  ;;  %v2373_v21 = vcvt.s32.f32 %v303_v53 }
 0x166   :  { %689 = vst.msk [vmem:[#allocation2 + $0x78] sm:$0xff] %vm72_vm0, %v672_v50  ;;  %v359_v50 = vshra.s32 %v2364_v62, 16 }
 0x169   :  { %v2340_v41 = vpop.xlane.xlu2 %230  ;;  %v2342_v51 = vpop.xlane.xlu1 %228 }
 0x16a   :  { %vm645_vm15 = vcmp.lt.f32.partialorder %v2340_v41, %v2328_v31  ;;  %vm644_vm1 = vcmp.lt.f32.partialorder %v2342_v51, %v2330_v34  ;;  %v2349_v55 = vpop.xlane.xlu0 %240  ;;  %792 = vperm.xlu1 %1651, %v773_v35  }
 0x16b   :  { %v661_v45 = vsel %vm645_vm15, %v2340_v41, %v2328_v31  ;;  %v660_v57 = vsel %vm644_vm1, %v2342_v51, %v2330_v34  ;;  %vm650_vm12 = vcmp.lt.f32.partialorder %v2349_v55, %v2338_v40 }
 0x16c   :  { %678 = vst.msk [vmem:[#allocation2 + $0x20] sm:$0xff] %vm72_vm0, %v661_v45  ;;  %v666_v9 = vsel %vm650_vm12, %v2349_v55, %v2338_v40  ;;  %v2384_v45 = vcvt.s32.f32 %v359_v50  ;;  %v719_v40 = vld [vmem:[#allocation3 + $0x58] sm:$0xff] }
 0x16d   :  { %677 = vst.msk [vmem:[#allocation2 + $0x18] sm:$0xff] %vm72_vm0, %v660_v57  ;;  %v2393_v57 = vld [vmem:[#allocation2 + $0x58] sm:$0xff] }
 0x16e   :  { %683 = vst.msk [vmem:[#allocation2 + $0x48] sm:$0xff] %vm72_vm0, %v666_v9 }
 0x16f   :  { %306 = vmin.xlane.f32.xlu0 %v2373_v21 }
 0x171   :  { %v2380_v35 = vpop.xlane.xlu1 %242 }
 0x172   :  { %3146 = vst [vmem:[#allocation35_spill] sm:$0xff] %v2380_v35  ;;  %vm3109_vm14 = vcmp.lt.f32.partialorder %v2380_v35, %v2378_v22 }
 0x173   :  { %v667_v53 = vsel %vm3109_vm14, %v2380_v35, %v2378_v22  ;;  %vm268_vm14 = vcmp.le.f32.partialorder %v2044_v47, %v2206_v33 }
 0x174   :  { %684 = vst.msk [vmem:[#allocation2 + $0x50] sm:$0xff] %vm72_vm0, %v667_v53  ;;  %362 = vmin.xlane.f32.xlu2 %v2384_v45  ;;  %v2409_v53 = vsel %vm268_vm14, %v2162_v17, 128  ;;  %vm269_vm14 = vcmp.le.f32.partialorder %v2052_v52, %v2225_v38 }
 0x175   :  { %v457_v11 = vshra.s32 %v2409_v53, 16  ;;  %v2424_v47 = vsel %vm269_vm14, %v2162_v17, 128  ;;  %vm260_vm14 = vcmp.le.f32.partialorder %v2096_v4, %v2340_v41 }
 0x176   :  { %v471_v14 = vshra.s32 %v2424_v47, 16 }
 0x177   :  { %v2413_v27 = vcvt.s32.f32 %v457_v11 }
 0x178   :  { %v2395_v9 = vpop.xlane.xlu2 %244  ;;  %v2429_v11 = vcvt.s32.f32 %v471_v14  ;;  %v2447_v14 = vsel %vm260_vm14, %v2162_v17, 128  ;;  %vm259_vm14 = vcmp.le.f32.partialorder %v2093_v3, %v2342_v51  ;;  %v775_v3 = vsel %vm644_vm1, 1, %v3147_v18  ;;  %v3172_v51 = vld [vmem:[#allocation31_spill] sm:$0xff] }
 0x179   :  { %vm652_vm5 = vcmp.lt.f32.partialorder %v2395_v9, %v2393_v57  ;;  %v2485_v36 = vsel %vm259_vm14, %v2162_v17, 128  ;;  %vm270_vm14 = vcmp.le.f32.partialorder %v2063_v58, %v2251_v46  ;;  %v780_v58 = vsel %vm649_vm10, 1, %v3147_v18  ;;  %v708_v46 = vld [vmem:[#allocation3] sm:$0xff] }
 0x17a   :  { %v668_v50 = vsel %vm652_vm5, %v2395_v9, %v2393_v57  ;;  %v331_v49 = vshra.s32 %v2485_v36, 16 }
 0x17b   :  { %685 = vst.msk [vmem:[#allocation2 + $0x58] sm:$0xff] %vm72_vm0, %v668_v50  ;;  %v774_v50 = vsel %vm643_vm8, 1, %v3147_v18 }
 0x17c   :  { %v2495_v38 = vcvt.s32.f32 %v331_v49 }
 0x183   :  { %1127 = vperm.xlu0 %1652, %v2009_v32  }
 0x18c   :  { %1133 = vperm.xlu2 %1653, %v2009_v32  }
 0x194   :  { %1654 = vset.pattern.permute.xlu2 %v3147_v18  ;;  %460 = vmin.xlane.f32.xlu1 %v2413_v27 }
 0x195   :  { %795 = vperm.xlu2 %1654, %v774_v50   ;;  %v2436_v50 = vsel %vm263_vm11, %v2162_v17, 128  ;;  %vm266_vm11 = vcmp.le.f32.partialorder %v2109_v8, %v2380_v35  ;;  %v2473_v8 = vsel %vm262_vm4, %v2162_v17, 128 }
 0x196   :  { %v387_v52 = vshra.s32 %v2436_v50, 16  ;;  %v373_v12 = vshra.s32 %v2473_v8, 16 }
 0x198   :  { %v2444_v61 = vcvt.s32.f32 %v387_v52  ;;  %v2462_v52 = vsel %vm266_vm11, %v2162_v17, 128 }
 0x199   :  { %v429_v13 = vshra.s32 %v2462_v52, 16 }
 0x19b   :  { %v2467_v44 = vcvt.s32.f32 %v429_v13  ;;  %v2482_v13 = vcvt.s32.f32 %v373_v12  ;;  %v302_v12 = vand.u32 65535, %v2326_v24  ;;  %v787_v24 = vsel %vm3129_vm13, 1, %v3147_v18 }
 0x19c   :  { %vm264_vm13 = vcmp.le.f32.partialorder %v2077_v63, %v2292_v2  ;;  %v713_v63 = vld [vmem:[#allocation3 + $0x28] sm:$0xff] }
 0x19d   :  { %v304_v35 = vcvt.s32.f32 %v302_v12  ;;  %v470_v12 = vand.u32 65535, %v2424_v47 }
 0x1ad   :  { %807 = vperm.xlu1 %1651, %v778_v15   ;;  %474 = vmin.xlane.f32.xlu0 %v2429_v11  ;;  %v345_v15 = vshra.s32 %v2447_v14, 16 }
 0x1af   :  { %v2457_v4 = vcvt.s32.f32 %v345_v15  ;;  %v786_v15 = vsel %vm655_vm7, 1, %v3147_v18 }
 0x1b5   :  { %390 = vmin.xlane.f32.xlu0 %v2444_v61 }
 0x1b7   :  { %v2488_v56 = vpop.permute.xlu0 %789 }
 0x1b8   :  { %3148 = vst [vmem:[#allocation36_spill] sm:$0xff] %v2488_v56  ;;  %v358_v56 = vand.u32 65535, %v2364_v62  ;;  %v2516_v62 = vsel %vm270_vm14, %v2162_v17, 128 }
 0x1b9   :  { %v484_v25 = vand.u32 65535, %v2516_v62 }
 0x1ba   :  { %v360_v49 = vcvt.s32.f32 %v358_v56 }
 0x1bc   :  { %v2618_v29 = vpop.xlane.xlu1 %292 }
 0x1bd   :  { %348 = vmin.xlane.f32.xlu0 %v2457_v4 }
 0x1be   :  { %320 = vmin.xlane.f32.xlu2 %v2459_v54 }
 0x1bf   :  { %v3174_v57 = vld [vmem:[#allocation36_spill] sm:$0xff] }
 0x1c5   :  { %432 = vmin.xlane.f32.xlu0 %v2467_v44 }
 0x1d6   :  { %831 = vperm.xlu2 %1654, %v786_v15   ;;  %v2498_v15 = vpop.permute.xlu2 %804 }
 0x1d7   :  { %376 = vmin.xlane.f32.xlu1 %v2482_v13  ;;  %3149 = vst [vmem:[#allocation37_spill] sm:$0xff] %v2498_v15 }
 0x1de   :  { %798 = vperm.xlu2 %1654, %v775_v3  }
 0x1df   :  { %334 = vmin.xlane.f32.xlu1 %v2495_v38 }
 0x1e2   :  { %v2501_v22 = vpop.xlane.xlu0 %306 }
 0x1e3   :  { %vm308_vm11 = vcmp.eq.f32.partialorder %v2373_v21, %v2501_v22  ;;  %v776_v21 = vsel %vm645_vm15, 1, %v3147_v18 }
 0x1e4   :  { %v2506_v60 = vsel %vm308_vm11, %v304_v35, inf  ;;  %v485_v35 = vshra.s32 %v2516_v62, 16  ;;  %vm271_vm11 = vcmp.le.f32.partialorder %v2081_v1, %v2300_v7 }
 0x1e7   :  { %v363_v34 = vpop.xlane.xlu2 %362 }
 0x1e8   :  { %vm364_vm4 = vcmp.eq.f32.partialorder %v2384_v45, %v363_v34  ;;  %v2523_v45 = vcvt.s32.f32 %v485_v35  ;;  %v386_v35 = vand.u32 65535, %v2436_v50 }
 0x1e9   :  { %v365_v3 = vsel %vm364_vm4, %v360_v49, inf }
 0x1ea   :  { %366 = vmin.xlane.f32.xlu0 %v365_v3 }
 0x1ef   :  { %v2535_v49 = vpop.permute.xlu2 %1133 }
 0x1f0   :  { %3151 = vst [vmem:[#allocation39_spill] sm:$0xff] %v2535_v49 }
 0x1f5   :  { %v2526_v56 = vpop.permute.xlu0 %1127 }
 0x1f6   :  { %3150 = vst [vmem:[#allocation38_spill] sm:$0xff] %v2526_v56 }
 0x1f7   :  { %v2552_v49 = vpop.permute.xlu2 %795 }
 0x1f8   :  { %834 = vperm.xlu1 %1651, %v787_v24   ;;  %v472_v24 = vcvt.s32.f32 %v470_v12 }
 0x200   :  { %801 = vperm.xlu1 %1651, %v776_v21   ;;  %v2540_v21 = vsel %vm271_vm11, %v2162_v17, 128 }
 0x201   :  { %v499_v1 = vshra.s32 %v2540_v21, 16 }
 0x203   :  { %v2550_v15 = vcvt.s32.f32 %v499_v1 }
 0x207   :  { %488 = vmin.xlane.f32.xlu2 %v2523_v45 }
 0x21f   :  { %813 = vperm.xlu2 %1654, %v780_v58   ;;  %v388_v58 = vcvt.s32.f32 %v386_v35 }
 0x220   :  { %v2537_v3 = vpop.xlane.xlu0 %474 }
 0x221   :  { %vm476_vm4 = vcmp.eq.f32.partialorder %v2429_v11, %v2537_v3  ;;  %v344_v11 = vand.u32 65535, %v2447_v14  ;;  %v428_v14 = vand.u32 65535, %v2462_v52 }
 0x222   :  { %v2544_v47 = vsel %vm476_vm4, %v472_v24, inf  ;;  %v316_v24 = vand.u32 65535, %v2451_v16 }
 0x223   :  { %v346_v50 = vcvt.s32.f32 %v344_v11  ;;  %v430_v16 = vcvt.s32.f32 %v428_v14  ;;  %v783_v14 = vsel %vm652_vm5, 1, %v3147_v18 }
 0x224   :  { %v318_v1 = vcvt.s32.f32 %v316_v24 }
 0x228   :  { %v2548_v56 = vpop.xlane.xlu0 %390 }
 0x229   :  { %vm392_vm14 = vcmp.eq.f32.partialorder %v2444_v61, %v2548_v56 }
 0x22a   :  { %502 = vmin.xlane.f32.xlu1 %v2550_v15  ;;  %v2557_v12 = vsel %vm392_vm14, %v388_v58, inf }
 0x230   :  { %v2561_v0 = vpop.xlane.xlu0 %348 }
 0x231   :  { %v2563_v7 = vpop.xlane.xlu2 %320  ;;  %vm350_vm11 = vcmp.eq.f32.partialorder %v2457_v4, %v2561_v0  ;;  %v2581_v4 = vsel %vm264_vm13, %v2162_v17, 128  ;;  %vm265_vm13 = vcmp.le.f32.partialorder %v2100_v6, %v2349_v55 }
 0x232   :  { %vm322_vm4 = vcmp.eq.f32.partialorder %v2459_v54, %v2563_v7  ;;  %v2569_v61 = vsel %vm350_vm11, %v346_v50, inf  ;;  %v781_v54 = vsel %vm650_vm12, 1, %v3147_v18  ;;  %v401_v52 = vshra.s32 %v2581_v4, 16 }
 0x233   :  { %v323_v35 = vsel %vm322_vm4, %v318_v1, inf  ;;  %vm267_vm11 = vcmp.le.f32.partialorder %v2113_v10, %v2395_v9  ;;  %vm294_vm4 = vcmp.eq.f32.partialorder %v2192_v28, %v2618_v29  ;;  %v327_v28 = vcvt.f32.s32 %v2563_v7 }
 0x234   :  { %324 = vmin.xlane.f32.xlu0 %v323_v35  ;;  %v2588_v24 = vcvt.s32.f32 %v401_v52  ;;  %v2606_v52 = vsel %vm265_vm13, %v2162_v17, 128 }
 0x238   :  { %v2572_v58 = vpop.xlane.xlu0 %432 }
 0x239   :  { %vm434_vm14 = vcmp.eq.f32.partialorder %v2467_v44, %v2572_v58  ;;  %v369_v44 = vcvt.f32.s32 %v363_v34 }
 0x23a   :  { %v2576_v11 = vsel %vm434_vm14, %v430_v16, inf }
 0x23b   :  { %v370_v1 = vshll.u32 %v369_v44, 16  ;;  %v415_v44 = vshra.s32 %v2606_v52, 16 }
 0x243   :  { %816 = vperm.xlu1 %1651, %v781_v54   ;;  %v1137_v54 = vadd.s32 72, %v1998_v26 }
 0x248   :  { %404 = vmin.xlane.f32.xlu2 %v2588_v24 }
 0x24b   :  { %1655 = vset.pattern.permute.xlu1 %v1137_v54  ;;  %v2629_v54 = vsel %vm267_vm11, %v2162_v17, 128 }
 0x24c   :  { %v442_v39 = vand.u32 65535, %v2629_v54 }
 0x25d   :  { %v367_v50 = vpop.xlane.xlu0 %366 }
 0x25e   :  { %v368_v35 = vcvt.f32.s32 %v367_v50  ;;  %v2609_v50 = vpop.permute.xlu2 %831 }
 0x25f   :  { %3152 = vst [vmem:[#allocation40_spill] sm:$0xff] %v2609_v50 }
 0x260   :  { %v2595_v16 = vadd.s32 %v370_v1, %v368_v35  ;;  %822 = vperm.xlu2 %1654, %v783_v14   ;;  %v2611_v1 = vcvt.s32.f32 %v415_v44 }
 0x262   :  { %v729_v34 = vsel %vm646_vm3, %v2595_v16, %v713_v63  ;;  %v486_v63 = vcvt.s32.f32 %v484_v25  ;;  %v1143_v25 = vadd.s32 80, %v1998_v26 }
 0x263   :  { %745 = vst.msk [vmem:[#allocation3 + $0x28] sm:$0xff] %vm72_vm0, %v729_v34  ;;  %v2626_v34 = vpop.permute.xlu1 %825 }
 0x264   :  { %3154 = vst [vmem:[#allocation42_spill] sm:$0xff] %v2626_v34 }
 0x266   :  { %v2614_v6 = vpop.permute.xlu2 %798 }
 0x267   :  { %3153 = vst [vmem:[#allocation41_spill] sm:$0xff] %v2614_v6 }
 0x268   :  { %1656 = vset.pattern.permute.xlu2 %v1143_v25 }
 0x26b   :  { %v2635_v44 = vpop.permute.xlu1 %792 }
 0x26c   :  { %3155 = vst [vmem:[#allocation43_spill] sm:$0xff] %v2635_v44 }
 0x26d   :  { %418 = vmin.xlane.f32.xlu1 %v2611_v1 }
 0x275   :  { %310 = vmin.xlane.f32.xlu1 %v2506_v60  ;;  %v443_v60 = vshra.s32 %v2629_v54, 16 }
 0x277   :  { %v2632_v62 = vcvt.s32.f32 %v443_v60  ;;  %v456_v60 = vand.u32 65535, %v2409_v53  ;;  %v1831_v53 = vmov 1.0  }
 0x279   :  { %v458_v34 = vcvt.s32.f32 %v456_v60 }
 0x27a   :  { %v2620_v35 = vpop.xlane.xlu2 %488 }
 0x27b   :  { %vm490_vm3 = vcmp.eq.f32.partialorder %v2523_v45, %v2620_v35  ;;  %v288_v45 = vand.u32 65535, %v2184_v23 }
 0x27c   :  { %v491_v14 = vsel %vm490_vm3, %v486_v63, inf }
 0x27d   :  { %492 = vmin.xlane.f32.xlu0 %v491_v14  ;;  %v290_v10 = vcvt.s32.f32 %v288_v45  ;;  %v2642_v14 = vpop.xlane.xlu1 %460  ;;  %v328_v45 = vshll.u32 %v327_v28, 16 }
 0x27e   :  { %vm462_vm14 = vcmp.eq.f32.partialorder %v2413_v27, %v2642_v14 }
 0x27f   :  { %v295_v63 = vsel %vm294_vm4, %v290_v10, inf  ;;  %v463_v23 = vsel %vm462_vm14, %v458_v34, inf  ;;  %v400_v34 = vand.u32 65535, %v2581_v4 }
 0x281   :  { %v402_v48 = vcvt.s32.f32 %v400_v34  ;;  %v941_v34 = vld [vmem:[#allocation3 + $0x28] sm:$0xff] }
 0x282   :  { %v2660_v7 = vpop.permute.xlu2 %813 }
 0x285   :  { %v2648_v25 = vpop.permute.xlu1 %807 }
 0x289   :  { %446 = vmin.xlane.f32.xlu2 %v2632_v62 }
 0x28d   :  { %v2651_v44 = vpop.xlane.xlu1 %376 }
 0x28e   :  { %1139 = vperm.xlu1 %1655, %v2009_v32   ;;  %vm378_vm3 = vcmp.eq.f32.partialorder %v2482_v13, %v2651_v44  ;;  %v383_v31 = vcvt.f32.s32 %v2651_v44 }
 0x291   :  { %296 = vmin.xlane.f32.xlu2 %v295_v63  ;;  %v710_v63 = vld [vmem:[#allocation3 + $0x10] sm:$0xff] }
 0x296   :  { %1657 = vset.pattern.permute.xlu1 %v3147_v18 }
 0x299   :  { %464 = vmin.xlane.f32.xlu2 %v463_v23 }
 0x2a7   :  { %v325_v6 = vpop.xlane.xlu0 %324 }
 0x2a8   :  { %v326_v10 = vcvt.f32.s32 %v325_v6  ;;  %v2662_v6 = vpop.xlane.xlu1 %334 }
 0x2a9   :  { %vm336_vm11 = vcmp.eq.f32.partialorder %v2495_v38, %v2662_v6  ;;  %v709_v38 = vld [vmem:[#allocation3 + $0x8] sm:$0xff] }
 0x2aa   :  { %v329_v50 = vadd.s32 %v328_v45, %v326_v10 }
 0x2ac   :  { %v726_v27 = vsel %vm643_vm8, %v329_v50, %v710_v63  ;;  %vm514_vm13 = vcmp.eq.s32.totalorder %v2162_v17, %v329_v50 }
 0x2ad   :  { %742 = vst.msk [vmem:[#allocation3 + $0x10] sm:$0xff] %vm72_vm0, %v726_v27  ;;  %1551 = vmatmul.msk.f32.vlgmr.msra.gmra.mxu1 %vm514_vm13, %v1831_v53  ;;  %vm3156_vm13 = vcmp.lt.f32.partialorder %v2206_v33, %v2196_v30  ;;  %v3159_v30 = vld [vmem:[#allocation35_spill] sm:$0xff]  ;;  %v3160_v33 = vld [vmem:[#allocation34_spill] sm:$0xff] }
 0x2b0   :  { %v2671_v60 = vpop.permute.xlu1 %834 }
 0x2b1   :  { %1145 = vperm.xlu2 %1656, %v2009_v32  }
 0x2b8   :  { %478 = vmin.xlane.f32.xlu1 %v2544_v47  ;;  %v2674_v23 = vpop.permute.xlu1 %801  ;;  %v372_v47 = vand.u32 65535, %v2473_v8  ;;  %v498_v8 = vand.u32 65535, %v2540_v21 }
 0x2b9   :  { %1658 = vset.pattern.permute.xlu2 %v3147_v18 }
 0x2ba   :  { %v500_v13 = vcvt.s32.f32 %v498_v8 }
 0x2bb   :  { %v2667_v43 = vpop.xlane.xlu2 %404 }
 0x2bc   :  { %vm406_vm8 = vcmp.eq.f32.partialorder %v2588_v24, %v2667_v43  ;;  %v374_v24 = vcvt.s32.f32 %v372_v47  ;;  %v1173_v47 = vadd.s32 120, %v1998_v26 }
 0x2bd   :  { %v407_v50 = vsel %vm406_vm8, %v402_v48, inf  ;;  %vm3158_vm8 = vcmp.lt.f32.partialorder %v2294_v5, %v3157_v20 }
 0x2be   :  { %408 = vmin.xlane.f32.xlu0 %v407_v50  ;;  %v379_v45 = vsel %vm378_vm3, %v374_v24, inf  ;;  %vm3161_vm3 = vcmp.lt.f32.partialorder %v3159_v30, %v3160_v33 }
 0x2bf   :  { %1663 = vset.pattern.permute.xlu0 %v1173_v47 }
 0x2c0   :  { %394 = vmin.xlane.f32.xlu1 %v2557_v12  ;;  %v2677_v4 = vpop.xlane.xlu1 %502  ;;  %v330_v12 = vand.u32 65535, %v2485_v36 }
 0x2c1   :  { %vm504_vm4 = vcmp.eq.f32.partialorder %v2550_v15, %v2677_v4 }
 0x2c2   :  { %v505_v50 = vsel %vm504_vm4, %v500_v13, inf  ;;  %vm919_vm4 = vcmask 261120  }
 0x2c8   :  { %352 = vmin.xlane.f32.xlu1 %v2569_v61  ;;  %v2683_v28 = vpop.permute.xlu1 %816  ;;  %v332_v61 = vcvt.s32.f32 %v330_v12 }
 0x2ca   :  { %v337_v63 = vsel %vm336_vm11, %v332_v61, inf  ;;  %v938_v61 = vld [vmem:[#allocation3 + $0x10] sm:$0xff]  ;;  %vm838_vm11 = vcmp.eq.s32.totalorder %v2552_v49, 1 }
 0x2d0   :  { %436 = vmin.xlane.f32.xlu1 %v2576_v11  ;;  %v313_v11 = vcvt.f32.s32 %v2501_v22  ;;  %v495_v22 = vcvt.f32.s32 %v2620_v35  ;;  %v2705_v35 = vpop.permute.xlu2 %822 }
 0x2d2   :  { %v314_v48 = vshll.u32 %v313_v11, 16 }
 0x2da   :  { %380 = vmin.xlane.f32.xlu2 %v379_v45  ;;  %v414_v45 = vand.u32 65535, %v2606_v52  ;;  %v722_v52 = vld [vmem:[#allocation3 + $0x70] sm:$0xff] }
 0x2dc   :  { %v416_v21 = vcvt.s32.f32 %v414_v45  ;;  %v467_v45 = vcvt.f32.s32 %v2642_v14  ;;  %v779_v14 = vsel %vm3158_vm8, 1, %v3147_v18 }
 0x2e0   :  { %v2688_v10 = vpop.xlane.xlu1 %418 }
 0x2e1   :  { %vm420_vm14 = vcmp.eq.f32.partialorder %v2611_v1, %v2688_v10 }
 0x2e2   :  { %338 = vmin.xlane.f32.xlu2 %v337_v63  ;;  %v496_v63 = vshll.u32 %v495_v22, 16  ;;  %v421_v11 = vsel %vm420_vm14, %v416_v21, inf  ;;  %v720_v21 = vld [vmem:[#allocation3 + $0x60] sm:$0xff] }
 0x2e8   :  { %v311_v27 = vpop.xlane.xlu1 %310 }
 0x2e9   :  { %v312_v36 = vcvt.f32.s32 %v311_v27  ;;  %968 = vperm.xlu1 %1657, %v941_v34   ;;  %v444_v27 = vcvt.s32.f32 %v442_v39 }
 0x2ea   :  { %506 = vmin.xlane.f32.xlu2 %v505_v50 }
 0x2eb   :  { %v315_v24 = vadd.s32 %v314_v48, %v312_v36  ;;  %v299_v36 = vcvt.f32.s32 %v2618_v29 }
 0x2ed   :  { %v725_v15 = vsel %vm642_vm6, %v315_v24, %v709_v38  ;;  %v300_v38 = vshll.u32 %v299_v36, 16  ;;  %v721_v36 = vld [vmem:[#allocation3 + $0x68] sm:$0xff] }
 0x2ee   :  { %741 = vst.msk [vmem:[#allocation3 + $0x8] sm:$0xff] %vm72_vm0, %v725_v15 }
 0x2f0   :  { %v493_v12 = vpop.xlane.xlu0 %492 }
 0x2f1   :  { %v494_v8 = vcvt.f32.s32 %v493_v12  ;;  %959 = vperm.xlu1 %1657, %v938_v61  }
 0x2f2   :  { %422 = vmin.xlane.f32.xlu2 %v421_v11 }
 0x2f3   :  { %v2703_v13 = vadd.s32 %v496_v63, %v494_v8  ;;  %v481_v63 = vcvt.f32.s32 %v2537_v3  ;;  %v397_v3 = vcvt.f32.s32 %v2548_v56 }
 0x2f5   :  { %v738_v37 = vsel %vm655_vm7, %v2703_v13, %v722_v52  ;;  %v937_v22 = vld [vmem:[#allocation3 + $0x8] sm:$0xff] }
 0x2f6   :  { %754 = vst.msk [vmem:[#allocation3 + $0x70] sm:$0xff] %vm72_vm0, %v738_v37  ;;  %v3162_v52 = vld [vmem:[#allocation27_spill] sm:$0xff]  ;;  %v3163_v37 = vld [vmem:[#allocation26_spill] sm:$0xff] }
 0x2f7   :  { %vm3164_vm14 = vcmp.lt.f32.partialorder %v3162_v52, %v3163_v37 }
 0x2f8   :  { %v785_v39 = vsel %vm3164_vm14, 1, %v3147_v18 }
 0x2fc   :  { %v2713_v1 = vpop.xlane.xlu2 %446 }
 0x2fd   :  { %v950_v34 = vld [vmem:[#allocation3 + $0x70] sm:$0xff]  ;;  %vm448_vm6 = vcmp.eq.f32.partialorder %v2632_v62, %v2713_v1  ;;  %v468_v62 = vshll.u32 %v467_v45, 16 }
 0x2fe   :  { %995 = vperm.xlu1 %1657, %v950_v34   ;;  %v449_v48 = vsel %vm448_vm6, %v444_v27, inf  ;;  %v482_v27 = vshll.u32 %v481_v63, 16  ;;  %vm3165_vm6 = vmmov %vm3164_vm14 }
 0x2ff   :  { %450 = vmin.xlane.f32.xlu0 %v449_v48 }
 0x300   :  { %v2740_v61 = vpop.permute.xlu1 %1139 }
 0x304   :  { %v297_v50 = vpop.xlane.xlu2 %296 }
 0x305   :  { %v298_v42 = vcvt.f32.s32 %v297_v50  ;;  %v411_v50 = vcvt.f32.s32 %v2667_v43 }
 0x307   :  { %v301_v47 = vadd.s32 %v300_v38, %v298_v42  ;;  %v412_v43 = vshll.u32 %v411_v50, 16 }
 0x309   :  { %v724_v54 = vsel %vm641_vm2, %v301_v47, %v708_v46  ;;  %vm512_vm7 = vcmp.eq.s32.totalorder %v2162_v17, %v301_v47  ;;  %vm513_vm2 = vcmp.eq.s32.totalorder %v2162_v17, %v315_v24  ;;  %v782_v24 = vsel %vm3161_vm3, 1, %v3147_v18  ;;  %v716_v47 = vld [vmem:[#allocation3 + $0x40] sm:$0xff] }
 0x30a   :  { %740 = vst.msk [vmem:[#allocation3] sm:$0xff] %vm72_vm0, %v724_v54  ;;  %1549 = vmatmul.msk.f32.vlgmr.msrb.gmra.mxu0 %vm512_vm7, %v1831_v53  ;;  %956 = vperm.xlu2 %1658, %v937_v22   ;;  %v398_v22 = vshll.u32 %v397_v3, 16 }
 0x30c   :  { %v465_v29 = vpop.xlane.xlu2 %464 }
 0x30d   :  { %v466_v15 = vcvt.f32.s32 %v465_v29 }
 0x30f   :  { %v2725_v12 = vadd.s32 %v468_v62, %v466_v15  ;;  %v715_v62 = vld [vmem:[#allocation3 + $0x38] sm:$0xff] }
 0x311   :  { %v736_v19 = vsel %vm3156_vm13, %v2725_v12, %v720_v21  ;;  %v936_v54 = vld [vmem:[#allocation3] sm:$0xff]  ;;  %vm3166_vm13 = vmmov %vm3158_vm8 }
 0x312   :  { %752 = vst.msk [vmem:[#allocation3 + $0x60] sm:$0xff] %vm72_vm0, %v736_v19  ;;  %1550 = vmatmul.msk.f32.gmra.mxu0 %vm513_vm2, %v1831_v53  ;;  %v355_v19 = vcvt.f32.s32 %v2561_v0  ;;  %vm526_vm2 = vcmp.eq.s32.totalorder %v2162_v17, %v2703_v13 }
 0x313   :  { %1175 = vperm.xlu0 %1663, %v2009_v32  }
 0x314   :  { %v356_v2 = vshll.u32 %v355_v19, 16 }
 0x31b   :  { %1664 = vset.pattern.permute.xlu0 %v3147_v18 }
 0x31c   :  { %810 = vperm.xlu0 %1664, %v779_v14  }
 0x324   :  { %819 = vperm.xlu0 %1664, %v782_v24  }
 0x32a   :  { %v583_v32 = vpop.f32.mrf.mxu1 }
 0x32b   :  { %v854_v8 = vsel %vm838_vm11, %v583_v32, 0.0  ;;  %v479_v11 = vpop.xlane.xlu1 %478  ;;  %v712_v32 = vld [vmem:[#allocation3 + $0x20] sm:$0xff] }
 0x32c   :  { %v905_v34 = vmul.f32 -0.5, %v854_v8  ;;  %v480_v48 = vcvt.f32.s32 %v479_v11  ;;  %828 = vperm.xlu0 %1664, %v785_v39   ;;  %v439_v11 = vcvt.f32.s32 %v2572_v58  ;;  %v2787_v39 = vpop.permute.xlu2 %1145 }
 0x32e   :  { %922 = vst.msk [vmem:[%s3104_s4 + $0x10] sm:$0xff] %vm919_vm4, %v905_v34  ;;  %v483_v49 = vadd.s32 %v482_v27, %v480_v48  ;;  %v440_v52 = vshll.u32 %v439_v11, 16  ;;  %v718_v27 = vld [vmem:[#allocation3 + $0x50] sm:$0xff]  ;;  %v1155_v11 = vadd.s32 96, %v1998_v26 }
 0x330   :  { %v737_v38 = vsel %vm3165_vm6, %v483_v49, %v721_v36  ;;  %vm525_vm7 = vcmp.eq.s32.totalorder %v2162_v17, %v483_v49  ;;  %v384_v36 = vshll.u32 %v383_v31, 16  ;;  %v714_v49 = vld [vmem:[#allocation3 + $0x30] sm:$0xff]  ;;  %v1063_v31 = vld [vmem:[#allocation2 + $0x8] sm:$0xff] }
 0x331   :  { %753 = vst.msk [vmem:[#allocation3 + $0x68] sm:$0xff] %vm72_vm0, %v737_v38  ;;  %1562 = vmatmul.msk.f32.vlgmr.msrb.gmra.mxu3 %vm525_vm7, %v1831_v53  ;;  %v409_v42 = vpop.xlane.xlu0 %408 }
 0x332   :  { %v410_v46 = vcvt.f32.s32 %v409_v42  ;;  %v341_v42 = vcvt.f32.s32 %v2662_v6 }
 0x333   :  { %v395_v45 = vpop.xlane.xlu1 %394 }
 0x334   :  { %v2764_v29 = vadd.s32 %v412_v43, %v410_v46  ;;  %v396_v56 = vcvt.f32.s32 %v395_v45  ;;  %953 = vperm.xlu0 %1664, %v936_v54   ;;  %v342_v45 = vshll.u32 %v341_v42, 16  ;;  %v711_v54 = vld [vmem:[#allocation3 + $0x18] sm:$0xff]  ;;  %v1670_v43 = vld [vmem:[#allocation5 + $0x8] sm:$0xff] }
 0x336   :  { %v732_v15 = vsel %vm649_vm10, %v2764_v29, %v716_v47  ;;  %v2770_v21 = vadd.s32 %v398_v22, %v396_v56  ;;  %vm3167_vm10 = vmmov %vm3161_vm3  ;;  %v1149_v47 = vadd.s32 88, %v1998_v26  ;;  %v509_v56 = vcvt.f32.s32 %v2677_v4 }
 0x337   :  { %748 = vst.msk [vmem:[#allocation3 + $0x40] sm:$0xff] %vm72_vm0, %v732_v15  ;;  %v425_v4 = vcvt.f32.s32 %v2688_v10  ;;  %v717_v10 = vld [vmem:[#allocation3 + $0x48] sm:$0xff]  ;;  %vm517_vm3 = vcmp.eq.s32.totalorder %v2162_v17, %v2595_v16  ;;  %vm520_vm14 = vcmp.eq.s32.totalorder %v2162_v17, %v2764_v29 }
 0x338   :  { %v731_v14 = vsel %vm3166_vm13, %v2770_v21, %v715_v62  ;;  %v949_v24 = vld [vmem:[#allocation3 + $0x68] sm:$0xff]  ;;  %v510_v19 = vshll.u32 %v509_v56, 16 }
 0x339   :  { %747 = vst.msk [vmem:[#allocation3 + $0x38] sm:$0xff] %vm72_vm0, %v731_v14  ;;  %992 = vperm.xlu2 %1658, %v949_v24   ;;  %1563 = vmatmul.msk.f32.gmra.mxu3 %vm526_vm2, %v1831_v53  ;;  %v723_v24 = vld [vmem:[#allocation3 + $0x78] sm:$0xff]  ;;  %v3176_v29 = vld [vmem:[#allocation43_spill] sm:$0xff] }
 0x33a   :  { %vm837_vm7 = vcmp.eq.s32.totalorder %v3176_v29, 1 }
 0x33b   :  { %v353_v59 = vpop.xlane.xlu1 %352 }
 0x33c   :  { %v354_v63 = vcvt.f32.s32 %v353_v59 }
 0x33e   :  { %v357_v8 = vadd.s32 %v356_v2, %v354_v63  ;;  %v944_v0 = vld [vmem:[#allocation3 + $0x40] sm:$0xff]  ;;  %v3171_v63 = vld [vmem:[#allocation32_spill] sm:$0xff] }
 0x33f   :  { %977 = vperm.xlu1 %1657, %v944_v0   ;;  %v2810_v2 = vld [vmem:[#allocation8] ss:$0 sm:$0xff] }
 0x340   :  { %v728_v5 = vsel %vm645_vm15, %v357_v8, %v712_v32  ;;  %v943_v20 = vld [vmem:[#allocation3 + $0x38] sm:$0xff] }
 0x341   :  { %744 = vst.msk [vmem:[#allocation3 + $0x20] sm:$0xff] %vm72_vm0, %v728_v5  ;;  %974 = vperm.xlu2 %1658, %v943_v20   ;;  %v426_v5 = vshll.u32 %v425_v4, 16 }
 0x343   :  { %v437_v13 = vpop.xlane.xlu1 %436 }
 0x344   :  { %v438_v37 = vcvt.f32.s32 %v437_v13 }
 0x346   :  { %v2789_v34 = vadd.s32 %v440_v52, %v438_v37  ;;  %v453_v52 = vcvt.f32.s32 %v2713_v1 }
 0x348   :  { %v734_v58 = vsel %vm3167_vm10, %v2789_v34, %v718_v27  ;;  %v940_v48 = vld [vmem:[#allocation3 + $0x20] sm:$0xff]  ;;  %v454_v27 = vshll.u32 %v453_v52, 16  ;;  %vm522_vm13 = vcmp.eq.s32.totalorder %v2162_v17, %v2789_v34  ;;  %vm524_vm10 = vcmp.eq.s32.totalorder %v2162_v17, %v2725_v12  ;;  %v3179_v52 = vld [vmem:[#allocation23_spill] sm:$0xff] }
 0x349   :  { %750 = vst.msk [vmem:[#allocation3 + $0x50] sm:$0xff] %vm72_vm0, %v734_v58  ;;  %965 = vperm.xlu2 %1658, %v940_v48   ;;  %v1161_v48 = vadd.s32 104, %v1998_v26 }
 0x34d   :  { %v381_v41 = vpop.xlane.xlu2 %380 }
 0x34e   :  { %v382_v50 = vcvt.f32.s32 %v381_v41 }
 0x350   :  { %v385_v3 = vadd.s32 %v384_v36, %v382_v50  ;;  %v946_v38 = vld [vmem:[#allocation3 + $0x50] sm:$0xff] }
 0x351   :  { %983 = vperm.xlu2 %1658, %v946_v38   ;;  %v3175_v36 = vld [vmem:[#allocation20_spill] sm:$0xff] }
 0x352   :  { %v730_v30 = vsel %vm647_vm9, %v385_v3, %v714_v49  ;;  %vm3173_vm9 = vcmp.lt.f32.partialorder %v3171_v63, %v3172_v51  ;;  %vm518_vm11 = vcmp.eq.s32.totalorder %v2162_v17, %v385_v3  ;;  %v1194_v50 = vadd.f32 %v3175_v36, %v1063_v31  ;;  %v948_v51 = vld [vmem:[#allocation3 + $0x60] sm:$0xff]  ;;  %v1067_v36 = vld [vmem:[#allocation2 + $0x28] sm:$0xff] }
 0x353   :  { %746 = vst.msk [vmem:[#allocation3 + $0x30] sm:$0xff] %vm72_vm0, %v730_v30 }
 0x355   :  { %v339_v33 = vpop.xlane.xlu2 %338 }
 0x356   :  { %v340_v44 = vcvt.f32.s32 %v339_v33  ;;  %v1167_v33 = vadd.s32 112, %v1998_v26 }
 0x358   :  { %v343_v22 = vadd.s32 %v342_v45, %v340_v44 }
 0x359   :  { %1659 = vset.pattern.permute.xlu2 %v1149_v47  ;;  %v1671_v47 = vld [vmem:[#allocation5] sm:$0xff] }
 0x35a   :  { %v727_v6 = vsel %vm644_vm1, %v343_v22, %v711_v54  ;;  %vm515_vm15 = vcmp.eq.s32.totalorder %v2162_v17, %v343_v22  ;;  %vm516_vm1 = vcmp.eq.s32.totalorder %v2162_v17, %v357_v8 }
 0x35b   :  { %743 = vst.msk [vmem:[#allocation3 + $0x18] sm:$0xff] %vm72_vm0, %v727_v6  ;;  %1552 = vmatmul.msk.f32.gmra.mxu1 %vm515_vm15, %v1831_v53  ;;  %v942_v6 = vld [vmem:[#allocation3 + $0x30] sm:$0xff] }
 0x35d   :  { %v507_v15 = vpop.xlane.xlu2 %506 }
 0x35e   :  { %v508_v14 = vcvt.f32.s32 %v507_v15 }
 0x360   :  { %v511_v59 = vadd.s32 %v510_v19, %v508_v14 }
 0x361   :  { %1151 = vperm.xlu2 %1659, %v2810_v2  }
 0x362   :  { %v739_v32 = vsel %vm3173_vm9, %v511_v59, %v723_v24  ;;  %vm527_vm8 = vcmp.eq.s32.totalorder %v2162_v17, %v511_v59  ;;  %v939_v56 = vld [vmem:[#allocation3 + $0x18] sm:$0xff]  ;;  %v3177_v24 = vld [vmem:[#allocation40_spill] sm:$0xff] }
 0x363   :  { %755 = vst.msk [vmem:[#allocation3 + $0x78] sm:$0xff] %vm72_vm0, %v739_v32  ;;  %1553 = vmatmul.msk.f32.gmra.mxu1 %vm516_vm1, %v1831_v53  ;;  %1564 = vmatmul.msk.f32.gmra.mxu3 %vm527_vm8, %v1831_v53  ;;  %vm850_vm9 = vcmp.eq.s32.totalorder %v3177_v24, 1  ;;  %vm840_vm8 = vcmp.eq.s32.totalorder %v2674_v23, 1  ;;  %v1077_v23 = vld [vmem:[#allocation2 + $0x78] sm:$0xff]  ;;  %v2928_v24 = vpop.permute.xlu1 %968 }
 0x365   :  { %v423_v0 = vpop.xlane.xlu2 %422 }
 0x366   :  { %v424_v20 = vcvt.f32.s32 %v423_v0  ;;  %v1062_v0 = vld [vmem:[#allocation2] sm:$0xff] }
 0x368   :  { %v427_v13 = vadd.s32 %v426_v5, %v424_v20  ;;  %v3178_v5 = vld [vmem:[#allocation19_spill] sm:$0xff] }
 0x369   :  { %1660 = vset.pattern.permute.xlu2 %v1155_v11  ;;  %v1193_v20 = vadd.f32 %v3178_v5, %v1062_v0 }
 0x36a   :  { %v733_v8 = vsel %vm650_vm12, %v427_v13, %v717_v10  ;;  %vm519_vm12 = vcmp.eq.s32.totalorder %v2162_v17, %v2770_v21  ;;  %vm521_vm6 = vcmp.eq.s32.totalorder %v2162_v17, %v427_v13  ;;  %v951_v11 = vld [vmem:[#allocation3 + $0x78] sm:$0xff]  ;;  %v1066_v13 = vld [vmem:[#allocation2 + $0x20] sm:$0xff] }
 0x36b   :  { %749 = vst.msk [vmem:[#allocation3 + $0x48] sm:$0xff] %vm72_vm0, %v733_v8  ;;  %1554 = vmatmul.msk.f32.gmra.mxu1 %vm517_vm3, %v1831_v53  ;;  %v1064_v8 = vld [vmem:[#allocation2 + $0x10] sm:$0xff]  ;;  %vm851_vm3 = vcmp.eq.s32.totalorder %v2671_v60, 1 }
 0x36d   :  { %v2875_v54 = vpop.permute.xlu2 %956 }
 0x371   :  { %1157 = vperm.xlu2 %1660, %v2810_v2  }
 0x372   :  { %v451_v37 = vpop.xlane.xlu0 %450  ;;  %v945_v14 = vld [vmem:[#allocation3 + $0x48] sm:$0xff] }
 0x373   :  { %v452_v58 = vcvt.f32.s32 %v451_v37  ;;  %1555 = vmatmul.msk.f32.gmra.mxu1 %vm518_vm11, %v1831_v53  ;;  %v1197_v37 = vadd.f32 %v3179_v52, %v1066_v13 }
 0x375   :  { %v455_v55 = vadd.s32 %v454_v27, %v452_v58  ;;  %v3180_v27 = vld [vmem:[#allocation22_spill] sm:$0xff] }
 0x376   :  { %v1195_v58 = vadd.f32 %v3180_v27, %v1064_v8 }
 0x377   :  { %v735_v16 = vsel %vm652_vm5, %v455_v55, %v719_v40  ;;  %vm836_vm5 = vcmp.eq.s32.totalorder %v3174_v57, 1  ;;  %vm523_vm2 = vcmp.eq.s32.totalorder %v2162_v17, %v455_v55  ;;  %v1065_v40 = vld [vmem:[#allocation2 + $0x18] sm:$0xff] }
 0x378   :  { %751 = vst.msk [vmem:[#allocation3 + $0x58] sm:$0xff] %vm72_vm0, %v735_v16  ;;  %v3181_v55 = vld [vmem:[#allocation41_spill] sm:$0xff] }
 0x379   :  { %1661 = vset.pattern.permute.xlu2 %v1161_v48  ;;  %vm839_vm1 = vcmp.eq.s32.totalorder %v3181_v55, 1  ;;  %v1071_v48 = vld [vmem:[#allocation2 + $0x48] sm:$0xff]  ;;  %v3182_v57 = vld [vmem:[#allocation21_spill] sm:$0xff] }
 0x37b   :  { %1556 = vmatmul.msk.f32.gmra.mxu1 %vm519_vm12, %v1831_v53  ;;  %vm842_vm12 = vcmp.eq.s32.totalorder %v2648_v25, 1 }
 0x37f   :  { %v947_v1 = vld [vmem:[#allocation3 + $0x58] sm:$0xff] }
 0x380   :  { %986 = vperm.xlu1 %1657, %v947_v1  }
 0x381   :  { %1163 = vperm.xlu2 %1661, %v2810_v2  }
 0x383   :  { %1557 = vmatmul.msk.f32.gmra.mxu1 %vm520_vm14, %v1831_v53 }
 0x385   :  { %v2858_v42 = vpop.permute.xlu0 %1175 }
 0x387   :  { %v577_v9 = vpop.f32.mrf.mxu0 }
 0x388   :  { %v852_v41 = vsel %vm836_vm5, %v577_v9, 0.0  ;;  %1662 = vset.pattern.permute.xlu1 %v1167_v33  ;;  %v1196_v9 = vadd.f32 %v3182_v57, %v1065_v40  ;;  %vm844_vm5 = vcmp.eq.s32.totalorder %v2660_v7, 1 }
 0x389   :  { %v903_v49 = vmul.f32 -0.5, %v852_v41  ;;  %1666 = vset.pattern.permute.xlu2 %v3147_v18 }
 0x38a   :  { %1229 = vperm.xlu2 %1666, %v1194_v50   ;;  %v1074_v50 = vld [vmem:[#allocation2 + $0x60] sm:$0xff] }
 0x38b   :  { %920 = vst.msk [vmem:[%s3104_s4] sm:$0xff] %vm919_vm4, %v903_v49  ;;  %1558 = vmatmul.msk.f32.gmra.mxu1 %vm521_vm6, %v1831_v53  ;;  %v1306_v45 = vsub.f32 %v903_v49, %v1671_v47  ;;  %vm845_vm6 = vcmp.eq.s32.totalorder %v2683_v28, 1 }
 0x38d   :  { %v1322_v22 = vmul.f32 %v1306_v45, %v1306_v45  ;;  %v1069_v45 = vld [vmem:[#allocation2 + $0x38] sm:$0xff] }
 0x38e   :  { %v2868_v34 = vpop.permute.xlu0 %810 }
 0x38f   :  { %v580_v21 = vpop.f32.mrf.mxu0  ;;  %vm843_vm14 = vcmp.eq.s32.totalorder %v2868_v34, 1 }
 0x390   :  { %v853_v3 = vsel %vm837_vm7, %v580_v21, 0.0 }
 0x391   :  { %v904_v38 = vmul.f32 -0.5, %v853_v3  ;;  %v3183_v3 = vld [vmem:[#allocation24_spill] sm:$0xff] }
 0x393   :  { %921 = vst.msk [vmem:[%s3104_s4 + $0x8] sm:$0xff] %vm919_vm4, %v904_v38  ;;  %1559 = vmatmul.msk.f32.gmra.mxu1 %vm522_vm13, %v1831_v53  ;;  %v1307_v46 = vsub.f32 %v904_v38, %v1670_v43  ;;  %v2877_v62 = vpop.permute.xlu2 %992  ;;  %v1198_v38 = vadd.f32 %v3183_v3, %v1067_v36  ;;  %vm847_vm13 = vcmp.eq.s32.totalorder %v2705_v35, 1 }
 0x395   :  { %v1323_v30 = vmul.f32 %v1307_v46, %v1307_v46 }
 0x396   :  { %v2873_v44 = vpop.permute.xlu0 %819 }
 0x397   :  { %1340 = vadd.xlane.f32.xlu0 %v1323_v30  ;;  %v3184_v30 = vld [vmem:[#allocation37_spill] sm:$0xff]  ;;  %vm846_vm7 = vcmp.eq.s32.totalorder %v2873_v44, 1  ;;  %v2966_v44 = vadd.s32 4294967280, %v2162_v17 }
 0x398   :  { %vm841_vm11 = vcmp.eq.s32.totalorder %v3184_v30, 1 }
 0x39b   :  { %1560 = vmatmul.msk.f32.gmra.mxu1 %vm523_vm2, %v1831_v53  ;;  %vm1003_vm2 = vcmask 130112  }
 0x39e   :  { %v829_v26 = vpop.permute.xlu0 %828 }
 0x39f   :  { %vm849_vm15 = vcmp.eq.s32.totalorder %v829_v26, 1  ;;  %v3185_v26 = vld [vmem:[#allocation38_spill] sm:$0xff] }
 0x3a3   :  { %1561 = vmatmul.msk.f32.gmra.mxu1 %vm524_vm10, %v1831_v53  ;;  %v2883_v53 = vpop.permute.xlu2 %974  ;;  %vm1007_vm10 = vcmask 195712  }
 0x3a6   :  { %v954_v7 = vpop.permute.xlu0 %953 }
 0x3aa   :  { %1338 = vadd.xlane.f32.xlu1 %v1322_v22  ;;  %v1208_v22 = vadd.f32 %v2858_v42, %v1077_v23  ;;  %v1072_v42 = vld [vmem:[#allocation2 + $0x50] sm:$0xff]  ;;  %v2991_v23 = vadd.s32 4294967256, %v2162_v17 }
 0x3ab   :  { %962 = vperm.xlu0 %1664, %v939_v56   ;;  %v2891_v32 = vpop.permute.xlu2 %965 }
 0x3b3   :  { %971 = vperm.xlu0 %1664, %v942_v6   ;;  %v2895_v10 = vpop.permute.xlu2 %983  ;;  %v1200_v6 = vadd.f32 %v3185_v26, %v1069_v45 }
 0x3b4   :  { %v616_v15 = vpop.f32.mrf.mxu3 }
 0x3b5   :  { %v865_v12 = vsel %vm849_vm15, %v616_v15, 0.0  ;;  %vm1011_vm15 = vcmask 261312  }
 0x3b6   :  { %v916_v19 = vmul.f32 -0.5, %v865_v12 }
 0x3b8   :  { %933 = vst.msk [vmem:[%s3104_s4 + $0x68] sm:$0xff] %vm919_vm4, %v916_v19  ;;  %v1203_v19 = vadd.f32 %v2787_v39, %v1072_v42  ;;  %v960_v39 = vpop.permute.xlu1 %959 }
 0x3b9   :  { %v1006_v36 = vperm.slane %v960_v39, %v2966_v44 }
 0x3bb   :  { %980 = vperm.xlu0 %1664, %v945_v14  }
 0x3bc   :  { %v619_v59 = vpop.f32.mrf.mxu3 }
 0x3bd   :  { %v866_v4 = vsel %vm850_vm9, %v619_v59, 0.0  ;;  %vm1015_vm9 = vcmask 326912  }
 0x3be   :  { %v917_v63 = vmul.f32 -0.5, %v866_v4 }
 0x3c0   :  { %934 = vst.msk [vmem:[%s3104_s4 + $0x70] sm:$0xff] %vm919_vm4, %v917_v63  ;;  %v1075_v63 = vld [vmem:[#allocation2 + $0x68] sm:$0xff]  ;;  %v2944_v34 = vpop.permute.xlu1 %995 }
 0x3c3   :  { %1169 = vperm.xlu1 %1662, %v2810_v2   ;;  %989 = vperm.xlu0 %1664, %v948_v51   ;;  %v2899_v2 = vpop.permute.xlu2 %1151 }
 0x3cb   :  { %1665 = vset.pattern.permute.xlu1 %v3147_v18  ;;  %998 = vperm.xlu0 %1664, %v951_v11   ;;  %v1202_v18 = vadd.f32 %v2740_v61, %v1071_v48  ;;  %v1158_v41 = vpop.permute.xlu2 %1157  ;;  %v2961_v48 = vadd.s32 4294967288, %v2162_v17 }
 0x3cc   :  { %1226 = vperm.xlu1 %1665, %v1193_v20   ;;  %v1205_v29 = vadd.f32 %v1158_v41, %v1074_v50  ;;  %v2974_v41 = vadd.s32 4294967264, %v2162_v17 }
 0x3d3   :  { %1238 = vperm.xlu0 %1664, %v1197_v37   ;;  %v2951_v37 = vpop.permute.xlu1 %977 }
 0x3d4   :  { %1232 = vperm.xlu1 %1665, %v1195_v58  }
 0x3d8   :  { %v586_v16 = vpop.f32.mrf.mxu1 }
 0x3d9   :  { %v855_v1 = vsel %vm839_vm1, %v586_v16, 0.0  ;;  %v1000_v16 = vperm.slane %v954_v7, %v2162_v17 }
 0x3da   :  { %v906_v31 = vmul.f32 -0.5, %v855_v1 }
 0x3db   :  { %1253 = vperm.xlu0 %1664, %v1202_v18   ;;  %v1164_v59 = vpop.permute.xlu2 %1163 }
 0x3dc   :  { %923 = vst.msk [vmem:[%s3104_s4 + $0x18] sm:$0xff] %vm919_vm4, %v906_v31  ;;  %1235 = vperm.xlu1 %1665, %v1196_v9   ;;  %v1206_v51 = vadd.f32 %v1164_v59, %v1075_v63  ;;  %v1002_v31 = vperm.slane %v2875_v54, %v2961_v48  ;;  %v2971_v9 = vadd.s32 4294967272, %v2162_v17 }
 0x3de   :  { %v1004_v35 = vsel %vm1003_vm2, %v1002_v31, %v1000_v16  ;;  %v3051_v16 = vadd.s32 4294967176, %v2162_v17 }
 0x3df   :  { %v1008_v3 = vsel %vm1007_vm10, %v1006_v36, %v1004_v35  ;;  %v3188_v35 = vld [vmem:[#allocation39_spill] sm:$0xff] }
 0x3e0   :  { %v589_v49 = vpop.f32.mrf.mxu1 }
 0x3e1   :  { %v856_v21 = vsel %vm840_vm8, %v589_v49, 0.0  ;;  %vm1023_vm8 = vcmask 458112  }
 0x3e2   :  { %v907_v61 = vmul.f32 -0.5, %v856_v21 }
 0x3e3   :  { %1262 = vperm.xlu0 %1664, %v1205_v29  }
 0x3e4   :  { %924 = vst.msk [vmem:[%s3104_s4 + $0x20] sm:$0xff] %vm919_vm4, %v907_v61  ;;  %1241 = vperm.xlu1 %1665, %v1198_v38   ;;  %v1014_v61 = vperm.slane %v2891_v32, %v2974_v41  ;;  %v2998_v32 = vadd.s32 4294967240, %v2162_v17 }
 0x3e6   :  { %v622_v43 = vpop.f32.mrf.mxu3 }
 0x3e7   :  { %v867_v46 = vsel %vm851_vm3, %v622_v43, 0.0  ;;  %v3186_v43 = vld [vmem:[#allocation42_spill] sm:$0xff]  ;;  %vm1027_vm3 = vcmask 523712  }
 0x3e8   :  { %v918_v33 = vmul.f32 -0.5, %v867_v46  ;;  %v592_v47 = vpop.f32.mrf.mxu1  ;;  %vm848_vm1 = vcmp.eq.s32.totalorder %v3186_v43, 1 }
 0x3e9   :  { %v857_v56 = vsel %vm841_vm11, %v592_v47, 0.0  ;;  %vm1035_vm11 = vcmask 654912  }
 0x3ea   :  { %935 = vst.msk [vmem:[%s3104_s4 + $0x78] sm:$0xff] %vm919_vm4, %v918_v33  ;;  %v908_v15 = vmul.f32 -0.5, %v857_v56  ;;  %v1018_v56 = vperm.slane %v2928_v24, %v2991_v23  ;;  %v3019_v24 = vadd.s32 4294967216, %v2162_v17 }
 0x3eb   :  { %1271 = vperm.xlu0 %1664, %v1208_v22   ;;  %v2995_v22 = vadd.s32 4294967248, %v2162_v17 }
 0x3ec   :  { %925 = vst.msk [vmem:[%s3104_s4 + $0x28] sm:$0xff] %vm919_vm4, %v908_v15  ;;  %1247 = vperm.xlu1 %1665, %v1200_v6   ;;  %v1026_v15 = vperm.slane %v2883_v53, %v2998_v32  ;;  %v1038_v63 = vperm.slane %v2895_v10, %v3019_v24 }
 0x3f0   :  { %v595_v60 = vpop.f32.mrf.mxu1 }
 0x3f1   :  { %v858_v12 = vsel %vm842_vm12, %v595_v60, 0.0  ;;  %vm1039_vm12 = vcmask 720512  }
 0x3f2   :  { %v909_v14 = vmul.f32 -0.5, %v858_v12  ;;  %v2958_v28 = vpop.permute.xlu1 %986  ;;  %v3012_v12 = vadd.s32 4294967232, %v2162_v17 }
 0x3f4   :  { %926 = vst.msk [vmem:[%s3104_s4 + $0x30] sm:$0xff] %vm919_vm4, %v909_v14  ;;  %1256 = vperm.xlu1 %1665, %v1203_v19   ;;  %v3016_v14 = vadd.s32 4294967224, %v2162_v17  ;;  %v1030_v59 = vperm.slane %v2951_v37, %v3012_v12 }
 0x3f8   :  { %v598_v4 = vpop.f32.mrf.mxu1 }
 0x3f9   :  { %v859_v25 = vsel %vm843_vm14, %v598_v4, 0.0  ;;  %vm1043_vm14 = vcmask 786112  }
 0x3fa   :  { %v910_v0 = vmul.f32 -0.5, %v859_v25 }
 0x3fc   :  { %927 = vst.msk [vmem:[%s3104_s4 + $0x38] sm:$0xff] %vm919_vm4, %v910_v0  ;;  %1265 = vperm.xlu1 %1665, %v1206_v51   ;;  %v3029_v0 = vadd.s32 4294967208, %v2162_v17 }
 0x3fe   :  { %v1042_v10 = vperm.slane %v2958_v28, %v3029_v0 }
 0x400   :  { %v601_v11 = vpop.f32.mrf.mxu1 }
 0x401   :  { %v860_v5 = vsel %vm844_vm5, %v601_v11, 0.0  ;;  %v3033_v11 = vadd.s32 4294967200, %v2162_v17  ;;  %vm1047_vm5 = vcmask 851712  }
 0x402   :  { %v911_v20 = vmul.f32 -0.5, %v860_v5  ;;  %v3036_v5 = vadd.s32 4294967192, %v2162_v17 }
 0x404   :  { %928 = vst.msk [vmem:[%s3104_s4 + $0x40] sm:$0xff] %vm919_vm4, %v911_v20  ;;  %v1068_v20 = vld [vmem:[#allocation2 + $0x30] sm:$0xff]  ;;  %v1050_v7 = vperm.slane %v2877_v62, %v3036_v5 }
 0x408   :  { %v604_v13 = vpop.f32.mrf.mxu1 }
 0x409   :  { %v861_v8 = vsel %vm845_vm6, %v604_v13, 0.0  ;;  %vm1051_vm6 = vcmask 917312  }
 0x40a   :  { %v912_v52 = vmul.f32 -0.5, %v861_v8  ;;  %v1341_v55 = vpop.xlane.xlu0 %1340 }
 0x40b   :  { %v1438_v49 = vsel %vm72_vm0, %v1341_v55, 0.0  ;;  %v3047_v55 = vadd.s32 4294967184, %v2162_v17 }
 0x40c   :  { %929 = vst.msk [vmem:[%s3104_s4 + $0x48] sm:$0xff] %vm919_vm4, %v912_v52 }
 0x410   :  { %v607_v27 = vpop.f32.mrf.mxu1 }
 0x411   :  { %v862_v58 = vsel %vm846_vm7, %v607_v27, 0.0  ;;  %v3187_v27 = vld [vmem:[#allocation25_spill] sm:$0xff]  ;;  %vm1055_vm7 = vcmask 982912  }
 0x412   :  { %v913_v40 = vmul.f32 -0.5, %v862_v58  ;;  %v1199_v58 = vadd.f32 %v3187_v27, %v1068_v20 }
 0x414   :  { %930 = vst.msk [vmem:[%s3104_s4 + $0x50] sm:$0xff] %vm919_vm4, %v913_v40 }
 0x418   :  { %v610_v18 = vpop.f32.mrf.mxu1 }
 0x419   :  { %v863_v1 = vsel %vm847_vm13, %v610_v18, 0.0  ;;  %v1054_v18 = vperm.slane %v2944_v34, %v3047_v55  ;;  %vm1059_vm13 = vcmask 1048512   ;;  %v1230_v34 = vpop.permute.xlu2 %1229 }
 0x41a   :  { %v914_v57 = vmul.f32 -0.5, %v863_v1  ;;  %v1070_v1 = vld [vmem:[#allocation2 + $0x40] sm:$0xff] }
 0x41b   :  { %v1201_v36 = vadd.f32 %v3188_v35, %v1070_v1 }
 0x41c   :  { %931 = vst.msk [vmem:[%s3104_s4 + $0x58] sm:$0xff] %vm919_vm4, %v914_v57 }
 0x41d   :  { %v1339_v50 = vpop.xlane.xlu1 %1338  ;;  %v963_v54 = vpop.permute.xlu0 %962 }
 0x41e   :  { %v1437_v29 = vsel %vm72_vm0, %v1339_v50, 0.0  ;;  %v1010_v21 = vperm.slane %v963_v54, %v2971_v9  ;;  %vm1019_vm0 = vcmask 392512  }
 0x41f   :  { %v1439_v38 = vadd.f32 %v1438_v49, %v1437_v29  ;;  %v1073_v49 = vld [vmem:[#allocation2 + $0x58] sm:$0xff] }
 0x420   :  { %v1012_v46 = vsel %vm1011_vm15, %v1010_v21, %v1008_v3  ;;  %v613_v30 = vpop.f32.mrf.mxu1  ;;  %v1204_v21 = vadd.f32 %v2899_v2, %v1073_v49 }
 0x421   :  { %v1016_v33 = vsel %vm1015_vm9, %v1014_v61, %v1012_v46  ;;  %v864_v47 = vsel %vm848_vm1, %v613_v30, 0.0  ;;  %1468 = vadd.xlane.f32.xlu2 %v1439_v38  ;;  %v1274_v38 = vperm.slane %v1230_v34, %v2961_v48  ;;  %v1076_v46 = vld [vmem:[#allocation2 + $0x70] sm:$0xff] }
 0x422   :  { %v915_v45 = vmul.f32 -0.5, %v864_v47  ;;  %v1020_v60 = vsel %vm1019_vm0, %v1018_v56, %v1016_v33 }
 0x424   :  { %932 = vst.msk [vmem:[%s3104_s4 + $0x60] sm:$0xff] %vm919_vm4, %v915_v45  ;;  %vm1031_vm4 = vcmask 589312   ;;  %s1832_s4 = smov [#allocation11]  }
 0x425   :  { %v972_v26 = vpop.permute.xlu0 %971  ;;  %s1487_s21 = sshll.u32 %s1832_s4, 4  ;;  %s1488_s21 = int_to_ptr.vmem [resolvable:$true] %s1487_s21 }
 0x426   :  { %v1022_v6 = vperm.slane %v972_v26, %v2995_v22 }
 0x428   :  { %v1024_v42 = vsel %vm1023_vm8, %v1022_v6, %v1020_v60 }
 0x429   :  { %v1028_v19 = vsel %vm1027_vm3, %v1026_v15, %v1024_v42 }
 0x42a   :  { %v1032_v25 = vsel %vm1031_vm4, %v1030_v59, %v1028_v19 }
 0x42d   :  { %v981_v53 = vpop.permute.xlu0 %980 }
 0x42e   :  { %v1034_v4 = vperm.slane %v981_v53, %v3016_v14 }
 0x430   :  { %v1036_v51 = vsel %vm1035_vm11, %v1034_v4, %v1032_v25 }
 0x431   :  { %v1040_v39 = vsel %vm1039_vm12, %v1038_v63, %v1036_v51 }
 0x432   :  { %v1044_v37 = vsel %vm1043_vm14, %v1042_v10, %v1040_v39 }
 0x435   :  { %v1170_v13 = vpop.permute.xlu1 %1169  ;;  %v990_v8 = vpop.permute.xlu0 %989 }
 0x436   :  { %v1046_v52 = vperm.slane %v990_v8, %v3033_v11  ;;  %v1207_v33 = vadd.f32 %v1170_v13, %v1076_v46 }
 0x438   :  { %v1048_v40 = vsel %vm1047_vm5, %v1046_v52, %v1044_v37 }
 0x439   :  { %v1052_v28 = vsel %vm1051_vm6, %v1050_v7, %v1048_v40  ;;  %1244 = vperm.xlu2 %1666, %v1199_v58  }
 0x43a   :  { %v1056_v50 = vsel %vm1055_vm7, %v1054_v18, %v1052_v28 }
 0x43d   :  { %v999_v62 = vpop.permute.xlu0 %998 }
 0x43e   :  { %v1058_v31 = vperm.slane %v999_v62, %v3051_v16  ;;  %v1227_v57 = vpop.permute.xlu1 %1226 }
 0x43f   :  { %v1273_v61 = vperm.slane %v1227_v57, %v2162_v17 }
 0x440   :  { %v1060_v54 = vsel %vm1059_vm13, %v1058_v31, %v1056_v50 }
 0x441   :  { %1250 = vperm.xlu2 %1666, %v1201_v36   ;;  %1061 = vst [vmem:[#allocation11] sm:$0x1] %v1060_v54  ;;  %v1275_v47 = vsel %vm1003_vm2, %v1274_v38, %v1273_v61  ;;  %vm1478_vm2 = vcmask 0  }
 0x442   :  { %1492 = dma.vmem_to_hbm [thread:$0]  %s1488_s21, 16, %s1490_s24, [#allocation7]  }
 0x445   :  { %v1239_v43 = vpop.permute.xlu0 %1238 }
 0x446   :  { %v1233_v29 = vpop.permute.xlu1 %1232  ;;  %v1280_v56 = vperm.slane %v1239_v43, %v2974_v41 }
 0x447   :  { %v1276_v3 = vperm.slane %v1233_v29, %v2966_v44 }
 0x449   :  { %1259 = vperm.xlu2 %1666, %v1204_v21   ;;  %v1277_v2 = vsel %vm1007_vm10, %v1276_v3, %v1275_v47 }
 0x44e   :  { %v1236_v30 = vpop.permute.xlu1 %1235 }
 0x44f   :  { %v1278_v45 = vperm.slane %v1236_v30, %v2971_v9 }
 0x451   :  { %v1279_v26 = vsel %vm1011_vm15, %v1278_v45, %v1277_v2  ;;  %1268 = vperm.xlu2 %1666, %v1207_v33  }
 0x452   :  { %v1281_v17 = vsel %vm1015_vm9, %v1280_v56, %v1279_v26 }
 0x456   :  { %v1242_v44 = vpop.permute.xlu1 %1241 }
 0x457   :  { %v1282_v48 = vperm.slane %v1242_v44, %v2991_v23  ;;  %v1254_v23 = vpop.permute.xlu0 %1253 }
 0x458   :  { %v1290_v10 = vperm.slane %v1254_v23, %v3016_v14 }
 0x459   :  { %v1283_v9 = vsel %vm1019_vm0, %v1282_v48, %v1281_v17 }
 0x45e   :  { %v1248_v59 = vpop.permute.xlu1 %1247 }
 0x45f   :  { %v1286_v51 = vperm.slane %v1248_v59, %v2998_v32  ;;  %v1263_v37 = vpop.permute.xlu0 %1262 }
 0x460   :  { %v1296_v32 = vperm.slane %v1263_v37, %v3033_v11 }
 0x466   :  { %v1257_v8 = vpop.permute.xlu1 %1256 }
 0x467   :  { %v1272_v18 = vpop.permute.xlu0 %1271 }
 0x46e   :  { %v1266_v28 = vpop.permute.xlu1 %1265 }
 0x46f   :  { %v1298_v62 = vperm.slane %v1266_v28, %v3036_v5 }
 0x494   :  { %v1469_v41 = vpop.xlane.xlu2 %1468 }
 0x495   :  { %v1470_v6 = vrot.slane %v1469_v41, 4 }
 0x497   :  { %v1471_v15 = vadd.f32 %v1470_v6, %v1469_v41 }
 0x499   :  { %v1472_v60 = vrot.slane %v1471_v15, 2 }
 0x49b   :  { %v1473_v42 = vadd.f32 %v1472_v60, %v1471_v15 }
 0x49c   :  { %v1245_v19 = vpop.permute.xlu2 %1244 }
 0x49d   :  { %v1474_v53 = vrot.slane %v1473_v42, 1  ;;  %v1284_v4 = vperm.slane %v1245_v19, %v2995_v22  ;;  %v1292_v22 = vperm.slane %v1257_v8, %v3019_v24 }
 0x49f   :  { %v1475_v63 = vadd.f32 %v1474_v53, %v1473_v42  ;;  %v1285_v25 = vsel %vm1023_vm8, %v1284_v4, %v1283_v9 }
 0x4a0   :  { %v1287_v13 = vsel %vm1027_vm3, %v1286_v51, %v1285_v25 }
 0x4a1   :  { %1629 = vpush %v1475_v63 }
 0x4a4   :  { %v1251_v39 = vpop.permute.xlu2 %1250 }
 0x4a5   :  { %v1288_v20 = vperm.slane %v1251_v39, %v3012_v12 }
 0x4a7   :  { %v1289_v52 = vsel %vm1031_vm4, %v1288_v20, %v1287_v13 }
 0x4a8   :  { %v1291_v7 = vsel %vm1035_vm11, %v1290_v10, %v1289_v52 }
 0x4a9   :  { %v1293_v40 = vsel %vm1039_vm12, %v1292_v22, %v1291_v7 }
 0x4ac   :  { %v1260_v27 = vpop.permute.xlu2 %1259 }
 0x4ad   :  { %v1294_v58 = vperm.slane %v1260_v27, %v3029_v0  ;;  %v1302_v0 = vperm.slane %v1272_v18, %v3051_v16 }
 0x4af   :  { %v1295_v12 = vsel %vm1043_vm14, %v1294_v58, %v1293_v40 }
 0x4b0   :  { %v1297_v14 = vsel %vm1047_vm5, %v1296_v32, %v1295_v12 }
 0x4b1   :  { %v1299_v11 = vsel %vm1051_vm6, %v1298_v62, %v1297_v14 }
 0x4b4   :  { %v1269_v1 = vpop.permute.xlu2 %1268 }
 0x4b5   :  { %v1300_v24 = vperm.slane %v1269_v1, %v3047_v55 }
 0x4b7   :  { %v1301_v31 = vsel %vm1055_vm7, %v1300_v24, %v1299_v11 }
 0x4b8   :  { %v1303_v57 = vsel %vm1059_vm13, %v1302_v0, %v1301_v31 }
 0x4b9   :  { %1305 = vst [vmem:[#allocation12] sm:$0x1] %v1303_v57 }
 0x4ba   :  { %1503 = dma.vmem_to_hbm [thread:$0]  %s1499_s25, 16, %s1501_s28, [#allocation13]  }
 0x4d2   :  { %s1630_s10 = spop %1629 }
 0x4d3   :  { %v1477_v5 = vstv %s1630_s10 }
 0x4d4   :  { %1479 = vst.msk [vmem:[#allocation14] sm:$0x1] %vm1478_vm2, %v1477_v5 }
 0x4d5   :  { %1514 = dma.vmem_to_hbm [thread:$0]  %s1510_s6, 16, %s1512_s8, [#allocation13]  }
 0x4d6   :  { %1820 = dma.done.wait [#allocation7], 16  }
 0x4d7   :  { %1821 = vsyncadd [#allocation7], 4294967280 }
 0x4d8   :  { %1822 = dma.done.wait [#allocation13], 32  }
 0x4d9   :  { %1823 = vsyncadd [#allocation13], 4294967264 }
 0x4da   :  { %1529 = vsyncpa [#allocation6], 1 }
 0x4db   :  { %1530 = vsyncpa [#allocation9], 1 }
 0x4dc   :  { %1531 = vsyncpa [#allocation7], 1 }
 0x4dd   :  { %1532 = vsyncpa [#allocation13], 1 }

</bundles_post_ra>
